<compile_context>
chip_gen: v7x
topology: tpu7x:2x2x1
jax: 0.10.0
libtpu: 0.0.40
codegen_flags: <defaults>
</compile_context>

<pallas_src>
import functools
import math

import jax
import jax.numpy as jnp
from jax.experimental import pallas as pl
from jax.experimental.pallas import tpu as pltpu

EPS = 1e-5


# -----------------------------------------------------------------------------------------
# Kernel A: 3x3 conv (one fused MXU matmul over the 3 kd taps x banded kh weights) + bias
# + ReLU (bf16 out), plus masked partial BatchNorm statistics.
# The previous layer's BatchNorm and the h-halo-column zeroing are folded into the input
# path as a per-column affine (isc/ish); `apply_affine` is a static flag — layer 1's input
# is already zero at every invalid position, so it skips the affine + row-mask VPU passes.
# -----------------------------------------------------------------------------------------
def _conv_relu_stats_kernel(x_ref, isc_ref, ish_ref, rm_ref, w_ref, b_ref, ocm_ref,
                            y_ref, stat_ref, *, apply_affine):
    rm = rm_ref[...]                                        # (TR, 1) row validity
    xf = x_ref[...].astype(jnp.float32)
    if apply_affine:
        # prev-layer BN + halo-column zeroing (folded into isc/ish) + halo/pad-row zeroing.
        xf = (xf * isc_ref[...] + ish_ref[...]) * rm

    tr = xf.shape[0]
    # kd = 0,1,2 taps: the (kd-1) input-row offset is a sublane rotation; wrapped rows only
    # ever land in d-halo output rows, which are masked out downstream.  All three taps are
    # fused into a single MXU matmul with K = 3 * ci_cols.  (Rolls stay in f32: static
    # sublane rotation of packed bf16 is avoided for lowering safety.)
    x0 = pltpu.roll(xf, 1, axis=0)                          # row r <- x[r-1]
    x2 = pltpu.roll(xf, tr - 1, axis=0)                     # row r <- x[r+1]
    xcat = jnp.concatenate([x0, xf, x2], axis=1).astype(jnp.bfloat16)

    acc = jnp.dot(xcat, w_ref[...], preferred_element_type=jnp.float32)
    y = jnp.maximum(acc + b_ref[...], 0.0)                  # conv bias + ReLU (f32)
    y_ref[...] = y.astype(y_ref.dtype)                      # bf16 inter-layer activation

    # Masked partial BN statistics: rm masks invalid rows; the (1, co_cols) column mask is
    # applied AFTER the reduction instead of materializing a full-tile mask.  Only rows 0/1
    # of the (8, co_cols) stats block carry data; the rest is never read by the combine.
    ym = y * rm
    ocm = ocm_ref[...]
    stat_ref[0:1, :] = jnp.sum(ym, axis=0, keepdims=True) * ocm       # masked sum
    stat_ref[1:2, :] = jnp.sum(ym * y, axis=0, keepdims=True) * ocm   # masked sum of squares


# -----------------------------------------------------------------------------------------
# Kernel B: final BatchNorm apply — one FMA per element, bf16 in / bf16 out, in place.
# -----------------------------------------------------------------------------------------
def _bn_apply_kernel(y_ref, sc_ref, sh_ref, o_ref):
    y = y_ref[...].astype(jnp.float32)
    o_ref[...] = (y * sc_ref[...] + sh_ref[...]).astype(o_ref.dtype)


def _conv_pass(xrow, in_scale, in_shift, rowmask, band, bias_row, out_cmask,
               tr, apply_affine, vmem_limit):
    rp, ci_cols = xrow.shape
    co_cols = band.shape[1]
    ntiles = rp // tr
    kernel = functools.partial(_conv_relu_stats_kernel, apply_affine=apply_affine)
    return pl.pallas_call(
        kernel,
        out_shape=(
            jax.ShapeDtypeStruct((rp, co_cols), jnp.bfloat16),         # conv+ReLU (bf16)
            jax.ShapeDtypeStruct((ntiles * 8, co_cols), jnp.float32),  # stats (rows 0/1 used)
        ),
        grid=(ntiles,),
        in_specs=[
            pl.BlockSpec((tr, ci_cols), lambda i: (i, 0)),             # activation rows
            pl.BlockSpec((1, ci_cols), lambda i: (0, 0)),              # folded-BN scale
            pl.BlockSpec((1, ci_cols), lambda i: (0, 0)),              # folded-BN shift
            pl.BlockSpec((tr, 1), lambda i: (i, 0)),                   # row validity mask
            pl.BlockSpec((3 * ci_cols, co_cols), lambda i: (0, 0)),    # fused banded weights
            pl.BlockSpec((1, co_cols), lambda i: (0, 0)),              # bias row
            pl.BlockSpec((1, co_cols), lambda i: (0, 0)),              # output column mask
        ],
        out_specs=(
            pl.BlockSpec((tr, co_cols), lambda i: (i, 0)),
            pl.BlockSpec((8, co_cols), lambda i: (i, 0)),
        ),
        compiler_params=pltpu.CompilerParams(
            dimension_semantics=("parallel",),
            vmem_limit_bytes=vmem_limit,
        ),
    )(xrow, in_scale, in_shift, rowmask, band, bias_row, out_cmask)


def _bn_pass(yrow, scale_row, shift_row, tr, vmem_limit):
    rp, co_cols = yrow.shape
    ntiles = rp // tr
    return pl.pallas_call(
        _bn_apply_kernel,
        out_shape=jax.ShapeDtypeStruct((rp, co_cols), yrow.dtype),
        grid=(ntiles,),
        in_specs=[
            pl.BlockSpec((tr, co_cols), lambda i: (i, 0)),
            pl.BlockSpec((1, co_cols), lambda i: (0, 0)),
            pl.BlockSpec((1, co_cols), lambda i: (0, 0)),
        ],
        out_specs=pl.BlockSpec((tr, co_cols), lambda i: (i, 0)),
        input_output_aliases={0: 0},                       # normalize y2 in place (no new slab)
        compiler_params=pltpu.CompilerParams(
            dimension_semantics=("parallel",),
            vmem_limit_bytes=vmem_limit,
        ),
    )(yrow, scale_row, shift_row)


# --------------------------------- wrapper helpers ---------------------------------------
def _band_weights(w, H):
    """(Co, Ci, 3, 3, 1) Conv3d weight -> (3*(H+2)*Ci, (H+2)*Co) fused banded bf16 matrix.

    band[kd*(Hp*Ci) + (h_in, ci), (h_out, co)] = w[co, ci, kd, h_in - h_out + 1] (0 outside
    the band), so one MXU matmul of the three kd-shifted activation copies performs the
    whole 3x3 x Ci contraction for every padded-h output column.
    """
    co, ci = w.shape[0], w.shape[1]
    hp = H + 2
    w4 = jnp.transpose(w[..., 0], (2, 3, 1, 0))                   # (kd, kh, Ci, Co)
    h_in = jnp.arange(hp)[:, None]
    h_out = jnp.arange(hp)[None, :]
    kh = h_in - h_out + 1                                         # (Hp, Hp)
    valid = (kh >= 0) & (kh <= 2)
    sel = w4[:, jnp.clip(kh, 0, 2)]                               # (3, Hp, Hp, Ci, Co)
    sel = jnp.where(valid[None, :, :, None, None], sel, 0.0)
    band = jnp.transpose(sel, (0, 1, 3, 2, 4)).reshape(3 * hp * ci, hp * co)
    return band.astype(jnp.bfloat16)


def _tile_rows(vec, hp):
    # per-channel vector -> (1, hp*C) row matching the (h_padded major, chan minor) columns.
    return jnp.tile(vec.astype(jnp.float32), hp).reshape(1, -1)


def _col_mask(H, c):
    hp = H + 2
    hv = (jnp.arange(hp) >= 1) & (jnp.arange(hp) <= H)
    return jnp.repeat(hv, c).astype(jnp.float32).reshape(1, hp * c)


def _bn_scale_shift(stats, count, gamma, beta, hp, co):
    # rows 0/1 of every per-tile (8, co_cols) stats block carry masked sum / sum-of-squares.
    st = stats.reshape(-1, 8, stats.shape[-1])
    s = jnp.sum(st[:, 0, :], axis=0).reshape(hp, co).sum(axis=0)    # (Co,)
    q = jnp.sum(st[:, 1, :], axis=0).reshape(hp, co).sum(axis=0)
    mean = s / count
    var = jnp.maximum(q / count - mean * mean, 0.0)                 # biased variance (train)
    scale = gamma.astype(jnp.float32) * jax.lax.rsqrt(var + EPS)
    shift = beta.astype(jnp.float32) - mean * scale
    return scale, shift


def _vmem_capacity_bytes():
    try:
        return int(pltpu.get_tpu_info().vmem_capacity_bytes)
    except Exception:
        return 64 * 1024 * 1024


def conv_block_forward(x, p, tile_images=None):
    # TODO(synk): BatchNorm running-stat buffer updates (training side effect) are not
    # modeled; they do not affect the forward output in train mode.
    N, C, D, H, W = x.shape
    co = p["w1"].shape[0]
    B = N * W
    dp, hp = D + 2, H + 2
    ci_cols, co_cols = hp * C, hp * co

    # TODO(synk): for production channel counts (Ci=Co>=128 at H~16) the banded weights
    # (6*hp^2*Ci*Co bytes bf16) exceed the per-tile VMEM budget (notably v7x's 64 MiB) and
    # inflate MXU FLOPs by ~hp/3; switch to an h-tiled band / per-(kd,kh) (Ci,Co) GEMM path.
    assert 6 * hp * hp * co * max(C, co) <= 8 * (1 << 20), (
        "banded-weight conv path would blow the VMEM budget; needs the h-tiled fallback")

    vmem_cap = _vmem_capacity_bytes()
    big_vmem = vmem_cap > 80 * 1024 * 1024             # v5e/v6e (128 MiB) vs v7x (64 MiB)
    vmem_limit = (96 if big_vmem else 64) * 1024 * 1024
    tile_out_bytes = (8 if big_vmem else 2) * 1024 * 1024   # bf16 conv-output bytes per tile

    # Row tile: TR = tb*dp rows must be a multiple of 16 (bf16 sublane packing).
    step = 16 // math.gcd(dp, 16)
    max_tb = -(-B // step) * step
    if tile_images is None:
        target_rows = max(step * dp, tile_out_bytes // (co_cols * 2))
        tb = max(step, (target_rows // dp) // step * step)
    else:
        tb = max(step, -(-tile_images // step) * step)
    tb = min(tb, max_tb)
    # Prefer >= 2 grid tiles so the "parallel" axis can feed both v7x TensorCores.
    if -(-B // tb) < 2 and max_tb >= 2 * step:
        tb = max(step, -(-(max_tb // 2) // step) * step)
    b_pad = -(-B // tb) * tb
    tr = tb * dp

    # Channels-last rows (bf16): one row per (b=N*W image, d_padded), columns =
    # (h_padded major, channel minor).  Zero padding is baked in here, so layer 1 needs no
    # input affine / masking at all.
    xcl = jnp.transpose(x, (0, 4, 2, 3, 1)).reshape(B, D, H, C)
    xrow = jnp.pad(xcl, ((0, b_pad - B), (1, 1), (1, 1), (0, 0)))
    xrow = xrow.reshape(b_pad * dp, ci_cols).astype(jnp.bfloat16)

    # Row validity (excludes d-halo rows and batch-padding images).  Kept as a tiny DMA'd
    # (rows, 1) stream: generating it in-kernel needs an integer div/mod or a packed-iota
    # reshape, which is not worth the lowering risk for a few KB per tile.
    d_valid = (jnp.arange(dp) >= 1) & (jnp.arange(dp) <= D)
    b_valid = jnp.arange(b_pad) < B
    rowmask = (b_valid[:, None] & d_valid[None, :]).astype(jnp.float32)
    rowmask = rowmask.reshape(b_pad * dp, 1)
    cmask_out = _col_mask(H, co)
    count = float(B * D * H)

    band1 = _band_weights(p["w1"], H)
    band2 = _band_weights(p["w2"], H)
    bias1 = _tile_rows(p["b1"], hp)
    bias2 = _tile_rows(p["b2"], hp)
    ones_in = jnp.ones((1, ci_cols), jnp.float32)
    zeros_in = jnp.zeros((1, ci_cols), jnp.float32)

    # ---- layer 1: conv + bias + ReLU (bf16 out) + partial BN stats ----------------------
    y1, st1 = _conv_pass(xrow, ones_in, zeros_in, rowmask, band1, bias1, cmask_out,
                         tr, apply_affine=False, vmem_limit=vmem_limit)
    scale1, shift1 = _bn_scale_shift(st1, count, p["g1"], p["beta1"], hp, co)

    # ---- layer 2: layer-1 BN + halo-column zeroing folded into the input affine ---------
    isc2 = _tile_rows(scale1, hp) * cmask_out
    ish2 = _tile_rows(shift1, hp) * cmask_out
    y2, st2 = _conv_pass(y1, isc2, ish2, rowmask, band2, bias2, cmask_out,
                         tr, apply_affine=True, vmem_limit=vmem_limit)
    scale2, shift2 = _bn_scale_shift(st2, count, p["g2"], p["beta2"], hp, co)

    # ---- final BatchNorm apply (in place over y2, bf16 I/O) ------------------------------
    # TODO(synk): when Conv_blocks are chained, fold scale2/shift2 into the next block's
    # layer-1 input affine (keeping the row layout) instead, eliminating this pass and the
    # NCDHW transposes entirely.
    out_rows = _bn_pass(y2, _tile_rows(scale2, hp), _tile_rows(shift2, hp),
                        tr, vmem_limit=vmem_limit)

    out = out_rows.reshape(b_pad, dp, hp, co)[:B, 1:D + 1, 1:H + 1, :]
    out = out.reshape(N, W, D, H, co)
    return jnp.transpose(out, (0, 4, 2, 3, 1)).astype(jnp.float32)   # back to NCDHW, f32


# ----------------------- pure-JAX reference (for the sanity check) -----------------------
def _ref_layer(x, w, b, gamma, beta):
    y = jax.lax.conv_general_dilated(
        x, w, window_strides=(1, 1, 1),
        padding=((1, 1), (1, 1), (0, 0)),
        dimension_numbers=("NCDHW", "OIDHW", "NCDHW"))
    y = y + b.reshape(1, -1, 1, 1, 1)
    y = jnp.maximum(y, 0.0)
    mean = jnp.mean(y, axis=(0, 2, 3, 4), keepdims=True)
    var = jnp.mean((y - mean) ** 2, axis=(0, 2, 3, 4), keepdims=True)
    return ((y - mean) * jax.lax.rsqrt(var + EPS)
            * gamma.reshape(1, -1, 1, 1, 1) + beta.reshape(1, -1, 1, 1, 1))


def _ref_block(x, p):
    x = _ref_layer(x, p["w1"], p["b1"], p["g1"], p["beta1"])
    x = _ref_layer(x, p["w2"], p["b2"], p["g2"], p["beta2"])
    return x


if __name__ == "__main__":
    # B = N*W = 16 images -> two 8-image row tiles: exercises the multi-tile partial-stats
    # path and gives the "parallel" grid two blocks (v7x megacore).
    N, Cin, Cout, D, H, W = 2, 4, 8, 16, 16, 8
    key = jax.random.PRNGKey(0)
    k1, k2, k3, k4, kx = jax.random.split(key, 5)

    params = {
        "w1": jax.random.normal(k1, (Cout, Cin, 3, 3, 1), jnp.float32) * 0.1,
        "b1": jax.random.normal(k2, (Cout,), jnp.float32) * 0.1,
        "w2": jax.random.normal(k3, (Cout, Cout, 3, 3, 1), jnp.float32) * 0.1,
        "b2": jax.random.normal(k4, (Cout,), jnp.float32) * 0.1,
        # BatchNorm3d affine params at PyTorch init: weight=1, bias=0
        "g1": jnp.ones((Cout,), jnp.float32),
        "beta1": jnp.zeros((Cout,), jnp.float32),
        "g2": jnp.ones((Cout,), jnp.float32),
        "beta2": jnp.zeros((Cout,), jnp.float32),
    }

    x = jax.random.normal(kx, (N, Cin, D, H, W), jnp.float32)

    fwd = jax.jit(conv_block_forward)
    out = jax.block_until_ready(fwd(x, params))
    ref = jax.block_until_ready(_ref_block(x, params))

    assert out.shape == (N, Cout, D, H, W)
    # bf16 activations + bf16 MXU matmuls (f32 accumulation) -> looser tolerance than f32.
    max_err = float(jnp.max(jnp.abs(out - ref)))
    assert jnp.allclose(out, ref, rtol=1e-1, atol=1e-1), max_err
    print("KERNEL_OK")
</pallas_src>

<mosaic_0001>
module attributes {stable_mosaic.version = 11 : i64} {
  func.func @_conv_relu_stats_kernel(%arg0: i32, %arg1: memref<144x72xbf16, #tpu.memory_space<vmem>>, %arg2: memref<1x72xf32, #tpu.memory_space<vmem>>, %arg3: memref<1x72xf32, #tpu.memory_space<vmem>>, %arg4: memref<144x1xf32, #tpu.memory_space<vmem>>, %arg5: memref<216x144xbf16, #tpu.memory_space<vmem>>, %arg6: memref<1x144xf32, #tpu.memory_space<vmem>>, %arg7: memref<1x144xf32, #tpu.memory_space<vmem>>, %arg8: memref<144x144xbf16, #tpu.memory_space<vmem>>, %arg9: memref<8x144xf32, #tpu.memory_space<vmem>>) attributes {dimension_semantics = [#tpu.dimension_semantics<parallel>], iteration_bounds = array<i64: 2>, scalar_prefetch = 0 : i64, scratch_operands = 0 : i64, tpu.core_type = #tpu.core_type<tc>, window_params = [{transform_indices = @transform_0, window_bounds = array<i64: 144, 72>}, {pipeline_mode = #tpu.pipeline_mode<synchronous>, transform_indices = @transform_1, window_bounds = array<i64: 1, 72>}, {pipeline_mode = #tpu.pipeline_mode<synchronous>, transform_indices = @transform_2, window_bounds = array<i64: 1, 72>}, {transform_indices = @transform_3, window_bounds = array<i64: 144, 1>}, {pipeline_mode = #tpu.pipeline_mode<synchronous>, transform_indices = @transform_4, window_bounds = array<i64: 216, 144>}, {pipeline_mode = #tpu.pipeline_mode<synchronous>, transform_indices = @transform_5, window_bounds = array<i64: 1, 144>}, {pipeline_mode = #tpu.pipeline_mode<synchronous>, transform_indices = @transform_6, window_bounds = array<i64: 1, 144>}, {transform_indices = @transform_7, window_bounds = array<i64: 144, 144>}, {transform_indices = @transform_8, window_bounds = array<i64: 8, 144>}]} {
    %c0 = arith.constant 0 : index
    %c0_0 = arith.constant 0 : index
    %0 = vector.load %arg4[%c0, %c0_0] : memref<144x1xf32, #tpu.memory_space<vmem>>, vector<144x1xf32>
    %c0_1 = arith.constant 0 : index
    %c0_2 = arith.constant 0 : index
    %1 = vector.load %arg1[%c0_1, %c0_2] : memref<144x72xbf16, #tpu.memory_space<vmem>>, vector<144x72xbf16>
    %2 = arith.extf %1 : vector<144x72xbf16> to vector<144x72xf32>
    %c1_i32 = arith.constant 1 : i32
    %3 = tpu.dynamic_rotate %2 by %c1_i32 dim 0 : vector<144x72xf32>, i32 -> vector<144x72xf32>
    %c143_i32 = arith.constant 143 : i32
    %4 = tpu.dynamic_rotate %2 by %c143_i32 dim 0 : vector<144x72xf32>, i32 -> vector<144x72xf32>
    %5 = tpu.concatenate %3, %2, %4 in 1 : vector<144x72xf32>, vector<144x72xf32>, vector<144x72xf32> -> vector<144x216xf32>
    %6 = arith.truncf %5 : vector<144x216xf32> to vector<144x216xbf16>
    %c0_3 = arith.constant 0 : index
    %c0_4 = arith.constant 0 : index
    %7 = vector.load %arg5[%c0_3, %c0_4] : memref<216x144xbf16, #tpu.memory_space<vmem>>, vector<216x144xbf16>
    %cst = arith.constant dense<0.000000e+00> : vector<144x144xf32>
    %8 = tpu.matmul %6, %7, %cst {dimension_numbers = #tpu.dot_dimension_numbers<[1], [0], [0], [1], [0, 0, 1, 1], [], []>} : vector<144x216xbf16>, vector<216x144xbf16>, vector<144x144xf32> -> vector<144x144xf32>
    %c0_5 = arith.constant 0 : index
    %c0_6 = arith.constant 0 : index
    %9 = vector.load %arg6[%c0_5, %c0_6] : memref<1x144xf32, #tpu.memory_space<vmem>>, vector<1x144xf32>
    %10 = vector.broadcast %9 : vector<1x144xf32> to vector<144x144xf32>
    %11 = arith.addf %8, %10 : vector<144x144xf32>
    %cst_7 = arith.constant 0.000000e+00 : f32
    %12 = vector.broadcast %cst_7 : f32 to vector<144x144xf32>
    %13 = arith.maximumf %11, %12 : vector<144x144xf32>
    %14 = arith.truncf %13 : vector<144x144xf32> to vector<144x144xbf16>
    %c0_8 = arith.constant 0 : index
    %c0_9 = arith.constant 0 : index
    %15 = vector.load %arg8[%c0_8, %c0_9] : memref<144x144xbf16, #tpu.memory_space<vmem>>, vector<144x144xbf16>
    tpu.vector_store %arg8[%c0_8, %c0_9], %14 {strides = array<i32>} : memref<144x144xbf16, #tpu.memory_space<vmem>>, vector<144x144xbf16>,
    %16 = vector.broadcast %0 : vector<144x1xf32> to vector<144x144xf32>
    %17 = arith.mulf %13, %16 : vector<144x144xf32>
    %c0_10 = arith.constant 0 : index
    %c0_11 = arith.constant 0 : index
    %18 = vector.load %arg7[%c0_10, %c0_11] : memref<1x144xf32, #tpu.memory_space<vmem>>, vector<1x144xf32>
    %cst_12 = arith.constant dense<0.000000e+00> : vector<144xf32>
    %19 = vector.multi_reduction <add>, %17, %cst_12 [0] : vector<144x144xf32> to vector<144xf32>
    %20 = vector.shape_cast %19 : vector<144xf32> to vector<1x144xf32>
    %21 = arith.mulf %20, %18 : vector<1x144xf32>
    %c0_13 = arith.constant 0 : index
    %c0_14 = arith.constant 0 : index
    %22 = vector.load %arg9[%c0_13, %c0_14] : memref<8x144xf32, #tpu.memory_space<vmem>>, vector<1x144xf32>
    tpu.vector_store %arg9[%c0_13, %c0_14], %21 {strides = array<i32>} : memref<8x144xf32, #tpu.memory_space<vmem>>, vector<1x144xf32>,
    %23 = arith.mulf %17, %13 : vector<144x144xf32>
    %cst_15 = arith.constant dense<0.000000e+00> : vector<144xf32>
    %24 = vector.multi_reduction <add>, %23, %cst_15 [0] : vector<144x144xf32> to vector<144xf32>
    %25 = vector.shape_cast %24 : vector<144xf32> to vector<1x144xf32>
    %26 = arith.mulf %25, %18 : vector<1x144xf32>
    %c1 = arith.constant 1 : index
    %c0_16 = arith.constant 0 : index
    %27 = vector.load %arg9[%c1, %c0_16] : memref<8x144xf32, #tpu.memory_space<vmem>>, vector<1x144xf32>
    tpu.vector_store %arg9[%c1, %c0_16], %26 {strides = array<i32>} : memref<8x144xf32, #tpu.memory_space<vmem>>, vector<1x144xf32>,
    return
  }
  func.func @transform_0(%arg0: i32) -> (i32, i32) {
    %c0_i32 = arith.constant 0 : i32
    %c0_i32_0 = arith.constant 0 : i32
    return %arg0, %c0_i32 : i32, i32
  }
  func.func @transform_1(%arg0: i32) -> (i32, i32) {
    %c0_i32 = arith.constant 0 : i32
    %c0_i32_0 = arith.constant 0 : i32
    %c0_i32_1 = arith.constant 0 : i32
    return %c0_i32, %c0_i32_0 : i32, i32
  }
  func.func @transform_2(%arg0: i32) -> (i32, i32) {
    %c0_i32 = arith.constant 0 : i32
    %c0_i32_0 = arith.constant 0 : i32
    %c0_i32_1 = arith.constant 0 : i32
    return %c0_i32, %c0_i32_0 : i32, i32
  }
  func.func @transform_3(%arg0: i32) -> (i32, i32) {
    %c0_i32 = arith.constant 0 : i32
    %c0_i32_0 = arith.constant 0 : i32
    return %arg0, %c0_i32 : i32, i32
  }
  func.func @transform_4(%arg0: i32) -> (i32, i32) {
    %c0_i32 = arith.constant 0 : i32
    %c0_i32_0 = arith.constant 0 : i32
    %c0_i32_1 = arith.constant 0 : i32
    return %c0_i32, %c0_i32_0 : i32, i32
  }
  func.func @transform_5(%arg0: i32) -> (i32, i32) {
    %c0_i32 = arith.constant 0 : i32
    %c0_i32_0 = arith.constant 0 : i32
    %c0_i32_1 = arith.constant 0 : i32
    return %c0_i32, %c0_i32_0 : i32, i32
  }
  func.func @transform_6(%arg0: i32) -> (i32, i32) {
    %c0_i32 = arith.constant 0 : i32
    %c0_i32_0 = arith.constant 0 : i32
    %c0_i32_1 = arith.constant 0 : i32
    return %c0_i32, %c0_i32_0 : i32, i32
  }
  func.func @transform_7(%arg0: i32) -> (i32, i32) {
    %c0_i32 = arith.constant 0 : i32
    %c0_i32_0 = arith.constant 0 : i32
    return %arg0, %c0_i32 : i32, i32
  }
  func.func @transform_8(%arg0: i32) -> (i32, i32) {
    %c0_i32 = arith.constant 0 : i32
    %c0_i32_0 = arith.constant 0 : i32
    return %arg0, %c0_i32 : i32, i32
  }
}

module attributes {stable_mosaic.version = 11 : i64} {
  func.func @_conv_relu_stats_kernel(%arg0: i32, %arg1: memref<144x144xbf16, #tpu.memory_space<vmem>>, %arg2: memref<1x144xf32, #tpu.memory_space<vmem>>, %arg3: memref<1x144xf32, #tpu.memory_space<vmem>>, %arg4: memref<144x1xf32, #tpu.memory_space<vmem>>, %arg5: memref<432x144xbf16, #tpu.memory_space<vmem>>, %arg6: memref<1x144xf32, #tpu.memory_space<vmem>>, %arg7: memref<1x144xf32, #tpu.memory_space<vmem>>, %arg8: memref<144x144xbf16, #tpu.memory_space<vmem>>, %arg9: memref<8x144xf32, #tpu.memory_space<vmem>>) attributes {dimension_semantics = [#tpu.dimension_semantics<parallel>], iteration_bounds = array<i64: 2>, scalar_prefetch = 0 : i64, scratch_operands = 0 : i64, tpu.core_type = #tpu.core_type<tc>, window_params = [{transform_indices = @transform_0, window_bounds = array<i64: 144, 144>}, {pipeline_mode = #tpu.pipeline_mode<synchronous>, transform_indices = @transform_1, window_bounds = array<i64: 1, 144>}, {pipeline_mode = #tpu.pipeline_mode<synchronous>, transform_indices = @transform_2, window_bounds = array<i64: 1, 144>}, {transform_indices = @transform_3, window_bounds = array<i64: 144, 1>}, {pipeline_mode = #tpu.pipeline_mode<synchronous>, transform_indices = @transform_4, window_bounds = array<i64: 432, 144>}, {pipeline_mode = #tpu.pipeline_mode<synchronous>, transform_indices = @transform_5, window_bounds = array<i64: 1, 144>}, {pipeline_mode = #tpu.pipeline_mode<synchronous>, transform_indices = @transform_6, window_bounds = array<i64: 1, 144>}, {transform_indices = @transform_7, window_bounds = array<i64: 144, 144>}, {transform_indices = @transform_8, window_bounds = array<i64: 8, 144>}]} {
    %c0 = arith.constant 0 : index
    %c0_0 = arith.constant 0 : index
    %0 = vector.load %arg4[%c0, %c0_0] : memref<144x1xf32, #tpu.memory_space<vmem>>, vector<144x1xf32>
    %c0_1 = arith.constant 0 : index
    %c0_2 = arith.constant 0 : index
    %1 = vector.load %arg1[%c0_1, %c0_2] : memref<144x144xbf16, #tpu.memory_space<vmem>>, vector<144x144xbf16>
    %2 = arith.extf %1 : vector<144x144xbf16> to vector<144x144xf32>
    %c0_3 = arith.constant 0 : index
    %c0_4 = arith.constant 0 : index
    %3 = vector.load %arg2[%c0_3, %c0_4] : memref<1x144xf32, #tpu.memory_space<vmem>>, vector<1x144xf32>
    %4 = vector.broadcast %3 : vector<1x144xf32> to vector<144x144xf32>
    %5 = arith.mulf %2, %4 : vector<144x144xf32>
    %c0_5 = arith.constant 0 : index
    %c0_6 = arith.constant 0 : index
    %6 = vector.load %arg3[%c0_5, %c0_6] : memref<1x144xf32, #tpu.memory_space<vmem>>, vector<1x144xf32>
    %7 = vector.broadcast %6 : vector<1x144xf32> to vector<144x144xf32>
    %8 = arith.addf %5, %7 : vector<144x144xf32>
    %9 = vector.broadcast %0 : vector<144x1xf32> to vector<144x144xf32>
    %10 = arith.mulf %8, %9 : vector<144x144xf32>
    %c1_i32 = arith.constant 1 : i32
    %11 = tpu.dynamic_rotate %10 by %c1_i32 dim 0 : vector<144x144xf32>, i32 -> vector<144x144xf32>
    %c143_i32 = arith.constant 143 : i32
    %12 = tpu.dynamic_rotate %10 by %c143_i32 dim 0 : vector<144x144xf32>, i32 -> vector<144x144xf32>
    %13 = tpu.concatenate %11, %10, %12 in 1 : vector<144x144xf32>, vector<144x144xf32>, vector<144x144xf32> -> vector<144x432xf32>
    %14 = arith.truncf %13 : vector<144x432xf32> to vector<144x432xbf16>
    %c0_7 = arith.constant 0 : index
    %c0_8 = arith.constant 0 : index
    %15 = vector.load %arg5[%c0_7, %c0_8] : memref<432x144xbf16, #tpu.memory_space<vmem>>, vector<432x144xbf16>
    %cst = arith.constant dense<0.000000e+00> : vector<144x144xf32>
    %16 = tpu.matmul %14, %15, %cst {dimension_numbers = #tpu.dot_dimension_numbers<[1], [0], [0], [1], [0, 0, 1, 1], [], []>} : vector<144x432xbf16>, vector<432x144xbf16>, vector<144x144xf32> -> vector<144x144xf32>
    %c0_9 = arith.constant 0 : index
    %c0_10 = arith.constant 0 : index
    %17 = vector.load %arg6[%c0_9, %c0_10] : memref<1x144xf32, #tpu.memory_space<vmem>>, vector<1x144xf32>
    %18 = vector.broadcast %17 : vector<1x144xf32> to vector<144x144xf32>
    %19 = arith.addf %16, %18 : vector<144x144xf32>
    %cst_11 = arith.constant 0.000000e+00 : f32
    %20 = vector.broadcast %cst_11 : f32 to vector<144x144xf32>
    %21 = arith.maximumf %19, %20 : vector<144x144xf32>
    %22 = arith.truncf %21 : vector<144x144xf32> to vector<144x144xbf16>
    %c0_12 = arith.constant 0 : index
    %c0_13 = arith.constant 0 : index
    %23 = vector.load %arg8[%c0_12, %c0_13] : memref<144x144xbf16, #tpu.memory_space<vmem>>, vector<144x144xbf16>
    tpu.vector_store %arg8[%c0_12, %c0_13], %22 {strides = array<i32>} : memref<144x144xbf16, #tpu.memory_space<vmem>>, vector<144x144xbf16>,
    %24 = vector.broadcast %0 : vector<144x1xf32> to vector<144x144xf32>
    %25 = arith.mulf %21, %24 : vector<144x144xf32>
    %c0_14 = arith.constant 0 : index
    %c0_15 = arith.constant 0 : index
    %26 = vector.load %arg7[%c0_14, %c0_15] : memref<1x144xf32, #tpu.memory_space<vmem>>, vector<1x144xf32>
    %cst_16 = arith.constant dense<0.000000e+00> : vector<144xf32>
    %27 = vector.multi_reduction <add>, %25, %cst_16 [0] : vector<144x144xf32> to vector<144xf32>
    %28 = vector.shape_cast %27 : vector<144xf32> to vector<1x144xf32>
    %29 = arith.mulf %28, %26 : vector<1x144xf32>
    %c0_17 = arith.constant 0 : index
    %c0_18 = arith.constant 0 : index
    %30 = vector.load %arg9[%c0_17, %c0_18] : memref<8x144xf32, #tpu.memory_space<vmem>>, vector<1x144xf32>
    tpu.vector_store %arg9[%c0_17, %c0_18], %29 {strides = array<i32>} : memref<8x144xf32, #tpu.memory_space<vmem>>, vector<1x144xf32>,
    %31 = arith.mulf %25, %21 : vector<144x144xf32>
    %cst_19 = arith.constant dense<0.000000e+00> : vector<144xf32>
    %32 = vector.multi_reduction <add>, %31, %cst_19 [0] : vector<144x144xf32> to vector<144xf32>
    %33 = vector.shape_cast %32 : vector<144xf32> to vector<1x144xf32>
    %34 = arith.mulf %33, %26 : vector<1x144xf32>
    %c1 = arith.constant 1 : index
    %c0_20 = arith.constant 0 : index
    %35 = vector.load %arg9[%c1, %c0_20] : memref<8x144xf32, #tpu.memory_space<vmem>>, vector<1x144xf32>
    tpu.vector_store %arg9[%c1, %c0_20], %34 {strides = array<i32>} : memref<8x144xf32, #tpu.memory_space<vmem>>, vector<1x144xf32>,
    return
  }
  func.func @transform_0(%arg0: i32) -> (i32, i32) {
    %c0_i32 = arith.constant 0 : i32
    %c0_i32_0 = arith.constant 0 : i32
    return %arg0, %c0_i32 : i32, i32
  }
  func.func @transform_1(%arg0: i32) -> (i32, i32) {
    %c0_i32 = arith.constant 0 : i32
    %c0_i32_0 = arith.constant 0 : i32
    %c0_i32_1 = arith.constant 0 : i32
    return %c0_i32, %c0_i32_0 : i32, i32
  }
  func.func @transform_2(%arg0: i32) -> (i32, i32) {
    %c0_i32 = arith.constant 0 : i32
    %c0_i32_0 = arith.constant 0 : i32
    %c0_i32_1 = arith.constant 0 : i32
    return %c0_i32, %c0_i32_0 : i32, i32
  }
  func.func @transform_3(%arg0: i32) -> (i32, i32) {
    %c0_i32 = arith.constant 0 : i32
    %c0_i32_0 = arith.constant 0 : i32
    return %arg0, %c0_i32 : i32, i32
  }
  func.func @transform_4(%arg0: i32) -> (i32, i32) {
    %c0_i32 = arith.constant 0 : i32
    %c0_i32_0 = arith.constant 0 : i32
    %c0_i32_1 = arith.constant 0 : i32
    return %c0_i32, %c0_i32_0 : i32, i32
  }
  func.func @transform_5(%arg0: i32) -> (i32, i32) {
    %c0_i32 = arith.constant 0 : i32
    %c0_i32_0 = arith.constant 0 : i32
    %c0_i32_1 = arith.constant 0 : i32
    return %c0_i32, %c0_i32_0 : i32, i32
  }
  func.func @transform_6(%arg0: i32) -> (i32, i32) {
    %c0_i32 = arith.constant 0 : i32
    %c0_i32_0 = arith.constant 0 : i32
    %c0_i32_1 = arith.constant 0 : i32
    return %c0_i32, %c0_i32_0 : i32, i32
  }
  func.func @transform_7(%arg0: i32) -> (i32, i32) {
    %c0_i32 = arith.constant 0 : i32
    %c0_i32_0 = arith.constant 0 : i32
    return %arg0, %c0_i32 : i32, i32
  }
  func.func @transform_8(%arg0: i32) -> (i32, i32) {
    %c0_i32 = arith.constant 0 : i32
    %c0_i32_0 = arith.constant 0 : i32
    return %arg0, %c0_i32 : i32, i32
  }
}

module attributes {stable_mosaic.version = 11 : i64} {
  func.func @_bn_apply_kernel(%arg0: i32, %arg1: memref<144x144xbf16, #tpu.memory_space<vmem>>, %arg2: memref<1x144xf32, #tpu.memory_space<vmem>>, %arg3: memref<1x144xf32, #tpu.memory_space<vmem>>, %arg4: memref<144x144xbf16, #tpu.memory_space<vmem>>) attributes {dimension_semantics = [#tpu.dimension_semantics<parallel>], iteration_bounds = array<i64: 2>, scalar_prefetch = 0 : i64, scratch_operands = 0 : i64, tpu.core_type = #tpu.core_type<tc>, window_params = [{transform_indices = @transform_0, window_bounds = array<i64: 144, 144>}, {pipeline_mode = #tpu.pipeline_mode<synchronous>, transform_indices = @transform_1, window_bounds = array<i64: 1, 144>}, {pipeline_mode = #tpu.pipeline_mode<synchronous>, transform_indices = @transform_2, window_bounds = array<i64: 1, 144>}, {transform_indices = @transform_3, window_bounds = array<i64: 144, 144>}]} {
    %c0 = arith.constant 0 : index
    %c0_0 = arith.constant 0 : index
    %0 = vector.load %arg1[%c0, %c0_0] : memref<144x144xbf16, #tpu.memory_space<vmem>>, vector<144x144xbf16>
    %1 = arith.extf %0 : vector<144x144xbf16> to vector<144x144xf32>
    %c0_1 = arith.constant 0 : index
    %c0_2 = arith.constant 0 : index
    %2 = vector.load %arg2[%c0_1, %c0_2] : memref<1x144xf32, #tpu.memory_space<vmem>>, vector<1x144xf32>
    %3 = vector.broadcast %2 : vector<1x144xf32> to vector<144x144xf32>
    %4 = arith.mulf %1, %3 : vector<144x144xf32>
    %c0_3 = arith.constant 0 : index
    %c0_4 = arith.constant 0 : index
    %5 = vector.load %arg3[%c0_3, %c0_4] : memref<1x144xf32, #tpu.memory_space<vmem>>, vector<1x144xf32>
    %6 = vector.broadcast %5 : vector<1x144xf32> to vector<144x144xf32>
    %7 = arith.addf %4, %6 : vector<144x144xf32>
    %8 = arith.truncf %7 : vector<144x144xf32> to vector<144x144xbf16>
    %c0_5 = arith.constant 0 : index
    %c0_6 = arith.constant 0 : index
    %9 = vector.load %arg4[%c0_5, %c0_6] : memref<144x144xbf16, #tpu.memory_space<vmem>>, vector<144x144xbf16>
    tpu.vector_store %arg4[%c0_5, %c0_6], %8 {strides = array<i32>} : memref<144x144xbf16, #tpu.memory_space<vmem>>, vector<144x144xbf16>,
    return
  }
  func.func @transform_0(%arg0: i32) -> (i32, i32) {
    %c0_i32 = arith.constant 0 : i32
    %c0_i32_0 = arith.constant 0 : i32
    return %arg0, %c0_i32 : i32, i32
  }
  func.func @transform_1(%arg0: i32) -> (i32, i32) {
    %c0_i32 = arith.constant 0 : i32
    %c0_i32_0 = arith.constant 0 : i32
    %c0_i32_1 = arith.constant 0 : i32
    return %c0_i32, %c0_i32_0 : i32, i32
  }
  func.func @transform_2(%arg0: i32) -> (i32, i32) {
    %c0_i32 = arith.constant 0 : i32
    %c0_i32_0 = arith.constant 0 : i32
    %c0_i32_1 = arith.constant 0 : i32
    return %c0_i32, %c0_i32_0 : i32, i32
  }
  func.func @transform_3(%arg0: i32) -> (i32, i32) {
    %c0_i32 = arith.constant 0 : i32
    %c0_i32_0 = arith.constant 0 : i32
    return %arg0, %c0_i32 : i32, i32
  }
}

</mosaic_0001>

<bundles_post_ra>
// kernel: tile.33
= control target key start
LH: loop header
LB: loop body
LE: loop exit
PB: predicated region body
PF: predicated region fallthrough
CT: control target
= control target key end

     0   :  { %s34_s0 = inlined_call_operand.vmem [shape: f32[8], index: 0, kind: input, shape index: {}]   ;;  %s35_s1 = inlined_call_operand.vmem [shape: f32[18,8], index: 1, kind: output, shape index: {}]  }
   0x1   :  { %v4_v0 = vld [vmem:[%s34_s0] ss:$0 sm:$0xff] }
   0x2   :  { %5 = vst [vmem:[%s35_s1] sm:$0xff] %v4_v0  ;;  %10 = vst [vmem:[%s35_s1 + $0x8] sm:$0xff] %v4_v0 }
   0x3   :  { %11 = vst [vmem:[%s35_s1 + $0x10] sm:$0xff] %v4_v0 }

// kernel: conv_block_forward.3
= control target key start
LH: loop header
LB: loop body
LE: loop exit
PB: predicated region body
PF: predicated region fallthrough
CT: control target
= control target key end

     0   :  { %s3687_s0 = inlined_call_operand.hbm [shape: bf16[288,72], index: 0, kind: input, shape index: {}]   ;;  %s3688_s1 = inlined_call_operand.hbm [shape: f32[1,72], index: 1, kind: input, shape index: {}]   ;;  %s3689_s2 = inlined_call_operand.hbm [shape: f32[1,72], index: 2, kind: input, shape index: {}]   ;;  %s3690_s3 = inlined_call_operand.hbm [shape: f32[288,1], index: 3, kind: input, shape index: {}]   ;;  %s3691_s4 = inlined_call_operand.hbm [shape: bf16[216,144], index: 4, kind: input, shape index: {}]   ;;  %s3692_s5 = inlined_call_operand.hbm [shape: f32[1,144], index: 5, kind: input, shape index: {}]   ;;  %s3693_s6 = inlined_call_operand.hbm [shape: f32[1,144], index: 6, kind: input, shape index: {}]   ;;  %s3694_s7 = inlined_call_operand.hbm [shape: bf16[288,144], index: 7, kind: output, shape index: {0}]   ;;  %s3695_s8 = inlined_call_operand.hbm [shape: f32[16,144], index: 8, kind: output, shape index: {1}]  }
   0x1   :  { %3701 = sst [smem:[#allocation24_spill]] %s3687_s0 }
   0x2   :  { %3702 = sst [smem:[#allocation25_spill]] %s3688_s1 }
   0x3   :  { %3703 = sst [smem:[#allocation26_spill]] %s3689_s2 }
   0x4   :  { %3704 = sst [smem:[#allocation27_spill]] %s3691_s4 }
   0x5   :  { %3705 = sst [smem:[#allocation28_spill]] %s3692_s5 }
   0x6   :  { %3706 = sst [smem:[#allocation29_spill]] %s3693_s6 }
   0x7   :  { %14 = vsyncpa [#allocation3], 0 }
   0x8   :  { %16 = vsyncpa [#allocation3 + $0x1], 0 }
   0x9   :  { %17 = vsyncpa [#allocation6], 0 }
   0xa   :  { %18 = vsyncpa [#allocation9], 0 }
   0xb   :  { %20 = vsyncpa [#allocation9 + $0x1], 0 }
   0xc   :  { %21 = vsyncpa [#allocation12], 0 }
   0xd   :  { %22 = vsyncpa [#allocation4], 0 }
   0xe   :  { %24 = vsyncpa [#allocation4 + $0x1], 0 }
   0xf   :  { %25 = vsyncpa [#allocation16], 0 }
  0x10   :  { %27 = vsyncpa [#allocation16 + $0x1], 0  ;;  %s2640_s27 = smov 0   ;;  %s2642_s28 = smov 0  }
  0x11   :  { %s2644_s29 = smov 0   ;;  %s2646_s30 = smov 0  }
  0x12 LB: > { %s2576_s9 = smov [#allocation5]   ;;  %s2661_s11 = sadd.s32 4294967295, %s2574_s30   ;;  %s2574_s30 = sphi %s2646_s30, %s3738_s30   ;;  %s2570_s29 = sphi %s2644_s29, %s3737_s29   ;;  %s2566_s28 = sphi %s2642_s28, %s3736_s28   ;;  %s2562_s27 = sphi %s2640_s27, %s3735_s27  }
  0x13   : > { %s260_s10 = sshll.u32 %s2576_s9, 4  ;;  %p1830_p0 = scmp.ge.s32.totalorder %s2574_s30, 1  ;;  %s2666_s10 = int_to_ptr.vmem [resolvable:$true] %s260_s10 }
  0x14   : > { %p3697_p1 = scmp.eq.s32.totalorder %s2661_s11, 0  ;;  %p247_p2 = scmp.lt.s32.totalorder %s2574_s30, 3 }
  0x15   : > { %s2577_s13 = smov [#allocation10]   ;;  %s2578_s16 = smov [#allocation11]  }
  0x16   : > { %p2668_p3 = pnand %p1830_p0, %p247_p2  ;;  %s281_s14 = sshll.u32 %s2577_s13, 4  ;;  %s2675_s14 = int_to_ptr.vmem [resolvable:$true] %s281_s14 }
  0x17   : > { %s295_s17 = sshll.u32 %s2578_s16, 4  ;;  %s3709_s1 = sld [smem:[#allocation25_spill]]  ;;  %s2683_s17 = int_to_ptr.vmem [resolvable:$true] %s295_s17 }
  0x18   : > { %s3707_s12 = scalar_select %p2668_p3, 1, 0 }
  0x19   : > { %p2038_p5 = pneg %p2668_p3 }
  0x1b   : > { %p2679_p6 = pnand %p2038_p5, %p3697_p1 }
  0x1d   : > { %s2260_s20 = scalar_lea.hbm %s3709_s1, 16  ;;  %p2693_p8 = pneg %p2679_p6 }
  0x1e   : > { %p2261_p7 = scmp.ne.s32.totalorder %s3709_s1, %s2260_s20  ;;  %p2267_p11 = scmp.lt.u32.totalorder %s2260_s20, %s3709_s1 }
  0x20   : > { %p2263_p9 = pnand %p2693_p8, %p2261_p7 }
  0x22   : > { %p2264_p10 = pneg %p2263_p9 }
  0x24   : > { %p2269_p12 = pnand %p2267_p11, %p2264_p10 }
  0x26   : > { %2272 = shalt.err (!%p2269_p12)
}
  0x27   : > { %s2273_s26 = scalar_lea.vmem %s2666_s10, 16  ;;  %s2280_s9 = scalar_lea.vmem %s2666_s10, 32 }
  0x28   : > { %p2274_p13 = scmp.ne.s32.totalorder %s2666_s10, %s2273_s26  ;;  %p2281_p5 = scmp.lt.s32.totalorder %s2666_s10, %s2666_s10 }
  0x29   : > { %p2282_p7 = scmp.lt.s32.totalorder %s2280_s9, %s2273_s26 }
  0x2a   : > { %p2276_p0 = pnand %p2274_p13, %p2693_p8 }
  0x2b   : > { %p2283_p9 = por %p2282_p7, %p2281_p5 }
  0x2c   : > { %p2277_p2 = pneg %p2276_p0 }
  0x2e   : > { %p2284_p4 = pnand %p2283_p9, %p2277_p2 }
  0x30   : > { %2287 = shalt.err (!%p2284_p4)
}
  0x31   : > { %2041 = dma.hbm_to_vmem [thread:$0]  (!%p2679_p6), %s3709_s1, 16, %s2666_s10, [#allocation6]  }
  0x32   : > { %s3711_s4 = sld [smem:[#allocation27_spill]] }
  0x38   : > { %s2288_s20 = scalar_lea.hbm %s3711_s4, 3456 }
  0x39   : > { %p2289_p10 = scmp.ne.s32.totalorder %s3711_s4, %s2288_s20  ;;  %p2295_p4 = scmp.lt.u32.totalorder %s2288_s20, %s3711_s4 }
  0x3b   : > { %p2291_p11 = pnand %p2289_p10, %p2693_p8 }
  0x3d   : > { %p2292_p12 = pneg %p2291_p11 }
  0x3f   : > { %p2297_p13 = pnand %p2295_p4, %p2292_p12 }
  0x41   : > { %2300 = shalt.err (!%p2297_p13)
}
  0x42   : > { %s2301_s10 = scalar_lea.vmem %s2675_s14, 3456  ;;  %p2309_p7 = scmp.lt.s32.totalorder %s2675_s14, %s2675_s14 }
  0x43   : > { %p2302_p0 = scmp.ne.s32.totalorder %s2675_s14, %s2301_s10  ;;  %p2310_p9 = scmp.lt.s32.totalorder %s2301_s10, %s2301_s10 }
  0x45   : > { %p2304_p2 = pnand %p2302_p0, %p2693_p8  ;;  %p2311_p10 = por %p2310_p9, %p2309_p7 }
  0x47   : > { %p2305_p5 = pneg %p2304_p2 }
  0x49   : > { %p2312_p11 = pnand %p2311_p10, %p2305_p5 }
  0x4b   : > { %2315 = shalt.err (!%p2312_p11)
}
  0x4c   : > { %s3696_s26 = smov 128   ;;  %s3699_s9 = smov 8  }
  0x4d   : > { %2047 = dma.hbm_to_vmem [thread:$0]  (!%p2679_p6), %s3711_s4, 3456, %s2675_s14, [#allocation9], %s3696_s26, %s3696_s26, %s3699_s9  }
  0x4e   : > { %s3712_s5 = sld [smem:[#allocation28_spill]] }
  0x54   : > { %s2316_s20 = scalar_lea.hbm %s3712_s5, 32 }
  0x55   : > { %p2317_p12 = scmp.ne.s32.totalorder %s3712_s5, %s2316_s20  ;;  %p2323_p0 = scmp.lt.u32.totalorder %s2316_s20, %s3712_s5 }
  0x57   : > { %p2319_p4 = pnand %p2317_p12, %p2693_p8 }
  0x59   : > { %p2320_p13 = pneg %p2319_p4 }
  0x5b   : > { %p2325_p2 = pnand %p2323_p0, %p2320_p13 }
  0x5d   : > { %2328 = shalt.err (!%p2325_p2)
}
  0x5e   : > { %s2329_s14 = scalar_lea.vmem %s2683_s17, 32  ;;  %p2337_p10 = scmp.lt.s32.totalorder %s2683_s17, %s2683_s17 }
  0x5f   : > { %p2330_p5 = scmp.ne.s32.totalorder %s2683_s17, %s2329_s14  ;;  %p2338_p11 = scmp.lt.s32.totalorder %s2329_s14, %s2329_s14 }
  0x61   : > { %p2332_p7 = pnand %p2330_p5, %p2693_p8  ;;  %p2339_p12 = por %p2338_p11, %p2337_p10 }
  0x63   : > { %p2333_p9 = pneg %p2332_p7 }
  0x65   : > { %p2340_p4 = pnand %p2339_p12, %p2333_p9 }
  0x67   : > { %2343 = shalt.err (!%p2340_p4)
}
  0x68   : > { %2050 = dma.hbm_to_vmem [thread:$0]  (!%p2679_p6), %s3712_s5, 32, %s2683_s17, [#allocation12]  }
  0x69   : > { %s2581_s16 = smov [#allocation7]   ;;  %s2582_s19 = smov [#allocation13]  }
  0x6a   : > { %s271_s18 = sshll.u32 %s2581_s16, 4  ;;  %s306_s20 = sshll.u32 %s2582_s19, 4  ;;  %s272_s18 = int_to_ptr.vmem [resolvable:$true] %s271_s18  ;;  %s307_s20 = int_to_ptr.vmem [resolvable:$true] %s306_s20 }
  0x6b   : > { %s3713_s2 = sld [smem:[#allocation26_spill]] }
  0x71   : > { %s2344_s24 = scalar_lea.hbm %s3713_s2, 16 }
  0x72   : > { %p2345_p13 = scmp.ne.s32.totalorder %s3713_s2, %s2344_s24  ;;  %p2351_p5 = scmp.lt.u32.totalorder %s2344_s24, %s3713_s2 }
  0x74   : > { %p2347_p0 = pnand %p2345_p13, %p2693_p8 }
  0x76   : > { %p2348_p2 = pneg %p2347_p0 }
  0x78   : > { %p2353_p7 = pnand %p2351_p5, %p2348_p2 }
  0x7a   : > { %2356 = shalt.err (!%p2353_p7)
}
  0x7b   : > { %s2357_s17 = scalar_lea.vmem %s272_s18, 16  ;;  %s2364_s13 = scalar_lea.vmem %s272_s18, 32 }
  0x7c   : > { %p2358_p9 = scmp.ne.s32.totalorder %s272_s18, %s2357_s17  ;;  %p2365_p12 = scmp.lt.s32.totalorder %s272_s18, %s272_s18 }
  0x7d   : > { %p2366_p4 = scmp.lt.s32.totalorder %s2364_s13, %s2357_s17 }
  0x7e   : > { %p2360_p10 = pnand %p2358_p9, %p2693_p8 }
  0x7f   : > { %p2367_p1 = por %p2366_p4, %p2365_p12 }
  0x80   : > { %p2361_p11 = pneg %p2360_p10 }
  0x82   : > { %p2368_p3 = pnand %p2367_p1, %p2361_p11 }
  0x84   : > { %2371 = shalt.err (!%p2368_p3)
}
  0x85   : > { %2044 = dma.hbm_to_vmem [thread:$0]  (!%p2679_p6), %s3713_s2, 16, %s272_s18, [#allocation6]  }
  0x86   : > { %s3714_s6 = sld [smem:[#allocation29_spill]] }
  0x8c   : > { %s2372_s22 = scalar_lea.hbm %s3714_s6, 32 }
  0x8d   : > { %p2373_p13 = scmp.ne.s32.totalorder %s3714_s6, %s2372_s22  ;;  %p2379_p3 = scmp.lt.u32.totalorder %s2372_s22, %s3714_s6 }
  0x8f   : > { %p2375_p0 = pnand %p2373_p13, %p2693_p8 }
  0x91   : > { %p2376_p1 = pneg %p2375_p0 }
  0x93   : > { %p2381_p2 = pnand %p2379_p3, %p2376_p1 }
  0x95   : > { %2384 = shalt.err (!%p2381_p2)
}
  0x96   : > { %s2385_s17 = scalar_lea.vmem %s307_s20, 32  ;;  %p2393_p10 = scmp.lt.s32.totalorder %s307_s20, %s307_s20 }
  0x97   : > { %p2386_p5 = scmp.ne.s32.totalorder %s307_s20, %s2385_s17  ;;  %p2394_p11 = scmp.lt.s32.totalorder %s2385_s17, %s2385_s17 }
  0x99   : > { %p2388_p7 = pnand %p2386_p5, %p2693_p8  ;;  %p2395_p12 = por %p2394_p11, %p2393_p10 }
  0x9b   : > { %p2389_p9 = pneg %p2388_p7 }
  0x9d   : > { %p2396_p4 = pnand %p2395_p12, %p2389_p9 }
  0x9f   : > { %2399 = shalt.err (!%p2396_p4)
}
  0xa0   : > { %2053 = dma.hbm_to_vmem [thread:$0]  (!%p2679_p6), %s3714_s6, 32, %s307_s20, [#allocation12]  }
  0xa1   : > { %s1829_s23 = sadd.s32 4294967294, %s2574_s30   ;;  %s2802_s15 = sadd.s32 1, %s2574_s30  }
  0xa2   : > { %s40_s16 = sadd.s32 1, %s2570_s29  ;;  %s37_s19 = ssub.s32 %s2574_s30, %s2802_s15 }
  0xa3   : > { %p47_p8 = scmp.ne.s32.totalorder %s2570_s29, %s2566_s28  ;;  %p38_p13 = scmp.eq.s32.totalorder %s37_s19, 0 }
  0xa4   : > { %p48_p0 = scmp.eq.s32.totalorder %s2574_s30, 0  ;;  %p53_p1 = scmp.ne.s32.totalorder %s2566_s28, %s2562_s27 }
  0xa5   : > { %p208_p3 = scmp.eq.s32.totalorder %s2661_s11, 1  ;;  %p3715_p5 = scmp.eq.s32.totalorder %s2661_s11, 0 }
  0xa6   : > { %s2814_s26 = scalar_select %p38_p13, %s2570_s29, %s40_s16  }
  0xa7   : > { %p49_p2 = por %p48_p0, %p47_p8  ;;  %p2818_p7 = por %p3715_p5, %p53_p1 }
  0xa8   : > { %p2822_p6 = por %p208_p3, %p47_p8  ;;  %p214_p9 = scmp.eq.s32.totalorder %s1829_s23, 1 }
  0xa9   : > { %p2073_p10 = scmp.lt.s32.totalorder %s2574_s30, 2  ;;  %s2828_s22 = sand.u32 1, %s2570_s29  }
  0xaa   : > { %s3717_s20 = scalar_select %p2822_p6, 1, 0 }
  0xab   : > { %p2830_p11 = por %p214_p9, %p53_p1  ;;  %s2006_s25 = smul.u32 72, %s2828_s22 }
  0xac   : > { %p2835_p12 = pnand %p2073_p10, %p49_p2  ;;  %s1910_s10 = smul.u32 1152, %s2574_s30 }
  0xad   : > { %s3718_s24 = scalar_select %p2830_p11, 1, 0 }
  0xae   : > { %s3720_s0 = sld [smem:[#allocation24_spill]]  ;;  %s321_s23 = scalar_lea.vmem [#allocation2], %s2006_s25 }
  0xaf   : > { %s328_s16 = sshll.u32 %s321_s23, 4  ;;  %s318_s19 = scalar_lea.sflag [#allocation3], %s2828_s22  ;;  %s2845_s16 = int_to_ptr.vmem [resolvable:$true] %s328_s16 }
  0xb0   : > { %p2402_p8 = pneg %p2835_p12 }
  0xb4   : > { %s2843_s13 = scalar_lea.hbm %s3720_s0, %s1910_s10  ;;  %s2405_s18 = scalar_lea.hbm %s3720_s0, 2304 }
  0xb5   : > { %s2400_s9 = scalar_lea.hbm %s2843_s13, 1152  ;;  %p2406_p1 = scmp.lt.u32.totalorder %s2843_s13, %s3720_s0 }
  0xb6   : > { %p2401_p4 = scmp.ne.s32.totalorder %s2843_s13, %s2400_s9  ;;  %p2407_p3 = scmp.lt.u32.totalorder %s2405_s18, %s2400_s9 }
  0xb7   : > { %p2409_p5 = scmp.lt.u32.totalorder %s2400_s9, %s2843_s13 }
  0xb8   : > { %p2403_p13 = pnand %p2402_p8, %p2401_p4  ;;  %p2408_p2 = por %p2407_p3, %p2406_p1 }
  0xba   : > { %p2404_p0 = pneg %p2403_p13  ;;  %p2410_p9 = por %p2409_p5, %p2408_p2 }
  0xbc   : > { %p2411_p10 = pnand %p2410_p9, %p2404_p0 }
  0xbe   : > { %2414 = shalt.err (!%p2411_p10)
}
  0xbf   : > { %s2415_s25 = scalar_lea.vmem %s2845_s16, 1152  ;;  %s2583_s23 = smov [#allocation2]  }
  0xc0   : > { %p2416_p4 = scmp.ne.s32.totalorder %s2845_s16, %s2415_s25  ;;  %s2420_s17 = sshll.u32 %s2583_s23, 4  ;;  %s2421_s17 = int_to_ptr.vmem [resolvable:$false] %s2420_s17 }
  0xc1   : > { %s2422_s1 = scalar_lea.vmem %s2421_s17, 2304  ;;  %p2423_p6 = scmp.lt.s32.totalorder %s2845_s16, %s2421_s17 }
  0xc2   : > { %p2418_p13 = pnand %p2416_p4, %p2402_p8  ;;  %p2424_p1 = scmp.lt.s32.totalorder %s2422_s1, %s2415_s25 }
  0xc4   : > { %p2419_p11 = pneg %p2418_p13  ;;  %p2425_p3 = por %p2424_p1, %p2423_p6 }
  0xc6   : > { %p2426_p2 = pnand %p2425_p3, %p2419_p11 }
  0xc8   : > { %2429 = shalt.err (!%p2426_p2)
}
  0xc9   : > { %s2584_s2 = smov 64   ;;  %s2585_s9 = smov 4  }
  0xca   : > { %2057 = dma.hbm_to_vmem [thread:$0]  (!%p2835_p12), %s2843_s13, 1152, %s2845_s16, %s318_s19, %s2584_s2, %s2584_s2, %s2585_s9  }
  0xcb   : > { %s338_s10 = sand.u32 1, %s2574_s30   ;;  %s2007_s18 = smul.u32 144, %s2828_s22 }
  0xcc   : > { %s1911_s23 = smul.u32 2304, %s2574_s30  ;;  %s2885_s5 = scalar_lea.sflag [#allocation9], %s338_s10 }
  0xcd   : > { %s342_s0 = scalar_lea.vmem [#allocation8], %s2007_s18  ;;  %s2435_s16 = scalar_lea.hbm %s3690_s3, 4608 }
  0xce   : > { %s2881_s1 = scalar_lea.hbm %s3690_s3, %s1911_s23  ;;  %s349_s4 = sshll.u32 %s342_s0, 4  ;;  %s2883_s4 = int_to_ptr.vmem [resolvable:$true] %s349_s4 }
  0xcf   : > { %s2430_s6 = scalar_lea.hbm %s2881_s1, 2304  ;;  %p2436_p5 = scmp.lt.u32.totalorder %s2881_s1, %s3690_s3 }
  0xd0   : > { %p2431_p6 = scmp.ne.s32.totalorder %s2881_s1, %s2430_s6  ;;  %p2437_p9 = scmp.lt.u32.totalorder %s2435_s16, %s2430_s6 }
  0xd1   : > { %p2439_p4 = scmp.lt.u32.totalorder %s2430_s6, %s2881_s1 }
  0xd2   : > { %p2433_p11 = pnand %p2431_p6, %p2402_p8  ;;  %p2438_p10 = por %p2437_p9, %p2436_p5 }
  0xd4   : > { %p2434_p0 = pneg %p2433_p11  ;;  %p2440_p13 = por %p2439_p4, %p2438_p10 }
  0xd6   : > { %p2441_p1 = pnand %p2440_p13, %p2434_p0 }
  0xd8   : > { %2444 = shalt.err (!%p2441_p1)
}
  0xd9   : > { %s2445_s0 = scalar_lea.vmem %s2883_s4, 2304  ;;  %s2586_s9 = smov [#allocation8]  }
  0xda   : > { %p2446_p3 = scmp.ne.s32.totalorder %s2883_s4, %s2445_s0  ;;  %s2450_s10 = sshll.u32 %s2586_s9, 4  ;;  %s2451_s10 = int_to_ptr.vmem [resolvable:$false] %s2450_s10 }
  0xdb   : > { %s2452_s18 = scalar_lea.vmem %s2451_s10, 4608  ;;  %p2453_p11 = scmp.lt.s32.totalorder %s2883_s4, %s2451_s10 }
  0xdc   : > { %p2448_p2 = pnand %p2446_p3, %p2402_p8  ;;  %p2454_p5 = scmp.lt.s32.totalorder %s2452_s18, %s2445_s0 }
  0xde   : > { %p2449_p6 = pneg %p2448_p2  ;;  %p2455_p9 = por %p2454_p5, %p2453_p11 }
  0xe0   : > { %p2456_p10 = pnand %p2455_p9, %p2449_p6 }
  0xe2   : > { %2459 = shalt.err (!%p2456_p10)
}
  0xe3   : > { %s3721_s6 = smov 8   ;;  %s3722_s23 = smov 128  }
  0xe4   : > { %2060 = dma.hbm_to_vmem [thread:$0]  (!%p2835_p12), %s2881_s1, 2304, %s2883_s4, %s2885_s5, %s3722_s23, %s3722_s23, %s3721_s6  }
  0xe5   : > { %p3723_p8 = scmp.ne.s32.totalorder %s3707_s12, 0 }
  0xe6   : > { %s2917_s25 = sand.u32 (!%p3723_p8), 1, %s2566_s28  }
  0xe7   : > { %361 = sbr.rel (%p3723_p8) target bundleno = 716 (0x2cc), region = 48  ;;  %s364_s22 = scalar_lea.sflag (!%p3723_p8), [#allocation3], %s2917_s25 }
  0xe8   : > { %s2008_s17 = smul.u32 (!%p3723_p8), 72, %s2917_s25 }
  0xea   : > { %s2921_s13 = scalar_lea.vmem (!%p3723_p8), [#allocation2], %s2008_s17 }
  0xee   : > { %2533 = dma.done.wait (%p2818_p7), %s364_s22, 1152  }
  0xef   : > { %2535 = vsyncadd (%p2818_p7), %s364_s22, 4294966144  ;;  %p3724_p12 = scmp.eq.s32.totalorder %s2661_s11, 0 }
  0xf1   : > { %2537 = dma.done.wait (%p3724_p12), [#allocation6], 32   ;;  %p3725_p0 = pmov %p3724_p12 }
  0xf2   : > { %s380_s4 = sand.u32 1, %s2661_s11   ;;  %s2009_s5 = smul.u32 144, %s2917_s25 }
  0xf3   : > { %2539 = vsyncadd (%p3725_p0), [#allocation6], 4294967264  ;;  %s381_s12 = scalar_lea.sflag [#allocation9], %s380_s4 }
  0xf4   : > { %s2935_s14 = scalar_lea.vmem [#allocation8], %s2009_s5 }
  0xf5   : > { %2541 = dma.done.wait (%p2818_p7), %s381_s12, 2304  }
  0xf6   : > { %2543 = vsyncadd (%p2818_p7), %s381_s12, 4294964992  ;;  %p3726_p4 = pmov %p3725_p0 }
  0xf7   : > { %p3727_p13 = pmov %p3725_p0 }
  0xf8   : > { %2545 = dma.done.wait (%p3726_p4), [#allocation9], 3456  }
  0xf9   : > { %2547 = vsyncadd (%p3727_p13), [#allocation9], 4294963840  ;;  %p3728_p1 = pmov %p3725_p0 }
  0xfa   : > { %p3729_p3 = pmov %p3725_p0 }
  0xfb   : > { %2549 = dma.done.wait (%p3728_p1), [#allocation12], 64  }
  0xfc   : > { %2551 = vsyncadd (%p3729_p3), [#allocation12], 4294967232  ;;  %v515_v0 = vlaneseq  ;;  %v1969_v2 = vld [vmem:[%s2921_s13 + $0x8] sm:$0xff]   ;;  %v1934_v3 = vld [vmem:[%s2921_s13] sm:$0xff]   ;;  %s2587_s21 = smov 72   ;;  %s2588_s1 = smov 16  }
  0xfd   : > { %v1970_v4 = vld [vmem:[%s2921_s13 + $0x10] sm:$0xff]   ;;  %v2955_v5 = vunpack.c.l.bf16 %v1969_v2  ;;  %v2957_v6 = vunpack.c.h.bf16 %v1969_v2  ;;  %v2959_v7 = vunpack.c.l.bf16 %v1934_v3  ;;  %v2961_v8 = vunpack.c.h.bf16 %v1934_v3  ;;  %v1971_v11 = vld [vmem:[%s2921_s13 + $0x18] sm:$0xff]   ;;  %v1973_v13 = vld [vmem:[%s2921_s13 + $0x28] sm:$0xff]   ;;  %s3305_s16 = scalar_lea.vmem [#allocation14], %s2009_s5  ;;  %s1977_s19 = smul.u32 2304, %s2661_s11 }
  0xfe   : > { %v2950_v1 = vshrl.u32 %v515_v0, 7  ;;  %v2963_v9 = vunpack.c.l.bf16 %v1970_v4  ;;  %v2965_v10 = vunpack.c.h.bf16 %v1970_v4  ;;  %v1974_v17 = vld [vmem:[%s2921_s13 + $0x30] sm:$0xff]   ;;  %v2981_v22 = vunpack.c.l.bf16 %v1971_v11  ;;  %v1972_v28 = vld [vmem:[%s2921_s13 + $0x20] sm:$0xff]   ;;  %v1975_v34 = vld [vmem:[%s2921_s13 + $0x38] sm:$0xff]   ;;  %s1640_s2 = sshll.u32 %s3305_s16, 4  ;;  %s1621_s18 = scalar_lea.sflag [#allocation4], %s2917_s25  ;;  %s3574_s2 = int_to_ptr.vmem [resolvable:$true] %s1640_s2 }
  0xff   : > { %v2137_v12 = vpack.i.bf16 %v2957_v6, %v2955_v5  ;;  %v2127_v14 = vpack.i.bf16 %v2961_v8, %v2959_v7  ;;  %v538_v15 = vrot.slane %v2955_v5, 1  ;;  %v539_v16 = vrot.slane %v2957_v6, 1  ;;  %v2219_v18 = vld [vmem:[#allocation10 + $0x4] ss:$8 sps:$4 sm:$0xff]   ;;  %v2221_v23 = vld [vmem:[#allocation10] ss:$8 sps:$4 sm:$0xff]   ;;  %s3567_s10 = scalar_lea.hbm %s3694_s7, %s1977_s19 }
 0x100   : > { %vm554_vm0 = vcmp.lt.s32.totalorder %v2950_v1, 7  ;;  %v540_v19 = vrot.slane %v2963_v9, 1  ;;  %v536_v20 = vrot.slane %v2959_v7, 1  ;;  %v537_v21 = vrot.slane %v2961_v8, 1  ;;  %982 = vmatprep.subr.bf16.mxu0 %v2219_v18  ;;  %v2222_v29 = vld [vmem:[#allocation10 + $0x14] ss:$8 sps:$4 sm:$0xff]   ;;  %1978 = vmatprep.subr.bf16.mxu1 %v2219_v18 }
 0x101   : > { %2138 = vrot.lane.b32.xlu1 %v2137_v12, %s2587_s21  ;;  %2128 = vrot.lane.b32.xlu0 %v2127_v14, %s2587_s21  ;;  %v569_v24 = vsel %vm554_vm0, %v538_v15, %v539_v16  ;;  %v541_v25 = vrot.slane %v2965_v10, 1  ;;  %v2987_v26 = vunpack.c.l.bf16 %v1973_v13  ;;  %v2989_v27 = vunpack.c.h.bf16 %v1973_v13  ;;  %v2224_v35 = vld [vmem:[#allocation10 + $0x10] ss:$8 sps:$4 sm:$0xff]   ;;  %v2225_v39 = vld [vmem:[#allocation10 + $0x24] ss:$8 sps:$4 sm:$0xff]   ;;  %s2460_s6 = scalar_lea.vmem %s3574_s2, 2304 }
 0x102   : > { %v568_v30 = vsel %vm554_vm0, %v539_v16, %v540_v19  ;;  %v570_v31 = vsel %vm554_vm0, %v537_v21, %v538_v15  ;;  %v571_v32 = vsel %vm554_vm0, %v536_v20, %v537_v21  ;;  %v542_v33 = vrot.slane %v2981_v22, 1  ;;  %983 = vmatpush1.bf16.msra.mxu0 %v2221_v23  ;;  %1992 = vmatpush1.bf16.msra.mxu1 %v2221_v23  ;;  %v2227_v52 = vld [vmem:[#allocation10 + $0x20] ss:$8 sps:$4 sm:$0xff]   ;;  %v2228_v56 = vld [vmem:[#allocation10 + $0x34] ss:$8 sps:$4 sm:$0xff]   ;;  %p2461_p7 = scmp.ne.s32.totalorder %s3574_s2, %s2460_s6  ;;  %p3732_p2 = scmp.ne.s32.totalorder %s3717_s20, 0 }
 0x103   : > { %v2142_v36 = vpack.i.bf16 %v568_v30, %v569_v24  ;;  %v2132_v37 = vpack.i.bf16 %v570_v31, %v571_v32  ;;  %v567_v38 = vsel %vm554_vm0, %v540_v19, %v541_v25  ;;  %984 = vmatprep.subr.bf16.mxu0 %v2222_v29  ;;  %vm517_vm1 = vcmp.lt.s32.totalorder %v2950_v1, 1  ;;  %1979 = vmatprep.subr.bf16.mxu1 %v2222_v29  ;;  %v1976_v3 = vld [vmem:[%s2921_s13 + $0x40] sm:$0xff]   ;;  %s2590_s23 = smov [#allocation14]  }
 0x104   : > { %v566_v40 = vsel %vm554_vm0, %v541_v25, %v542_v33  ;;  %v2147_v41 = vpack.i.bf16 %v2965_v10, %v2963_v9  ;;  %v3009_v42 = vunpack.c.l.bf16 %v1974_v17  ;;  %v546_v43 = vrot.slane %v2987_v26, 1  ;;  %v2230_v12 = vld [vmem:[#allocation10 + $0x30] ss:$8 sps:$4 sm:$0xff]   ;;  %v2231_v14 = vld [vmem:[#allocation10 + $0x44] ss:$8 sps:$4 sm:$0xff]   ;;  %p2462_p6 = pnand %p2461_p7, %p3732_p2  ;;  %s2464_s17 = sshll.u32 %s2590_s23, 4  ;;  %s2465_s17 = int_to_ptr.vmem [resolvable:$false] %s2464_s17 }
 0x105   : > { %2143 = vrot.lane.b32.xlu1 %v2142_v36, %s2588_s1  ;;  %2133 = vrot.lane.b32.xlu0 %v2132_v37, %s2588_s1  ;;  %v2157_v44 = vpack.i.bf16 %v566_v40, %v567_v38  ;;  %v547_v45 = vrot.slane %v2989_v27, 1  ;;  %v3015_v46 = vunpack.c.h.bf16 %v1971_v11  ;;  %v3017_v47 = vunpack.c.h.bf16 %v1974_v17  ;;  %v2234_v32 = vld [vmem:[#allocation10 + $0x54] ss:$8 sps:$4 sm:$0xff]   ;;  %s2466_s22 = scalar_lea.vmem %s2465_s17, 4608  ;;  %p2467_p5 = scmp.lt.s32.totalorder %s3574_s2, %s2465_s17 }
 0x106   : > { %v500_v48 = vrot.slane %v2957_v6, 7  ;;  %v548_v49 = vrot.slane %v3009_v42, 1  ;;  %v3021_v50 = vunpack.c.l.bf16 %v1972_v28  ;;  %v3023_v51 = vunpack.c.l.bf16 %v1975_v34  ;;  %985 = vmatpush1.bf16.msra.mxu0 %v2224_v35  ;;  %1993 = vmatpush1.bf16.msra.mxu1 %v2224_v35  ;;  %p2463_p11 = pneg %p2462_p6  ;;  %p2468_p9 = scmp.lt.s32.totalorder %s2466_s22, %s2460_s6 }
 0x107   : > { %v499_v53 = vrot.slane %v2955_v5, 7  ;;  %v543_v54 = vrot.slane %v3015_v46, 1  ;;  %v3027_v55 = vunpack.c.h.bf16 %v1972_v28  ;;  %986 = vmatprep.subr.bf16.mxu0 %v2225_v39  ;;  %v498_v57 = vrot.slane %v2961_v8, 7  ;;  %1980 = vmatprep.subr.bf16.mxu1 %v2225_v39  ;;  %v2233_v28 = vld [vmem:[#allocation10 + $0x40] ss:$8 sps:$4 sm:$0xff]  }
 0x108   : > { %v497_v58 = vrot.slane %v2959_v7, 7  ;;  %v2162_v59 = vpack.i.bf16 %v2989_v27, %v2987_v26  ;;  %v544_v60 = vrot.slane %v3021_v50, 1  ;;  %v560_v61 = vsel %vm554_vm0, %v547_v45, %v548_v49  ;;  %p2469_p10 = por %p2468_p9, %p2467_p5 }
 0x109   : > { %2158 = vrot.lane.b32.xlu1 %v2157_v44, %s2588_s1  ;;  %2148 = vrot.lane.b32.xlu0 %v2147_v41, %s2587_s21  ;;  %v561_v62 = vsel %vm554_vm0, %v546_v43, %v547_v45  ;;  %v2152_v63 = vpack.i.bf16 %v3015_v46, %v2981_v22  ;;  %v549_v2 = vrot.slane %v3017_v47, 1  ;;  %v565_v5 = vsel %vm554_vm0, %v542_v33, %v543_v54  ;;  %v2236_v44 = vld [vmem:[#allocation10 + $0x50] ss:$8 sps:$4 sm:$0xff]  }
 0x10a   : > { %v564_v4 = vsel %vm554_vm0, %v543_v54, %v544_v60  ;;  %v550_v8 = vrot.slane %v3023_v51, 1  ;;  %v3049_v11 = vunpack.c.h.bf16 %v1975_v34  ;;  %987 = vmatpush1.bf16.msra.mxu0 %v2227_v52  ;;  %v545_v13 = vrot.slane %v3027_v55, 1  ;;  %1994 = vmatpush1.bf16.msra.mxu1 %v2227_v52  ;;  %p2470_p8 = pnand %p2469_p10, %p2463_p11 }
 0x10b   : > { %988 = vmatprep.subr.bf16.mxu0 %v2228_v56  ;;  %v2172_v15 = vpack.i.bf16 %v560_v61, %v561_v62  ;;  %v3052_v16 = vunpack.c.l.bf16 %v1976_v3  ;;  %v2167_v17 = vpack.i.bf16 %v564_v4, %v565_v5  ;;  %v3056_v18 = vunpack.c.h.bf16 %v1976_v3  ;;  %1981 = vmatprep.subr.bf16.mxu1 %v2228_v56 }
 0x10c   : > { %v3060_v19 = vsel %vm517_vm1, %v497_v58, %v498_v57  ;;  %v3066_v21 = vsel %vm517_vm1, %v499_v53, %v500_v48  ;;  %v3070_v23 = vsel %vm554_vm0, %v549_v2, %v550_v8  ;;  %v559_v24 = vsel %vm554_vm0, %v548_v49, %v549_v2  ;;  %v2237_v49 = vld [vmem:[#allocation10 + $0x64] ss:$8 sps:$4 sm:$0xff]  }
 0x10d   : > { %2163 = vrot.lane.b32.xlu1 %v2162_v59, %s2587_s21  ;;  %2153 = vrot.lane.b32.xlu0 %v2152_v63, %s2587_s21  ;;  %v551_v25 = vrot.slane %v3049_v11, 1  ;;  %v3077_v29 = vsel %vm517_vm1, %v498_v57, %v499_v53  ;;  %v562_v30 = vsel %vm554_vm0, %v545_v13, %v546_v43  ;;  %v563_v31 = vsel %vm554_vm0, %v544_v60, %v545_v13  ;;  %v2242_v13 = vld [vmem:[#allocation10 + $0x70] ss:$8 sps:$4 sm:$0xff]  }
 0x10e   : > { %989 = vmatpush1.bf16.msra.mxu0 %v2230_v12  ;;  %v514_v33 = vrot.slane %v3056_v18, 7  ;;  %v506_v34 = vrot.slane %v3027_v55, 7  ;;  %v552_v35 = vrot.slane %v3052_v16, 1  ;;  %1995 = vmatpush1.bf16.msra.mxu1 %v2230_v12  ;;  %v507_v36 = vrot.slane %v2987_v26, 7 }
 0x10f   : > { %990 = vmatprep.subr.bf16.mxu0 %v2231_v14  ;;  %v2182_v37 = vpack.i.bf16 %v3017_v47, %v3009_v42  ;;  %v2192_v38 = vpack.i.bf16 %v3070_v23, %v559_v24  ;;  %v2177_v39 = vpack.i.bf16 %v3027_v55, %v3021_v50  ;;  %v508_v40 = vrot.slane %v2989_v27, 7  ;;  %1982 = vmatprep.subr.bf16.mxu1 %v2231_v14  ;;  %v2243_v14 = vld [vmem:[#allocation10 + $0x84] ss:$8 sps:$4 sm:$0xff]   ;;  %v2246_v23 = vld [vmem:[#allocation10 + $0x94] ss:$8 sps:$4 sm:$0xff]  }
 0x110   : > { %v2187_v41 = vpack.i.bf16 %v562_v30, %v563_v31  ;;  %v557_v43 = vsel %vm554_vm0, %v550_v8, %v551_v25  ;;  %v553_v26 = vrot.slane %v3056_v18, 1  ;;  %v501_v45 = vrot.slane %v2963_v9, 7  ;;  %v2249_v24 = vld [vmem:[#allocation10 + $0xa4] ss:$8 sps:$4 sm:$0xff]   ;;  %v2251_v30 = vld [vmem:[#allocation10 + $0xa0] ss:$8 sps:$4 sm:$0xff]  }
 0x111   : > { %2173 = vrot.lane.b32.xlu1 %v2172_v15, %s2588_s1  ;;  %2168 = vrot.lane.b32.xlu0 %v2167_v17, %s2588_s1  ;;  %v3103_v52 = vsel %vm517_vm1, %v514_v33, %v497_v58  ;;  %v3107_v27 = vsel %vm517_vm1, %v507_v36, %v508_v40  ;;  %v3111_v53 = vsel %vm517_vm1, %v506_v34, %v507_v36  ;;  %v502_v54 = vrot.slane %v2965_v10, 7  ;;  %v445_v31 = vld [vmem:[%s2935_s14 + $0x10] sm:$0xff] }
 0x112   : > { %991 = vmatpush1.bf16.msra.mxu0 %v2233_v28  ;;  %v556_v9 = vsel %vm554_vm0, %v551_v25, %v552_v35  ;;  %1996 = vmatpush1.bf16.msra.mxu1 %v2233_v28  ;;  %v3120_v55 = vsel %vm517_vm1, %v500_v48, %v501_v45  ;;  %v509_v56 = vrot.slane %v3009_v42, 7  ;;  %v510_v57 = vrot.slane %v3017_v47, 7  ;;  %v2239_v48 = vld [vmem:[#allocation10 + $0x60] ss:$8 sps:$4 sm:$0xff]   ;;  %v2255_v36 = vld [vmem:[#allocation10 + $0xc4] ss:$8 sps:$4 sm:$0xff]  }
 0x113   : > { %992 = vmatprep.subr.bf16.mxu0 %v2234_v32  ;;  %v3128_v10 = vsel %vm517_vm1, %v501_v45, %v502_v54  ;;  %v503_v58 = vrot.slane %v2981_v22, 7  ;;  %v504_v6 = vrot.slane %v3015_v46, 7  ;;  %v511_v59 = vrot.slane %v3023_v51, 7  ;;  %1983 = vmatprep.subr.bf16.mxu1 %v2234_v32  ;;  %v2240_v22 = vld [vmem:[#allocation10 + $0x74] ss:$8 sps:$4 sm:$0xff]  }
 0x114   : > { %v3135_v42 = vsel %vm517_vm1, %v509_v56, %v510_v57  ;;  %v3139_v47 = vsel %vm517_vm1, %v508_v40, %v509_v56  ;;  %v512_v60 = vrot.slane %v3049_v11, 7  ;;  %v505_v61 = vrot.slane %v3021_v50, 7  ;;  %v443_v28 = vld [vmem:[%s2935_s14] sm:$0xff]  ;;  %v449_v40 = vld [vmem:[%s2935_s14 + $0x30] sm:$0xff] }
 0x115   : > { %2183 = vrot.lane.b32.xlu1 %v2182_v37, %s2587_s21  ;;  %2178 = vrot.lane.b32.xlu0 %v2177_v39, %s2587_s21  ;;  %v3145_v46 = vsel %vm517_vm1, %v503_v58, %v504_v6  ;;  %v3149_v62 = vsel %vm517_vm1, %v502_v54, %v503_v58  ;;  %v3153_v63 = vsel %vm517_vm1, %v510_v57, %v511_v59  ;;  %v513_v15 = vrot.slane %v3052_v16, 7  ;;  %v2252_v32 = vld [vmem:[#allocation10 + $0xb4] ss:$8 sps:$4 sm:$0xff]   ;;  %v2257_v39 = vld [vmem:[#allocation10 + $0xc0] ss:$8 sps:$4 sm:$0xff]  }
 0x116   : > { %993 = vmatpush1.bf16.msra.mxu0 %v2236_v44  ;;  %1997 = vmatpush1.bf16.msra.mxu1 %v2236_v44  ;;  %v3157_v2 = vsel %vm517_vm1, %v511_v59, %v512_v60  ;;  %v3161_v50 = vsel %vm517_vm1, %v505_v61, %v506_v34  ;;  %v3165_v3 = vsel %vm517_vm1, %v504_v6, %v505_v61  ;;  %v2589_v25 = vmov 0   ;;  %v2254_v34 = vld [vmem:[#allocation10 + $0xb0] ss:$8 sps:$4 sm:$0xff]  }
 0x117   : > { %994 = vmatprep.subr.bf16.mxu0 %v2237_v49  ;;  %v2202_v4 = vpack.i.bf16 %v556_v9, %v557_v43  ;;  %v2197_v5 = vpack.i.bf16 %v3049_v11, %v3023_v51  ;;  %v555_v8 = vsel %vm554_vm0, %v552_v35, %v553_v26  ;;  %v572_v12 = vsel %vm554_vm0, %v553_v26, %v536_v20  ;;  %v2245_v11 = vld [vmem:[#allocation10 + $0x80] ss:$8 sps:$4 sm:$0xff]  }
 0x118   : > { %1984 = vmatprep.subr.bf16.mxu1 %v2237_v49  ;;  %v2212_v51 = vpack.i.bf16 %v572_v12, %v555_v8  ;;  %v2207_v7 = vpack.i.bf16 %v3056_v18, %v3052_v16  ;;  %v3186_v20 = vsel %vm517_vm1, %v513_v15, %v514_v33  ;;  %v3190_v17 = vsel %vm517_vm1, %v512_v60, %v513_v15  ;;  %v2248_v16 = vld [vmem:[#allocation10 + $0x90] ss:$8 sps:$4 sm:$0xff]  }
 0x119   : > { %2193 = vrot.lane.b32.xlu1 %v2192_v38, %s2588_s1  ;;  %2188 = vrot.lane.b32.xlu0 %v2187_v41, %s2588_s1  ;;  %v444_v18 = vld [vmem:[%s2935_s14 + $0x8] sm:$0xff]  ;;  %v446_v33 = vld [vmem:[%s2935_s14 + $0x18] sm:$0xff]  ;;  %v799_v38 = vld [vmem:[#allocation10 + $0xd0] sm:$0xff]  ;;  %vm975_vm2 = vcmask 1043456   ;;  %vm717_vm3 = vcmask 588800   ;;  %vm736_vm4 = vcmask 130048  }
 0x11a   : > { %995 = vmatpush1.bf16.msra.mxu0 %v2239_v48  ;;  %1998 = vmatpush1.bf16.msra.mxu1 %v2239_v48  ;;  %v447_v35 = vld [vmem:[%s2935_s14 + $0x20] sm:$0xff]  ;;  %v448_v37 = vld [vmem:[%s2935_s14 + $0x28] sm:$0xff]  ;;  %v1873_v41 = vcombine.high %v799_v38, %v799_v38  ;;  %v1872_v43 = vcombine.low %v799_v38, %v799_v38  ;;  %v450_v26 = vld [vmem:[%s2935_s14 + $0x38] sm:$0xff]  ;;  %vm947_vm5 = vcmask 719872   ;;  %vm1249_vm6 = vcmask 130052  }
 0x11b   : > { %996 = vmatprep.subr.bf16.mxu0 %v2240_v22  ;;  %1985 = vmatprep.subr.bf16.mxu1 %v2240_v22  ;;  %v451_v44 = vld [vmem:[%s2935_s14 + $0x40] sm:$0xff]  ;;  %v452_v49 = vld [vmem:[%s2935_s14 + $0x48] sm:$0xff]  ;;  %v453_v54 = vld [vmem:[%s2935_s14 + $0x50] sm:$0xff] }
 0x11c   : > { %2218 = vset.pattern.permute.xlu1 %v2589_v25  ;;  %2217 = vset.pattern.permute.xlu0 %v2589_v25  ;;  %v977_v45 = vsel %vm975_vm2, %v1872_v43, 0  ;;  %v454_v9 = vld [vmem:[%s2935_s14 + $0x58] sm:$0xff]  ;;  %v455_v56 = vld [vmem:[%s2935_s14 + $0x60] sm:$0xff]  ;;  %v456_v57 = vld [vmem:[%s2935_s14 + $0x68] sm:$0xff] }
 0x11d   : > { %2203 = vrot.lane.b32.xlu1 %v2202_v4, %s2588_s1  ;;  %2198 = vrot.lane.b32.xlu0 %v2197_v5, %s2587_s21  ;;  %v457_v58 = vld [vmem:[%s2935_s14 + $0x70] sm:$0xff]  ;;  %v458_v6 = vld [vmem:[%s2935_s14 + $0x78] sm:$0xff]  ;;  %vm3299_vm7 = vmor %vm1249_vm6, %vm975_vm2 }
 0x11e   : > { %997 = vmatpush1.bf16.msra.mxu0 %v2242_v13  ;;  %1999 = vmatpush1.bf16.msra.mxu1 %v2242_v13  ;;  %v459_v59 = vld [vmem:[%s2935_s14 + $0x80] sm:$0xff]  ;;  %v460_v48 = vld [vmem:[%s2935_s14 + $0x88] sm:$0xff] }
 0x11f   : > { %998 = vmatprep.subr.bf16.mxu0 %v2243_v14  ;;  %1986 = vmatprep.subr.bf16.mxu1 %v2243_v14 }
 0x121   : > { %2213 = vrot.lane.b32.xlu1 %v2212_v51, %s2588_s1  ;;  %2208 = vrot.lane.b32.xlu0 %v2207_v7, %s2587_s21 }
 0x122   : > { %999 = vmatpush1.bf16.msra.mxu0 %v2245_v11  ;;  %2000 = vmatpush1.bf16.msra.mxu1 %v2245_v11 }
 0x123   : > { %1000 = vmatprep.subr.bf16.mxu0 %v2246_v23  ;;  %1987 = vmatprep.subr.bf16.mxu1 %v2246_v23 }
 0x125   : > { %1276 = vperm.xlu1 %2218, %v444_v18   ;;  %1271 = vperm.xlu0 %2217, %v443_v28  }
 0x126   : > { %1001 = vmatpush1.bf16.msra.mxu0 %v2248_v16  ;;  %2001 = vmatpush1.bf16.msra.mxu1 %v2248_v16 }
 0x127   : > { %1002 = vmatprep.subr.bf16.mxu0 %v2249_v24  ;;  %1988 = vmatprep.subr.bf16.mxu1 %v2249_v24 }
 0x129   : > { %1281 = vperm.xlu1 %2218, %v445_v31   ;;  %1286 = vperm.xlu0 %2217, %v446_v33  }
 0x12a   : > { %1003 = vmatpush1.bf16.msra.mxu0 %v2251_v30  ;;  %2002 = vmatpush1.bf16.msra.mxu1 %v2251_v30 }
 0x12b   : > { %1004 = vmatprep.subr.bf16.mxu0 %v2252_v32  ;;  %1989 = vmatprep.subr.bf16.mxu1 %v2252_v32 }
 0x12d   : > { %1291 = vperm.xlu1 %2218, %v447_v35   ;;  %1296 = vperm.xlu0 %2217, %v448_v37  }
 0x12e   : > { %1005 = vmatpush1.bf16.msra.mxu0 %v2254_v34  ;;  %2003 = vmatpush1.bf16.msra.mxu1 %v2254_v34 }
 0x12f   : > { %1006 = vmatprep.subr.bf16.mxu0 %v2255_v36  ;;  %1990 = vmatprep.subr.bf16.mxu1 %v2255_v36 }
 0x131   : > { %1301 = vperm.xlu1 %2218, %v449_v40   ;;  %1306 = vperm.xlu0 %2217, %v450_v26  }
 0x132   : > { %1007 = vmatpush1.bf16.msra.mxu0 %v2257_v39  ;;  %2004 = vmatpush1.bf16.msra.mxu1 %v2257_v39 }
 0x133   : > { %1874 = vmatprep.subr.msk.bf16.mxu0 %vm975_vm2, %v1873_v41  ;;  %1991 = vmatprep.subr.msk.bf16.mxu1 %vm975_vm2, %v1873_v41 }
 0x135   : > { %1311 = vperm.xlu1 %2218, %v451_v44   ;;  %1316 = vperm.xlu0 %2217, %v452_v49  }
 0x136   : > { %1009 = vmatpush1.bf16.msra.mxu0 %v977_v45  ;;  %2005 = vmatpush1.bf16.msra.mxu1 %v977_v45 }
 0x139   : > { %1321 = vperm.xlu1 %2218, %v453_v54   ;;  %1326 = vperm.xlu0 %2217, %v454_v9  }
 0x13d   : > { %1331 = vperm.xlu1 %2218, %v455_v56   ;;  %1336 = vperm.xlu0 %2217, %v456_v57  }
 0x141   : > { %1341 = vperm.xlu1 %2218, %v457_v58   ;;  %1346 = vperm.xlu0 %2217, %v458_v6  }
 0x145   : > { %1351 = vperm.xlu1 %2218, %v459_v59   ;;  %1356 = vperm.xlu0 %2217, %v460_v48  }
 0x173   : > { %v2139_v60 = vpop.permute.xlu1 %2138  ;;  %v2129_v4 = vpop.permute.xlu0 %2128 }
 0x174   : > { %v2141_v61 = vunpack.i.h.bf16 %v2139_v60  ;;  %v2140_v22 = vunpack.i.l.bf16 %v2139_v60  ;;  %v2131_v5 = vunpack.i.h.bf16 %v2129_v4  ;;  %v2130_v8 = vunpack.i.l.bf16 %v2129_v4 }
 0x176   : > { %v720_v12 = vsel %vm717_vm3, %v3077_v29, %v2140_v22  ;;  %v721_v13 = vsel %vm717_vm3, %v3066_v21, %v2141_v61  ;;  %v718_v14 = vsel %vm717_vm3, %v3103_v52, %v2130_v8  ;;  %v719_v15 = vsel %vm717_vm3, %v3060_v19, %v2131_v5 }
 0x177   : > { %v757_v51 = vpack.c.bf16 %v721_v13, %v720_v12  ;;  %v2144_v7 = vpop.permute.xlu1 %2143  ;;  %v2134_v11 = vpop.permute.xlu0 %2133  ;;  %v755_v23 = vpack.c.bf16 %v719_v15, %v718_v14 }
 0x178   : > { %v2146_v16 = vunpack.i.h.bf16 %v2144_v7  ;;  %v2145_v18 = vunpack.i.l.bf16 %v2144_v7  ;;  %v2136_v24 = vunpack.i.h.bf16 %v2134_v11  ;;  %v2135_v25 = vunpack.i.l.bf16 %v2134_v11 }
 0x17a   : > { %v740_v29 = vsel %vm736_vm4, %v2141_v61, %v2146_v16  ;;  %v739_v21 = vsel %vm736_vm4, %v2140_v22, %v2145_v18  ;;  %v737_v28 = vsel %vm736_vm4, %v2130_v8, %v2135_v25  ;;  %v738_v52 = vsel %vm736_vm4, %v2131_v5, %v2136_v24 }
 0x17b   : > { %v758_v30 = vpack.c.bf16 %v740_v29, %v739_v21  ;;  %v2159_v19 = vpop.permute.xlu1 %2158  ;;  %v756_v31 = vpack.c.bf16 %v738_v52, %v737_v28  ;;  %v2149_v32 = vpop.permute.xlu0 %2148 }
 0x17c   : > { %v2161_v33 = vunpack.i.h.bf16 %v2159_v19  ;;  %v2160_v34 = vunpack.i.l.bf16 %v2159_v19  ;;  %v2151_v35 = vunpack.i.h.bf16 %v2149_v32  ;;  %v2150_v36 = vunpack.i.l.bf16 %v2149_v32 }
 0x17d   : > { %1875 = vmatprep.mubr.msk.bf16.mxu0 %vm947_vm5, %v756_v31 }
 0x17e   : > { %1015 = vmatmul.mubr.bf16.vlgmr.msra.gmra.mrb[0].mxu0 %v755_v23  ;;  %v722_v37 = vsel %vm717_vm3, %v3120_v55, %v2150_v36  ;;  %v723_v38 = vsel %vm717_vm3, %v3128_v10, %v2151_v35  ;;  %v742_v40 = vsel %vm736_vm4, %v2151_v35, %v2161_v33  ;;  %v741_v41 = vsel %vm736_vm4, %v2150_v36, %v2160_v34 }
 0x17f   : > { %v2164_v39 = vpop.permute.xlu1 %2163  ;;  %1876 = vmatprep.mubr.msk.bf16.mxu0 %vm947_vm5, %v758_v30  ;;  %v2154_v43 = vpop.permute.xlu0 %2153  ;;  %v759_v26 = vpack.c.bf16 %v723_v38, %v722_v37  ;;  %v760_v57 = vpack.c.bf16 %v742_v40, %v741_v41 }
 0x180   : > { %v2166_v44 = vunpack.i.h.bf16 %v2164_v39  ;;  %v2165_v45 = vunpack.i.l.bf16 %v2164_v39  ;;  %v2156_v49 = vunpack.i.h.bf16 %v2154_v43  ;;  %v2155_v54 = vunpack.i.l.bf16 %v2154_v43 }
 0x182   : > { %v728_v9 = vsel %vm717_vm3, %v3111_v53, %v2165_v45  ;;  %v729_v55 = vsel %vm717_vm3, %v3107_v27, %v2166_v44  ;;  %v3241_v10 = vsel %vm717_vm3, %v3149_v62, %v2155_v54  ;;  %v3245_v56 = vsel %vm717_vm3, %v3145_v46, %v2156_v49 }
 0x183   : > { %v2174_v58 = vpop.permute.xlu1 %2173  ;;  %v2169_v6 = vpop.permute.xlu0 %2168  ;;  %v765_v59 = vpack.c.bf16 %v729_v55, %v728_v9  ;;  %v761_v48 = vpack.c.bf16 %v3245_v56, %v3241_v10 }
 0x184   : > { %v2176_v60 = vunpack.i.h.bf16 %v2174_v58  ;;  %v2175_v53 = vunpack.i.l.bf16 %v2174_v58  ;;  %v2171_v61 = vunpack.i.h.bf16 %v2169_v6  ;;  %v2170_v22 = vunpack.i.l.bf16 %v2169_v6 }
 0x186   : > { %1025 = vmatmul.mubr.bf16.gmra.mrb[4].mxu0 %v757_v51  ;;  %v747_v27 = vsel %vm736_vm4, %v2165_v45, %v2175_v53  ;;  %v748_v62 = vsel %vm736_vm4, %v2166_v44, %v2176_v60  ;;  %v743_v46 = vsel %vm736_vm4, %v2155_v54, %v2170_v22  ;;  %v744_v5 = vsel %vm736_vm4, %v2156_v49, %v2171_v61 }
 0x187   : > { %v2184_v4 = vpop.permute.xlu1 %2183  ;;  %v766_v8 = vpack.c.bf16 %v748_v62, %v747_v27  ;;  %v2179_v12 = vpop.permute.xlu0 %2178  ;;  %1877 = vmatprep.mubr.msk.bf16.mxu0 %vm947_vm5, %v760_v57  ;;  %v762_v18 = vpack.c.bf16 %v744_v5, %v743_v46  ;;  %v808_v60 = vsub.s32 1, %v2950_v1 }
 0x188   : > { %v2186_v13 = vunpack.i.h.bf16 %v2184_v4  ;;  %v2185_v14 = vunpack.i.l.bf16 %v2184_v4  ;;  %v2181_v15 = vunpack.i.h.bf16 %v2179_v12  ;;  %v2180_v7 = vunpack.i.l.bf16 %v2179_v12 }
 0x189   : > { %1880 = vmatprep.mubr.msk.bf16.mxu1 %vm947_vm5, %v766_v8 }
 0x18a   : > { %1065 = vmatmul.mubr.bf16.vlgmr.msra.gmra.mrb[0].mxu1 %v765_v59  ;;  %v730_v51 = vsel %vm717_vm3, %v3139_v47, %v2185_v14  ;;  %v731_v11 = vsel %vm717_vm3, %v3135_v42, %v2186_v13  ;;  %v726_v23 = vsel %vm717_vm3, %v3165_v3, %v2180_v7  ;;  %v727_v16 = vsel %vm717_vm3, %v3161_v50, %v2181_v15 }
 0x18b   : > { %v2194_v24 = vpop.permute.xlu1 %2193  ;;  %v2189_v25 = vpop.permute.xlu0 %2188  ;;  %v767_v29 = vpack.c.bf16 %v731_v11, %v730_v51  ;;  %v763_v21 = vpack.c.bf16 %v727_v16, %v726_v23  ;;  %v804_v59 = vsub.s32 0, %v2950_v1 }
 0x18c   : > { %v2196_v28 = vunpack.i.h.bf16 %v2194_v24  ;;  %v2195_v52 = vunpack.i.l.bf16 %v2194_v24  ;;  %v2191_v30 = vunpack.i.h.bf16 %v2189_v25  ;;  %v2190_v19 = vunpack.i.l.bf16 %v2189_v25 }
 0x18e   : > { %v749_v47 = vsel %vm736_vm4, %v2185_v14, %v2195_v52  ;;  %v750_v31 = vsel %vm736_vm4, %v2186_v13, %v2196_v28  ;;  %1035 = vmatmul.mubr.bf16.gmra.mrb[8].mxu0 %v759_v26  ;;  %v745_v3 = vsel %vm736_vm4, %v2180_v7, %v2190_v19  ;;  %v746_v32 = vsel %vm736_vm4, %v2181_v15, %v2191_v30 }
 0x18f   : > { %v768_v42 = vpack.c.bf16 %v750_v31, %v749_v47  ;;  %1878 = vmatprep.mubr.msk.bf16.mxu0 %vm947_vm5, %v762_v18  ;;  %v2204_v50 = vpop.permute.xlu1 %2203  ;;  %v2199_v33 = vpop.permute.xlu0 %2198  ;;  %v764_v43 = vpack.c.bf16 %v746_v32, %v745_v3 }
 0x190   : > { %v2206_v34 = vunpack.i.h.bf16 %v2204_v50  ;;  %v2205_v35 = vunpack.i.l.bf16 %v2204_v50  ;;  %v2201_v36 = vunpack.i.h.bf16 %v2199_v33  ;;  %v2200_v37 = vunpack.i.l.bf16 %v2199_v33 }
 0x191   : > { %1881 = vmatprep.mubr.msk.bf16.mxu1 %vm947_vm5, %v768_v42 }
 0x192   : > { %1075 = vmatmul.mubr.bf16.gmra.mrb[4].mxu1 %v767_v29  ;;  %v752_v38 = vsel %vm736_vm4, %v2201_v36, %v2206_v34  ;;  %v751_v39 = vsel %vm736_vm4, %v2200_v37, %v2205_v35  ;;  %v732_v40 = vsel %vm717_vm3, %v3153_v63, %v2200_v37  ;;  %v733_v41 = vsel %vm717_vm3, %v3157_v2, %v2201_v36 }
 0x193   : > { %v770_v26 = vpack.c.bf16 %v752_v38, %v751_v39  ;;  %v769_v44 = vpack.c.bf16 %v733_v41, %v732_v40  ;;  %v2214_v45 = vpop.permute.xlu1 %2213  ;;  %v2209_v49 = vpop.permute.xlu0 %2208 }
 0x194   : > { %v2216_v54 = vunpack.i.h.bf16 %v2214_v45  ;;  %v2215_v9 = vunpack.i.l.bf16 %v2214_v45  ;;  %v2211_v55 = vunpack.i.h.bf16 %v2209_v49  ;;  %v2210_v10 = vunpack.i.l.bf16 %v2209_v49 }
 0x195   : > { %1882 = vmatprep.mubr.msk.bf16.mxu1 %vm947_vm5, %v770_v26 }
 0x196   : > { %1045 = vmatmul.mubr.bf16.gmra.mrb[12].mxu0 %v761_v48  ;;  %v754_v56 = vsel %vm736_vm4, %v2211_v55, %v2216_v54  ;;  %v753_v57 = vsel %vm736_vm4, %v2210_v10, %v2215_v9  ;;  %v734_v63 = vsel %vm717_vm3, %v3190_v17, %v2210_v10  ;;  %v735_v2 = vsel %vm717_vm3, %v3186_v20, %v2211_v55  ;;  %v800_v48 = vld [vmem:[#allocation11] sm:$0x3] }
 0x197   : > { %1879 = vmatprep.mubr.msk.bf16.mxu0 %vm947_vm5, %v764_v43  ;;  %v772_v58 = vpack.c.bf16 %v754_v56, %v753_v57  ;;  %v771_v6 = vpack.c.bf16 %v735_v2, %v734_v63  ;;  %v3288_v17 = vrot.slane %v800_v48, %v804_v59  ;;  %v3292_v20 = vrot.slane %v800_v48, %v808_v60 }
 0x19a   : > { %1085 = vmatmul.mubr.bf16.gmra.mrb[8].mxu1 %v769_v44 }
 0x19b   : > { %1883 = vmatprep.mubr.msk.bf16.mxu1 %vm947_vm5, %v772_v58 }
 0x19e   : > { %1055 = vmatmul.mubr.bf16.gmra.mrb[16].mxu0 %v763_v21 }
 0x1a2   : > { %1095 = vmatmul.mubr.bf16.gmra.mrb[12].mxu1 %v771_v6 }
 0x1a4   : > { %v1277_v53 = vpop.permute.xlu1 %1276  ;;  %v1272_v12 = vpop.permute.xlu0 %1271 }
 0x1a8   : > { %v1282_v11 = vpop.permute.xlu1 %1281  ;;  %v1287_v55 = vpop.permute.xlu0 %1286 }
 0x1ac   : > { %v3318_v39 = vpop.permute.xlu1 %1291 }
 0x251   : > { %v1016_v61 = vpop.f32.mrb[0].mxu0 }
 0x252   : > { %v1017_v22 = vadd.f32 %v1016_v61, %v3288_v17  ;;  %v1018_v27 = vpop.f32.mrb[1].mxu0 }
 0x253   : > { %v1019_v62 = vadd.f32 %v1018_v27, %v3292_v20  ;;  %v1020_v4 = vpop.f32.mrb[2].mxu0 }
 0x254   : > { %v1105_v46 = vmax.f32 %v1017_v22, 0.0  ;;  %v1021_v5 = vadd.f32 %v1020_v4, %v3288_v17  ;;  %v1022_v8 = vpop.f32.mrb[3].mxu0 }
 0x255   : > { %v1106_v13 = vmax.f32 %v1019_v62, 0.0  ;;  %v1023_v14 = vadd.f32 %v1022_v8, %v3292_v20 }
 0x256   : > { %v1359_v7 = vmul.f32 %v1272_v12, %v1105_v46  ;;  %v1107_v51 = vmax.f32 %v1021_v5, 0.0 }
 0x257   : > { %v1912_v23 = vpack.c.bf16 %v1106_v13, %v1105_v46  ;;  %v1360_v16 = vmul.f32 %v1272_v12, %v1106_v13  ;;  %v1108_v18 = vmax.f32 %v1023_v14, 0.0 }
 0x258   : > { %v1361_v24 = vmul.f32 %v1277_v53, %v1107_v51  ;;  %v1497_v52 = vmul.f32 %v1359_v7, %v1105_v46 }
 0x259   : > { %1251 = vst.msk [vmem:[%s3305_s16] sm:$0xff] %vm3299_vm7, %v1912_v23  ;;  %v1498_v25 = vmul.f32 %v1360_v16, %v1106_v13  ;;  %v1913_v29 = vpack.c.bf16 %v1108_v18, %v1107_v51  ;;  %v1362_v21 = vmul.f32 %v1277_v53, %v1108_v18  ;;  %v1026_v28 = vpop.f32.mrb[4].mxu0  ;;  %v1419_v42 = vsel %vm736_vm4, %v1360_v16, 0.0 }
 0x25a   : > { %v1396_v30 = vadd.f32 %v1361_v24, %v1359_v7  ;;  %v1499_v19 = vmul.f32 %v1361_v24, %v1107_v51  ;;  %v1027_v47 = vadd.f32 %v1026_v28, %v3288_v17  ;;  %v1028_v31 = vpop.f32.mrb[5].mxu0  ;;  %v3329_v7 = vpop.permute.xlu1 %1301 }
 0x25b   : > { %1252 = vst.msk [vmem:[%s3305_s16 + $0x8] sm:$0xff] %vm3299_vm7, %v1913_v29  ;;  %v1420_v3 = vsel %vm736_vm4, %v1362_v21, 0.0  ;;  %v1500_v32 = vmul.f32 %v1362_v21, %v1108_v18  ;;  %v1029_v50 = vadd.f32 %v1028_v31, %v3292_v20  ;;  %v1030_v33 = vpop.f32.mrb[6].mxu0  ;;  %v1556_v40 = vsel %vm736_vm4, %v1498_v25, 0.0 }
 0x25c   : > { %v1533_v34 = vadd.f32 %v1499_v19, %v1497_v52  ;;  %v1421_v35 = vadd.f32 %v1420_v3, %v1419_v42  ;;  %v1109_v36 = vmax.f32 %v1027_v47, 0.0  ;;  %v1031_v37 = vadd.f32 %v1030_v33, %v3288_v17  ;;  %v1032_v38 = vpop.f32.mrb[7].mxu0  ;;  %v1297_v52 = vpop.permute.xlu0 %1296 }
 0x25d   : > { %v1557_v41 = vsel %vm736_vm4, %v1500_v32, 0.0  ;;  %v1110_v43 = vmax.f32 %v1029_v50, 0.0  ;;  %v1033_v26 = vadd.f32 %v1032_v38, %v3292_v20  ;;  %v1066_v44 = vpop.f32.mrb[0].mxu1 }
 0x25e   : > { %v1558_v45 = vadd.f32 %v1557_v41, %v1556_v40  ;;  %v1363_v49 = vmul.f32 %v1282_v11, %v1109_v36  ;;  %v1111_v54 = vmax.f32 %v1031_v37, 0.0  ;;  %v1068_v9 = vpop.f32.mrb[1].mxu1  ;;  %v1067_v63 = vadd.f32 %v1066_v44, %v3288_v17  ;;  %v3352_v41 = vpop.permute.xlu1 %1311 }
 0x25f   : > { %v1914_v10 = vpack.c.bf16 %v1110_v43, %v1109_v36  ;;  %v1364_v56 = vmul.f32 %v1282_v11, %v1110_v43  ;;  %v1112_v57 = vmax.f32 %v1033_v26, 0.0  ;;  %v1070_v2 = vpop.f32.mrb[2].mxu1  ;;  %v1069_v53 = vadd.f32 %v1068_v9, %v3292_v20 }
 0x260   : > { %v1397_v58 = vadd.f32 %v1396_v30, %v1363_v49  ;;  %v1501_v6 = vmul.f32 %v1363_v49, %v1109_v36  ;;  %v1365_v48 = vmul.f32 %v1287_v55, %v1111_v54  ;;  %v1072_v61 = vpop.f32.mrb[3].mxu1  ;;  %v3336_v16 = vmax.f32 %v1067_v63, 0.0 }
 0x261   : > { %1253 = vst.msk [vmem:[%s3305_s16 + $0x10] sm:$0xff] %vm3299_vm7, %v1914_v10  ;;  %v1422_v22 = vsel %vm736_vm4, %v1364_v56, 0.0  ;;  %v1502_v27 = vmul.f32 %v1364_v56, %v1110_v43  ;;  %v1915_v62 = vpack.c.bf16 %v1112_v57, %v1111_v54  ;;  %v1366_v4 = vmul.f32 %v1287_v55, %v1112_v57  ;;  %v1036_v46 = vpop.f32.mrb[8].mxu0  ;;  %v3360_v56 = vpop.permute.xlu0 %1306 }
 0x262   : > { %v1534_v5 = vadd.f32 %v1533_v34, %v1501_v6  ;;  %v1423_v8 = vadd.f32 %v1422_v22, %v1421_v35  ;;  %v1398_v12 = vadd.f32 %v1397_v58, %v1365_v48  ;;  %v1503_v13 = vmul.f32 %v1365_v48, %v1111_v54  ;;  %v1038_v14 = vpop.f32.mrb[9].mxu0 }
 0x263   : > { %v1559_v51 = vsel %vm736_vm4, %v1502_v27, 0.0  ;;  %1254 = vst.msk [vmem:[%s3305_s16 + $0x18] sm:$0xff] %vm3299_vm7, %v1915_v62  ;;  %v1424_v11 = vsel %vm736_vm4, %v1366_v4, 0.0  ;;  %v1504_v23 = vmul.f32 %v1366_v4, %v1112_v57  ;;  %v1040_v18 = vpop.f32.mrb[10].mxu0  ;;  %v3338_v21 = vmax.f32 %v1069_v53, 0.0 }
 0x264   : > { %v1560_v24 = vadd.f32 %v1559_v51, %v1558_v45  ;;  %v1535_v25 = vadd.f32 %v1534_v5, %v1503_v13  ;;  %v1425_v29 = vadd.f32 %v1424_v11, %v1423_v8  ;;  %v1042_v28 = vpop.f32.mrb[11].mxu0  ;;  %v1037_v19 = vadd.f32 %v1036_v46, %v3288_v17 }
 0x265   : > { %v1561_v30 = vsel %vm736_vm4, %v1504_v23, 0.0  ;;  %v1071_v47 = vadd.f32 %v1070_v2, %v3288_v17  ;;  %v1076_v31 = vpop.f32.mrb[4].mxu1  ;;  %v1922_v3 = vpack.c.bf16 %v3338_v21, %v3336_v16  ;;  %v1039_v32 = vadd.f32 %v1038_v14, %v3292_v20 }
 0x266   : > { %v1562_v42 = vadd.f32 %v1561_v30, %v1560_v24  ;;  %v1078_v50 = vpop.f32.mrb[5].mxu1  ;;  %v1113_v33 = vmax.f32 %v1037_v19, 0.0  ;;  %v1073_v34 = vadd.f32 %v1072_v61, %v3292_v20  ;;  %v1041_v35 = vadd.f32 %v1040_v18, %v3288_v17 }
 0x267   : > { %v1080_v36 = vpop.f32.mrb[6].mxu1  ;;  %1261 = vst.msk [vmem:[%s3305_s16 + $0x50] sm:$0xff] %vm3299_vm7, %v1922_v3  ;;  %v1114_v37 = vmax.f32 %v1039_v32, 0.0  ;;  %v1043_v38 = vadd.f32 %v1042_v28, %v3292_v20  ;;  %v3355_v26 = vmax.f32 %v1071_v47, 0.0 }
 0x268   : > { %v1082_v40 = vpop.f32.mrb[7].mxu1  ;;  %v1367_v43 = vmul.f32 %v3318_v39, %v1113_v33  ;;  %v3357_v44 = vmax.f32 %v1073_v34, 0.0  ;;  %v1115_v45 = vmax.f32 %v1041_v35, 0.0  ;;  %v1081_v47 = vadd.f32 %v1080_v36, %v3288_v17 }
 0x269   : > { %v1046_v49 = vpop.f32.mrb[12].mxu0  ;;  %v1916_v54 = vpack.c.bf16 %v1114_v37, %v1113_v33  ;;  %v1368_v9 = vmul.f32 %v3318_v39, %v1114_v37  ;;  %v1116_v55 = vmax.f32 %v1043_v38, 0.0 }
 0x26a   : > { %v1048_v10 = vpop.f32.mrb[13].mxu0  ;;  %v1399_v57 = vadd.f32 %v1398_v12, %v1367_v43  ;;  %v1505_v63 = vmul.f32 %v1367_v43, %v1113_v33  ;;  %v1923_v2 = vpack.c.bf16 %v3357_v44, %v3355_v26  ;;  %v1369_v53 = vmul.f32 %v1297_v52, %v1115_v45  ;;  %v1322_v12 = vpop.permute.xlu1 %1321 }
 0x26b   : > { %v1050_v58 = vpop.f32.mrb[14].mxu0  ;;  %1255 = vst.msk [vmem:[%s3305_s16 + $0x20] sm:$0xff] %vm3299_vm7, %v1916_v54  ;;  %v1426_v6 = vsel %vm736_vm4, %v1368_v9, 0.0  ;;  %v1506_v48 = vmul.f32 %v1368_v9, %v1114_v37  ;;  %v1917_v27 = vpack.c.bf16 %v1116_v55, %v1115_v45  ;;  %v1370_v62 = vmul.f32 %v1297_v52, %v1116_v55  ;;  %v3383_v52 = vpop.permute.xlu0 %1316 }
 0x26c   : > { %v3368_v61 = vpop.f32.mrb[15].mxu0  ;;  %v1536_v39 = vadd.f32 %v1535_v25, %v1505_v63  ;;  %v1427_v22 = vadd.f32 %v1426_v6, %v1425_v29  ;;  %1262 = vst.msk [vmem:[%s3305_s16 + $0x58] sm:$0xff] %vm3299_vm7, %v1923_v2  ;;  %v1400_v5 = vadd.f32 %v1399_v57, %v1369_v53  ;;  %v1507_v14 = vmul.f32 %v1369_v53, %v1115_v45 }
 0x26d   : > { %v1086_v4 = vpop.f32.mrb[8].mxu1  ;;  %v1563_v46 = vsel %vm736_vm4, %v1506_v48, 0.0  ;;  %1256 = vst.msk [vmem:[%s3305_s16 + $0x28] sm:$0xff] %vm3299_vm7, %v1917_v27  ;;  %v1428_v51 = vsel %vm736_vm4, %v1370_v62, 0.0  ;;  %v1508_v11 = vmul.f32 %v1370_v62, %v1116_v55  ;;  %v3379_v18 = vmul.f32 %v1322_v12, %v3336_v16 }
 0x26e   : > { %v1088_v8 = vpop.f32.mrb[9].mxu1  ;;  %v1564_v13 = vadd.f32 %v1563_v46, %v1562_v42  ;;  %v1429_v24 = vadd.f32 %v1428_v51, %v1427_v22  ;;  %v1077_v25 = vadd.f32 %v1076_v31, %v3288_v17  ;;  %v1079_v29 = vadd.f32 %v1078_v50, %v3292_v20 }
 0x26f   : > { %v1090_v23 = vpop.f32.mrb[10].mxu1  ;;  %v1537_v30 = vadd.f32 %v1536_v39, %v1507_v14  ;;  %v1565_v19 = vsel %vm736_vm4, %v1508_v11, 0.0  ;;  %v1083_v42 = vadd.f32 %v1082_v40, %v3292_v20  ;;  %v1047_v31 = vadd.f32 %v1046_v49, %v3288_v17  ;;  %v1327_v2 = vpop.permute.xlu0 %1326 }
 0x270   : > { %v1092_v28 = vpop.f32.mrb[11].mxu1  ;;  %v1566_v32 = vadd.f32 %v1565_v19, %v1564_v13  ;;  %v3390_v33 = vmax.f32 %v1077_v25, 0.0  ;;  %v3392_v34 = vmax.f32 %v1079_v29, 0.0  ;;  %v1380_v35 = vmul.f32 %v1322_v12, %v3338_v21 }
 0x271   : > { %v3388_v3 = vpop.f32.mrb[16].mxu0  ;;  %v3398_v37 = vmax.f32 %v1081_v47, 0.0  ;;  %v3400_v38 = vmax.f32 %v1083_v42, 0.0  ;;  %v1049_v36 = vadd.f32 %v1048_v10, %v3292_v20  ;;  %v1117_v45 = vmax.f32 %v1047_v31, 0.0 }
 0x272   : > { %v3395_v50 = vpop.f32.mrb[17].mxu0  ;;  %v1924_v43 = vpack.c.bf16 %v3392_v34, %v3390_v33  ;;  %v1051_v55 = vadd.f32 %v1050_v58, %v3288_v17  ;;  %v3422_v6 = vmul.f32 %v3379_v18, %v3336_v16  ;;  %v3425_v48 = vsel %vm736_vm4, %v1380_v35, 0.0 }
 0x273   : > { %v3403_v40 = vpop.f32.mrb[18].mxu0  ;;  %v1925_v49 = vpack.c.bf16 %v3400_v38, %v3398_v37  ;;  %v1118_v9 = vmax.f32 %v1049_v36, 0.0  ;;  %v1371_v10 = vmul.f32 %v3329_v7, %v1117_v45  ;;  %v1518_v58 = vmul.f32 %v1380_v35, %v3338_v21 }
 0x274   : > { %v3407_v54 = vpop.f32.mrb[19].mxu0  ;;  %1263 = vst.msk [vmem:[%s3305_s16 + $0x60] sm:$0xff] %vm3299_vm7, %v1924_v43  ;;  %v3434_v22 = vmul.f32 %v1327_v2, %v3355_v26  ;;  %v1382_v12 = vmul.f32 %v1327_v2, %v3357_v44  ;;  %v1119_v21 = vmax.f32 %v1051_v55, 0.0  ;;  %v1053_v13 = vadd.f32 %v3368_v61, %v3292_v20 }
 0x275   : > { %v3412_v57 = vpop.f32.mrb[12].mxu1  ;;  %1264 = vst.msk [vmem:[%s3305_s16 + $0x68] sm:$0xff] %vm3299_vm7, %v1925_v49  ;;  %v1918_v53 = vpack.c.bf16 %v1118_v9, %v1117_v45  ;;  %v1401_v27 = vadd.f32 %v1400_v5, %v1371_v10  ;;  %v1509_v62 = vmul.f32 %v1371_v10, %v1117_v45  ;;  %v1372_v46 = vmul.f32 %v3329_v7, %v1118_v9 }
 0x276   : > { %v3418_v63 = vpop.f32.mrb[13].mxu1  ;;  %v1087_v14 = vadd.f32 %v1086_v4, %v3288_v17  ;;  %v1089_v25 = vadd.f32 %v1088_v8, %v3292_v20  ;;  %v1373_v29 = vmul.f32 %v3360_v56, %v1119_v21  ;;  %v1120_v19 = vmax.f32 %v1053_v13, 0.0 }
 0x277   : > { %v3431_v39 = vpop.f32.mrb[14].mxu1  ;;  %1257 = vst.msk [vmem:[%s3305_s16 + $0x30] sm:$0xff] %vm3299_vm7, %v1918_v53  ;;  %v1538_v51 = vadd.f32 %v1537_v30, %v1509_v62  ;;  %v1430_v11 = vsel %vm736_vm4, %v1372_v46, 0.0  ;;  %v1510_v5 = vmul.f32 %v1372_v46, %v1118_v9  ;;  %v1091_v61 = vadd.f32 %v1090_v23, %v3288_v17  ;;  %v1332_v9 = vpop.permute.xlu1 %1331 }
 0x278   : > { %v3437_v16 = vpop.f32.mrb[15].mxu1  ;;  %v1431_v7 = vadd.f32 %v1430_v11, %v1429_v24  ;;  %v3449_v47 = vmax.f32 %v1087_v14, 0.0  ;;  %v3452_v31 = vmax.f32 %v1089_v25, 0.0  ;;  %v1093_v4 = vadd.f32 %v1092_v28, %v3292_v20  ;;  %v1337_v62 = vpop.permute.xlu0 %1336 }
 0x279   : > { %v1567_v42 = vsel %vm736_vm4, %v1510_v5, 0.0  ;;  %v1402_v35 = vadd.f32 %v1401_v27, %v1373_v29  ;;  %v1511_v36 = vmul.f32 %v1373_v29, %v1119_v21  ;;  %v1919_v8 = vpack.c.bf16 %v1120_v19, %v1119_v21 }
 0x27a   : > { %v1568_v30 = vadd.f32 %v1567_v42, %v1566_v32  ;;  %v3457_v24 = vsel %vm736_vm4, %v1518_v58, 0.0  ;;  %v1520_v43 = vmul.f32 %v1382_v12, %v3357_v44  ;;  %v1374_v45 = vmul.f32 %v3360_v56, %v1120_v19 }
 0x27b   : > { %v1926_v49 = vpack.c.bf16 %v3452_v31, %v3449_v47  ;;  %v1539_v55 = vadd.f32 %v1538_v51, %v1511_v36  ;;  %1258 = vst.msk [vmem:[%s3305_s16 + $0x38] sm:$0xff] %vm3299_vm7, %v1919_v8  ;;  %v3466_v23 = vmax.f32 %v1091_v61, 0.0  ;;  %v3468_v28 = vmax.f32 %v1093_v4, 0.0 }
 0x27c   : > { %v1057_v32 = vadd.f32 %v3388_v3, %v3288_v17  ;;  %v3473_v10 = vmul.f32 %v1332_v9, %v3390_v33  ;;  %v1384_v44 = vmul.f32 %v1332_v9, %v3392_v34  ;;  %v1432_v56 = vsel %vm736_vm4, %v1374_v45, 0.0 }
 0x27d   : > { %v1512_v2 = vmul.f32 %v1374_v45, %v1120_v19  ;;  %1265 = vst.msk [vmem:[%s3305_s16 + $0x70] sm:$0xff] %vm3299_vm7, %v1926_v49  ;;  %v3482_v58 = vmul.f32 %v3434_v22, %v3355_v26  ;;  %v3485_v53 = vsel %vm736_vm4, %v1382_v12, 0.0  ;;  %v1433_v3 = vadd.f32 %v1432_v56, %v1431_v7  ;;  %v1342_v56 = vpop.permute.xlu1 %1341 }
 0x27e   : > { %v1927_v27 = vpack.c.bf16 %v3468_v28, %v3466_v23  ;;  %v3490_v46 = vsel %vm736_vm4, %v1520_v43, 0.0  ;;  %v1121_v13 = vmax.f32 %v1057_v32, 0.0  ;;  %v1059_v14 = vadd.f32 %v3395_v50, %v3292_v20 }
 0x27f   : > { %v1569_v21 = vsel %vm736_vm4, %v1512_v2, 0.0  ;;  %v3496_v26 = vmul.f32 %v1337_v62, %v3398_v37  ;;  %v1386_v12 = vmul.f32 %v1337_v62, %v3400_v38  ;;  %v1061_v11 = vadd.f32 %v3403_v40, %v3288_v17 }
 0x280   : > { %v1570_v51 = vadd.f32 %v1569_v21, %v1568_v30  ;;  %1266 = vst.msk [vmem:[%s3305_s16 + $0x78] sm:$0xff] %vm3299_vm7, %v1927_v27  ;;  %v1521_v5 = vmul.f32 %v3473_v10, %v3390_v33  ;;  %v3507_v25 = vsel %vm736_vm4, %v1384_v44, 0.0  ;;  %v1375_v50 = vmul.f32 %v3352_v41, %v1121_v13 }
 0x281   : > { %v1122_v7 = vmax.f32 %v1059_v14, 0.0  ;;  %v1123_v29 = vmax.f32 %v1061_v11, 0.0  ;;  %v1063_v19 = vadd.f32 %v3407_v54, %v3292_v20  ;;  %v1097_v42 = vadd.f32 %v3412_v57, %v3288_v17 }
 0x282   : > { %v1099_v40 = vadd.f32 %v3418_v63, %v3292_v20  ;;  %v1522_v61 = vmul.f32 %v1384_v44, %v3392_v34  ;;  %v1403_v33 = vadd.f32 %v1402_v35, %v1375_v50  ;;  %v1513_v4 = vmul.f32 %v1375_v50, %v1121_v13 }
 0x283   : > { %v1920_v30 = vpack.c.bf16 %v1122_v7, %v1121_v13  ;;  %v3519_v36 = vmul.f32 %v3496_v26, %v3398_v37  ;;  %v1376_v8 = vmul.f32 %v3352_v41, %v1122_v7  ;;  %v1377_v43 = vmul.f32 %v3383_v52, %v1123_v29 }
 0x284   : > { %v1124_v54 = vmax.f32 %v1063_v19, 0.0  ;;  %v1540_v45 = vadd.f32 %v1539_v55, %v1513_v4  ;;  %v3526_v57 = vmax.f32 %v1097_v42, 0.0  ;;  %v3528_v34 = vmax.f32 %v1099_v40, 0.0 }
 0x285   : > { %1259 = vst.msk [vmem:[%s3305_s16 + $0x40] sm:$0xff] %vm3299_vm7, %v1920_v30  ;;  %v1101_v63 = vadd.f32 %v3431_v39, %v3288_v17  ;;  %v1434_v37 = vsel %vm736_vm4, %v1376_v8, 0.0  ;;  %v1514_v35 = vmul.f32 %v1376_v8, %v1122_v7  ;;  %v1404_v41 = vadd.f32 %v1403_v33, %v1377_v43 }
 0x286   : > { %v1515_v49 = vmul.f32 %v1377_v43, %v1123_v29  ;;  %v1435_v9 = vadd.f32 %v1434_v37, %v1433_v3  ;;  %v1921_v32 = vpack.c.bf16 %v1124_v54, %v1123_v29  ;;  %v1378_v55 = vmul.f32 %v3383_v52, %v1124_v54 }
 0x287   : > { %v1103_v44 = vadd.f32 %v3437_v16, %v3292_v20  ;;  %v1571_v2 = vsel %vm736_vm4, %v1514_v35, 0.0  ;;  %v1405_v17 = vadd.f32 %v1404_v41, %v3379_v18  ;;  %v1928_v27 = vpack.c.bf16 %v3528_v34, %v3526_v57  ;;  %v1347_v16 = vpop.permute.xlu0 %1346 }
 0x288   : > { %v1541_v39 = vadd.f32 %v1540_v45, %v1515_v49  ;;  %v3542_v3 = vsel %vm736_vm4, %v1386_v12, 0.0  ;;  %v1572_v62 = vadd.f32 %v1571_v2, %v1570_v51  ;;  %1260 = vst.msk [vmem:[%s3305_s16 + $0x48] sm:$0xff] %vm3299_vm7, %v1921_v32  ;;  %v1436_v20 = vsel %vm736_vm4, %v1378_v55, 0.0 }
 0x289   : > { %v1516_v52 = vmul.f32 %v1378_v55, %v1124_v54  ;;  %v1524_v21 = vmul.f32 %v1386_v12, %v3400_v38  ;;  %v1406_v18 = vadd.f32 %v1405_v17, %v3434_v22  ;;  %v1437_v14 = vadd.f32 %v1436_v20, %v1435_v9  ;;  %1267 = vst.msk [vmem:[%s3305_s16 + $0x80] sm:$0xff] %vm3299_vm7, %v1928_v27 }
 0x28a   : > { %v1542_v13 = vadd.f32 %v1541_v39, %v3422_v6  ;;  %v1387_v51 = vmul.f32 %v1342_v56, %v3449_v47  ;;  %v3557_v50 = vmax.f32 %v1101_v63, 0.0  ;;  %v3559_v7 = vmax.f32 %v1103_v44, 0.0 }
 0x28b   : > { %v1573_v11 = vsel %vm736_vm4, %v1516_v52, 0.0  ;;  %v1407_v29 = vadd.f32 %v1406_v18, %v3473_v10  ;;  %v1439_v22 = vadd.f32 %v3425_v48, %v1437_v14  ;;  %v1579_v12 = vsel %vm736_vm4, %v1522_v61, 0.0  ;;  %v1352_v48 = vpop.permute.xlu1 %1351 }
 0x28c   : > { %v1543_v38 = vadd.f32 %v1542_v13, %v3482_v58  ;;  %v1574_v6 = vadd.f32 %v1573_v11, %v1572_v62  ;;  %v1388_v19 = vmul.f32 %v1342_v56, %v3452_v31  ;;  %v1389_v42 = vmul.f32 %v1347_v16, %v3466_v23 }
 0x28d   : > { %v1929_v10 = vpack.c.bf16 %v3559_v7, %v3557_v50  ;;  %v1441_v40 = vadd.f32 %v3485_v53, %v1439_v22  ;;  %v1408_v61 = vadd.f32 %v1407_v29, %v3496_v26  ;;  %v1581_v4 = vsel %vm736_vm4, %v1524_v21, 0.0 }
 0x28e   : > { %v1544_v58 = vadd.f32 %v1543_v38, %v1521_v5  ;;  %v1576_v33 = vadd.f32 %v3457_v24, %v1574_v6  ;;  %v1525_v30 = vmul.f32 %v1387_v51, %v3449_v47  ;;  %v1390_v8 = vmul.f32 %v1347_v16, %v3468_v28  ;;  %v1357_v5 = vpop.permute.xlu0 %1356 }
 0x28f   : > { %v1391_v43 = vmul.f32 %v1352_v48, %v3526_v57  ;;  %1268 = vst.msk [vmem:[%s3305_s16 + $0x88] sm:$0xff] %vm3299_vm7, %v1929_v10  ;;  %v1443_v53 = vadd.f32 %v3507_v25, %v1441_v40  ;;  %v1409_v24 = vadd.f32 %v1408_v61, %v1387_v51 }
 0x290   : > { %v1578_v54 = vadd.f32 %v3490_v46, %v1576_v33  ;;  %v1545_v26 = vadd.f32 %v1544_v58, %v3519_v36 }
 0x291   : > { %2473 = shalt.err (!%p2470_p8)
}
 0x292   : > { %s2474_s13 = scalar_lea.hbm %s3567_s10, 2304  ;;  %s2478_s12 = scalar_lea.hbm %s3694_s7, 4608 }
 0x293   : > { %p2475_p12 = scmp.ne.s32.totalorder %s3567_s10, %s2474_s13  ;;  %p2479_p13 = scmp.lt.u32.totalorder %s3567_s10, %s3694_s7 }
 0x294   : > { %p2480_p1 = scmp.lt.u32.totalorder %s2478_s12, %s2474_s13  ;;  %p2482_p7 = scmp.lt.u32.totalorder %s2474_s13, %s3567_s10 }
 0x295   : > { %p2476_p0 = pnand %p2475_p12, %p3732_p2 }
 0x296   : > { %p2481_p3 = por %p2480_p1, %p2479_p13 }
 0x297   : > { %p2477_p4 = pneg %p2476_p0 }
 0x298   : > { %p2483_p6 = por %p2482_p7, %p2481_p3 }
 0x29a   : > { %p2484_p11 = pnand %p2483_p6, %p2477_p4 }
 0x29c   : > { %2487 = shalt.err (!%p2484_p11)
}
 0x29d   : > { %s2591_s1 = smov 128   ;;  %s2592_s16 = smov 8   ;;  %v1526_v15 = vmul.f32 %v1388_v19, %v3452_v31  ;;  %v1527_v47 = vmul.f32 %v1389_v42, %v3466_v23  ;;  %v1392_v46 = vmul.f32 %v1352_v48, %v3528_v34  ;;  %v1393_v25 = vmul.f32 %v1357_v5, %v3557_v50  ;;  %v1395_v40 = vld [vmem:[#allocation13] sm:$0x3] }
 0x29e   : > { %2034 = dma.vmem_to_hbm [thread:$0]  (%p3732_p2), %s3574_s2, 2304, %s3567_s10, %s1621_s18, %s2591_s1, %s2591_s1, %s2592_s16   ;;  %v1580_v36 = vadd.f32 %v1579_v12, %v1578_v54  ;;  %v1410_v45 = vadd.f32 %v1409_v24, %v1389_v42  ;;  %v1546_v63 = vadd.f32 %v1545_v26, %v1525_v30  ;;  %v1445_v37 = vadd.f32 %v3542_v3, %v1443_v53 }
 0x29f   : > { %v1446_v35 = vsel %vm736_vm4, %v1388_v19, 0.0  ;;  %v1528_v41 = vmul.f32 %v1390_v8, %v3468_v28  ;;  %v1529_v49 = vmul.f32 %v1391_v43, %v3526_v57  ;;  %v1394_v9 = vmul.f32 %v1357_v5, %v3559_v7  ;;  %s1845_s19 = sshll.u32 %s2917_s25, 4  ;;  %s1932_s2 = sshll.u32 %s2661_s11, 8 }
 0x2a0   : > { %v1411_v31 = vadd.f32 %v1410_v45, %v1391_v43  ;;  %v1547_v32 = vadd.f32 %v1546_v63, %v1527_v47  ;;  %v1447_v23 = vadd.f32 %v1446_v35, %v1445_v37  ;;  %v1582_v55 = vadd.f32 %v1581_v4, %v1580_v36  ;;  %s438_s0 = scalar_lea.vmem [#allocation15], %s1845_s19  ;;  %s3643_s6 = scalar_lea.hbm %s3695_s8, %s1932_s2 }
 0x2a1   : > { %v1583_v44 = vsel %vm736_vm4, %v1526_v15, 0.0  ;;  %v1448_v56 = vsel %vm736_vm4, %v1390_v8, 0.0  ;;  %v1530_v2 = vmul.f32 %v1392_v46, %v3528_v34  ;;  %v1531_v17 = vmul.f32 %v1393_v25, %v3557_v50  ;;  %s1657_s9 = sshll.u32 %s438_s0, 4  ;;  %s1626_s23 = scalar_lea.sflag [#allocation16], %s2917_s25  ;;  %s3645_s9 = int_to_ptr.vmem [resolvable:$true] %s1657_s9 }
 0x2a2   : > { %v1548_v39 = vadd.f32 %v1547_v32, %v1529_v49  ;;  %v1449_v27 = vadd.f32 %v1448_v56, %v1447_v23  ;;  %v1584_v3 = vadd.f32 %v1583_v44, %v1582_v55  ;;  %v1412_v28 = vadd.f32 %v1411_v31, %v1393_v25  ;;  %s2488_s17 = scalar_lea.vmem %s3645_s9, 256  ;;  %s2594_s11 = smov [#allocation15]  }
 0x2a3   : > { %v1585_v57 = vsel %vm736_vm4, %v1528_v41, 0.0  ;;  %v1450_v62 = vsel %vm736_vm4, %v1392_v46, 0.0  ;;  %v1532_v20 = vmul.f32 %v1394_v9, %v3559_v7  ;;  %v1587_v13 = vsel %vm736_vm4, %v1530_v2, 0.0  ;;  %p2489_p5 = scmp.ne.s32.totalorder %s3645_s9, %s2488_s17  ;;  %s2492_s22 = sshll.u32 %s2594_s11, 4  ;;  %s2493_s22 = int_to_ptr.vmem [resolvable:$false] %s2492_s22 }
 0x2a4   : > { %v1451_v52 = vadd.f32 %v1450_v62, %v1449_v27  ;;  %v1586_v16 = vadd.f32 %v1585_v57, %v1584_v3  ;;  %v1413_v21 = vrot.slane %v1412_v28, 4  ;;  %v1549_v18 = vadd.f32 %v1548_v39, %v1531_v17  ;;  %s2494_s13 = scalar_lea.vmem %s2493_s22, 512  ;;  %p2495_p8 = scmp.lt.s32.totalorder %s3645_s9, %s2493_s22 }
 0x2a5   : > { %v1452_v34 = vsel %vm736_vm4, %v1394_v9, 0.0  ;;  %v1589_v29 = vsel %vm736_vm4, %v1532_v20, 0.0  ;;  %v2593_v48 = vmov 1966171168   ;;  %v1464_v53 = vrot.slane %v1395_v40, %v804_v59  ;;  %p2490_p9 = pnand %p2489_p5, %p3732_p2  ;;  %p2496_p12 = scmp.lt.s32.totalorder %s2494_s13, %s2488_s17 }
 0x2a6   : > { %v1588_v14 = vadd.f32 %v1587_v13, %v1586_v16  ;;  %v1414_v51 = vadd.f32 %v1413_v21, %v1412_v28  ;;  %v1550_v11 = vrot.slane %v1549_v18, 4  ;;  %v1453_v50 = vadd.f32 %v1452_v34, %v1451_v52 }
 0x2a7   : > { %v1477_v58 = vunpack.c.l.s4 %v2593_v48  ;;  %v1468_v54 = vrot.slane %v1395_v40, %v808_v60  ;;  %vm1493_vm8 = vcmp.lt.s32.totalorder %v515_v0, 144  ;;  %p2491_p10 = pneg %p2490_p9  ;;  %p2497_p0 = por %p2496_p12, %p2495_p8 }
 0x2a8   : > { %v1415_v38 = vrot.slane %v1414_v51, 2  ;;  %v1551_v22 = vadd.f32 %v1550_v11, %v1549_v18  ;;  %v1454_v6 = vrot.slane %v1453_v50, 4  ;;  %v1590_v12 = vadd.f32 %v1589_v29, %v1588_v14 }
 0x2a9   : > { %v1478_v47 = vunpack.c.0.s8 %v1477_v58  ;;  %p2498_p4 = pnand %p2497_p0, %p2491_p10 }
 0x2aa   : > { %v1416_v19 = vadd.f32 %v1415_v38, %v1414_v51  ;;  %v1552_v7 = vrot.slane %v1551_v22, 2  ;;  %v1455_v42 = vadd.f32 %v1454_v6, %v1453_v50  ;;  %v1591_v10 = vrot.slane %v1590_v12, 4 }
 0x2ab   : > { %v1481_v35 = vsub.s32 %v1478_v47, %v2950_v1 }
 0x2ac   : > { %v1417_v33 = vrot.slane %v1416_v19, 1  ;;  %v1553_v61 = vadd.f32 %v1552_v7, %v1551_v22  ;;  %v1456_v4 = vrot.slane %v1455_v42, 2  ;;  %v1592_v30 = vadd.f32 %v1591_v10, %v1590_v12 }
 0x2ae   : > { %v1554_v8 = vrot.slane %v1553_v61, 1  ;;  %v1457_v43 = vadd.f32 %v1456_v4, %v1455_v42  ;;  %v1593_v5 = vrot.slane %v1592_v30, 2  ;;  %v1418_v24 = vadd.f32 %v1417_v33, %v1416_v19 }
 0x2b0   : > { %v1458_v26 = vrot.slane %v1457_v43, 1  ;;  %v1594_v15 = vadd.f32 %v1593_v5, %v1592_v30  ;;  %v1555_v46 = vadd.f32 %v1554_v8, %v1553_v61  ;;  %v1471_v45 = vmul.f32 %v1464_v53, %v1418_v24 }
 0x2b2   : > { %v1459_v25 = vadd.f32 %v1458_v26, %v1457_v43  ;;  %v1595_v36 = vrot.slane %v1594_v15, 1  ;;  %v1597_v41 = vmul.f32 %v1555_v46, %v1464_v53 }
 0x2b4   : > { %v1472_v63 = vmul.f32 %v1468_v54, %v1459_v25  ;;  %v1596_v37 = vadd.f32 %v1595_v36, %v1594_v15 }
 0x2b6   : > { %v1475_v59 = vcombine.low %v1471_v45, %v1472_v63  ;;  %v1598_v49 = vmul.f32 %v1596_v37, %v1468_v54 }
 0x2b8   : > { %v1601_v9 = vcombine.low %v1597_v41, %v1598_v49  ;;  %v1482_v60 = vrot.slane %v1475_v59, %v1481_v35 }
 0x2ba   : > { %v1489_v31 = vrot.slane %v1482_v60, %v1481_v35  ;;  %v1608_v32 = vrot.slane %v1601_v9, %v1481_v35 }
 0x2bc   : > { %1495 = vst.msk [vmem:[%s438_s0] ss:$8 sm:$0x3] %vm1493_vm8, %v1489_v31  ;;  %v1615_v23 = vrot.slane %v1608_v32, %v1481_v35 }
 0x2be   : > { %1902 = vst.msk [vmem:[%s438_s0 + $0x1] ss:$8 sm:$0x3] %vm1493_vm8, %v1615_v23 }
 0x2bf   : > { %2501 = shalt.err (!%p2498_p4)
}
 0x2c0   : > { %s2502_s25 = scalar_lea.hbm %s3643_s6, 256  ;;  %s2506_s12 = scalar_lea.hbm %s3695_s8, 512 }
 0x2c1   : > { %p2503_p13 = scmp.ne.s32.totalorder %s3643_s6, %s2502_s25  ;;  %p2507_p7 = scmp.lt.u32.totalorder %s3643_s6, %s3695_s8 }
 0x2c2   : > { %p2508_p6 = scmp.lt.u32.totalorder %s2506_s12, %s2502_s25  ;;  %p2510_p5 = scmp.lt.u32.totalorder %s2502_s25, %s3643_s6 }
 0x2c3   : > { %p2504_p1 = pnand %p2503_p13, %p3732_p2 }
 0x2c4   : > { %p2509_p11 = por %p2508_p6, %p2507_p7 }
 0x2c5   : > { %p2505_p3 = pneg %p2504_p1 }
 0x2c6   : > { %p2511_p9 = por %p2510_p5, %p2509_p11 }
 0x2c8   : > { %p2512_p10 = pnand %p2511_p9, %p2505_p3 }
 0x2ca   : > { %2515 = shalt.err (!%p2512_p10)
}
 0x2cb   : > { %2035 = dma.vmem_to_hbm [thread:$0]  (%p3732_p2), %s3645_s9, 256, %s3643_s6, %s1626_s23  }
 0x2cc PF: > { %s1669_s1 = sand.u32 1, %s2562_s27   ;;  %p3733_p8 = scmp.ne.s32.totalorder %s3718_s24, 0 }
 0x2cd   : > { %p3734_p12 = scmp.ge.s32.totalorder %s2574_s30, 2  ;;  %s1670_s16 = scalar_lea.sflag [#allocation4], %s1669_s1 }
 0x2cf   : > { %p2062_p0 = pnand %p3734_p12, %p3733_p8 }
 0x2d1   : > { %2553 = dma.done.wait (!%p2062_p0), %s1670_s16, 2304  }
 0x2d2   : > { %2555 = vsyncadd (!%p2062_p0), %s1670_s16, 4294964992  ;;  %s1679_s19 = scalar_lea.sflag [#allocation16], %s1669_s1 }
 0x2d3   : > { %2557 = dma.done.wait (!%p2062_p0), %s1679_s19, 256  }
 0x2d4   : > { %2559 = vsyncadd (!%p2062_p0), %s1679_s19, 4294967040  ;;  %p30_p2 = scmp.ge.s32.totalorder %s2802_s15, 4   ;;  %s3735_s27 = smov %s2566_s28 }
 0x2d5   : > { %s3736_s28 = smov %s2570_s29  ;;  %s3737_s29 = smov %s2814_s26 }
 0x2d6   : > { %s3738_s30 = smov %s2802_s15  ;;  %32 = sbr.rel (!%p30_p2) target bundleno = 18 (0x12), region = 144 }
 0x2dd   :  { %1684 = vsyncpa [#allocation3], 1 }
 0x2de   :  { %1686 = vsyncpa [#allocation3 + $0x1], 1 }
 0x2df   :  { %1687 = vsyncpa [#allocation6], 1 }
 0x2e0   :  { %1688 = vsyncpa [#allocation9], 1 }
 0x2e1   :  { %1690 = vsyncpa [#allocation9 + $0x1], 1 }
 0x2e2   :  { %1691 = vsyncpa [#allocation12], 1 }
 0x2e3   :  { %1692 = vsyncpa [#allocation4], 1 }
 0x2e4   :  { %1694 = vsyncpa [#allocation4 + $0x1], 1 }
 0x2e5   :  { %1695 = vsyncpa [#allocation16], 1 }
 0x2e6   :  { %1697 = vsyncpa [#allocation16 + $0x1], 1 }

// kernel: conv_block_forward.5
= control target key start
LH: loop header
LB: loop body
LE: loop exit
PB: predicated region body
PF: predicated region fallthrough
CT: control target
= control target key end

     0   :  { %8 = vsyncpa [#allocation3], 0  ;;  %s1316_s0 = inlined_call_operand.hbm [shape: bf16[288,144], index: 0, kind: input, shape index: {}, may-alias: {0,3}]   ;;  %s1317_s1 = inlined_call_operand.hbm [shape: f32[1,144], index: 1, kind: input, shape index: {}]   ;;  %s1318_s2 = inlined_call_operand.hbm [shape: f32[1,144], index: 2, kind: input, shape index: {}]   ;;  %s1319_s3 = inlined_call_operand.hbm [shape: bf16[288,144], index: 3, kind: output, shape index: {}, may-alias: {0,3}]  }
   0x1   :  { %10 = vsyncpa [#allocation3 + $0x1], 0 }
   0x2   :  { %11 = vsyncpa [#allocation6], 0 }
   0x3   :  { %12 = vsyncpa [#allocation4], 0 }
   0x4   :  { %14 = vsyncpa [#allocation4 + $0x1], 0  ;;  %s918_s12 = smov 0   ;;  %s920_s13 = smov 0  }
   0x5   :  { %s922_s14 = smov 0   ;;  %s924_s15 = smov 0  }
   0x6 LB: > { %s939_s16 = sadd.s32 4294967295, %s888_s15   ;;  %s603_s17 = sadd.s32 4294967294, %s888_s15   ;;  %s888_s15 = sphi %s924_s15, %s1346_s15   ;;  %s884_s14 = sphi %s922_s14, %s1345_s14   ;;  %s880_s13 = sphi %s920_s13, %s1344_s13   ;;  %s876_s12 = sphi %s918_s12, %s1343_s12  }
   0x7   : > { %s943_s18 = sadd.s32 1, %s888_s15   ;;  %s27_s19 = sadd.s32 1, %s884_s14 }
   0x8   : > { %s24_s20 = ssub.s32 %s888_s15, %s943_s18  ;;  %p34_p0 = scmp.ne.s32.totalorder %s884_s14, %s880_s13 }
   0x9   : > { %p25_p1 = scmp.eq.s32.totalorder %s24_s20, 0  ;;  %p35_p2 = scmp.eq.s32.totalorder %s888_s15, 0 }
   0xa   : > { %p40_p3 = scmp.ne.s32.totalorder %s880_s13, %s876_s12  ;;  %p1320_p4 = scmp.eq.s32.totalorder %s939_s16, 0 }
   0xb   : > { %s955_s21 = scalar_select %p25_p1, %s884_s14, %s27_s19  }
   0xc   : > { %p957_p5 = por %p35_p2, %p34_p0  ;;  %p963_p6 = por %p1320_p4, %p40_p3 }
   0xd   : > { %p106_p7 = scmp.eq.s32.totalorder %s939_s16, 1  ;;  %p112_p8 = scmp.eq.s32.totalorder %s603_s17, 1 }
   0xe   : > { %s1326_s23 = scalar_select %p963_p6, 1, 0 }
   0xf   : > { %p604_p9 = scmp.ge.s32.totalorder %s888_s15, 1  ;;  %p119_p10 = scmp.lt.s32.totalorder %s888_s15, 3 }
  0x10   : > { %p970_p11 = por %p106_p7, %p34_p0  ;;  %p974_p12 = por %p112_p8, %p40_p3 }
  0x11   : > { %p978_p13 = pnand %p604_p9, %p119_p10  ;;  %s890_s27 = smov [#allocation5]  }
  0x12   : > { %s1327_s24 = scalar_select %p970_p11, 1, 0 }
  0x13   : > { %s1328_s25 = scalar_select %p974_p12, 1, 0 }
  0x14   : > { %s1329_s26 = scalar_select %p978_p13, 1, 0 }
  0x15   : > { %p673_p2 = pneg %p978_p13  ;;  %s132_s28 = sshll.u32 %s890_s27, 4  ;;  %s133_s28 = int_to_ptr.vmem [resolvable:$true] %s132_s28 }
  0x16   : > { %p690_p4 = scmp.lt.s32.totalorder %s888_s15, 2  ;;  %p1330_p0 = scmp.eq.s32.totalorder %s939_s16, 0 }
  0x17   : > { %s891_s4 = smov [#allocation7]   ;;  %s732_s8 = scalar_lea.hbm %s1317_s1, 32 }
  0x18   : > { %p988_p7 = pnand %p673_p2, %p1330_p0  ;;  %p994_p3 = pnand %p690_p4, %p957_p5 }
  0x19   : > { %s143_s5 = sshll.u32 %s891_s4, 4  ;;  %p733_p8 = scmp.ne.s32.totalorder %s1317_s1, %s732_s8  ;;  %s998_s5 = int_to_ptr.vmem [resolvable:$true] %s143_s5 }
  0x1a   : > { %s1332_s30 = scalar_select %p994_p3, 1, 0 }
  0x1b   : > { %p734_p9 = pneg %p988_p7  ;;  %p739_p10 = scmp.lt.u32.totalorder %s732_s8, %s1317_s1 }
  0x1d   : > { %p735_p4 = pnand %p734_p9, %p733_p8 }
  0x1f   : > { %p736_p5 = pneg %p735_p4 }
  0x21   : > { %p741_p2 = pnand %p739_p10, %p736_p5 }
  0x23   : > { %744 = shalt.err (!%p741_p2)
}
  0x24   : > { %s745_s19 = scalar_lea.vmem %s133_s28, 32  ;;  %p753_p11 = scmp.lt.s32.totalorder %s133_s28, %s133_s28 }
  0x25   : > { %p746_p0 = scmp.ne.s32.totalorder %s133_s28, %s745_s19  ;;  %p754_p6 = scmp.lt.s32.totalorder %s745_s19, %s745_s19 }
  0x27   : > { %p748_p1 = pnand %p746_p0, %p734_p9  ;;  %p755_p13 = por %p754_p6, %p753_p11 }
  0x29   : > { %p749_p12 = pneg %p748_p1 }
  0x2b   : > { %p756_p3 = pnand %p755_p13, %p749_p12 }
  0x2d   : > { %759 = shalt.err (!%p756_p3)
}
  0x2e   : > { %676 = dma.hbm_to_vmem [thread:$0]  (!%p988_p7), %s1317_s1, 32, %s133_s28, [#allocation6]  }
  0x2f   : > { %s154_s27 = sand.u32 1, %s884_s14   ;;  %s760_s7 = scalar_lea.hbm %s1318_s2, 32 }
  0x30   : > { %p761_p1 = scmp.ne.s32.totalorder %s1318_s2, %s760_s7  ;;  %p767_p12 = scmp.lt.u32.totalorder %s760_s7, %s1318_s2 }
  0x32   : > { %p763_p6 = pnand %p761_p1, %p734_p9 }
  0x34   : > { %p764_p11 = pneg %p763_p6 }
  0x36   : > { %p769_p13 = pnand %p767_p12, %p764_p11 }
  0x38   : > { %772 = shalt.err (!%p769_p13)
}
  0x39   : > { %s773_s28 = scalar_lea.vmem %s998_s5, 32  ;;  %p781_p5 = scmp.lt.s32.totalorder %s998_s5, %s998_s5 }
  0x3a   : > { %p774_p3 = scmp.ne.s32.totalorder %s998_s5, %s773_s28  ;;  %p782_p10 = scmp.lt.s32.totalorder %s773_s28, %s773_s28 }
  0x3c   : > { %p776_p8 = pnand %p774_p3, %p734_p9  ;;  %p783_p2 = por %p782_p10, %p781_p5 }
  0x3e   : > { %p777_p4 = pneg %p776_p8 }
  0x40   : > { %p784_p0 = pnand %p783_p2, %p777_p4 }
  0x42   : > { %787 = shalt.err (!%p784_p0)
}
  0x43   : > { %679 = dma.hbm_to_vmem [thread:$0]  (!%p988_p7), %s1318_s2, 32, %s998_s5, [#allocation6]  }
  0x44   : > { %s659_s20 = smul.u32 144, %s154_s27  ;;  %s1056_s9 = scalar_lea.sflag [#allocation3], %s154_s27 }
  0x45   : > { %s657_s22 = smul.u32 2304, %s888_s15  ;;  %p1333_p7 = scmp.ne.s32.totalorder %s1332_s30, 0 }
  0x46   : > { %s158_s29 = scalar_lea.vmem [#allocation2], %s659_s20  ;;  %s793_s28 = scalar_lea.hbm %s1316_s0, 4608 }
  0x47   : > { %s1052_s7 = scalar_lea.hbm %s1316_s0, %s657_s22  ;;  %s166_s8 = sshll.u32 %s158_s29, 4  ;;  %s1054_s8 = int_to_ptr.vmem [resolvable:$true] %s166_s8 }
  0x48   : > { %s788_s10 = scalar_lea.hbm %s1052_s7, 2304  ;;  %p790_p1 = pneg %p1333_p7 }
  0x49   : > { %p789_p9 = scmp.ne.s32.totalorder %s1052_s7, %s788_s10  ;;  %p794_p12 = scmp.lt.u32.totalorder %s1052_s7, %s1316_s0 }
  0x4a   : > { %p795_p13 = scmp.lt.u32.totalorder %s793_s28, %s788_s10  ;;  %p797_p8 = scmp.lt.u32.totalorder %s788_s10, %s1052_s7 }
  0x4b   : > { %p791_p6 = pnand %p790_p1, %p789_p9 }
  0x4c   : > { %p796_p3 = por %p795_p13, %p794_p12 }
  0x4d   : > { %p792_p11 = pneg %p791_p6 }
  0x4e   : > { %p798_p4 = por %p797_p8, %p796_p3 }
  0x50   : > { %p799_p5 = pnand %p798_p4, %p792_p11 }
  0x52   : > { %802 = shalt.err (!%p799_p5)
}
  0x53   : > { %s803_s27 = scalar_lea.vmem %s1054_s8, 2304  ;;  %s892_s20 = smov [#allocation2]  }
  0x54   : > { %p804_p10 = scmp.ne.s32.totalorder %s1054_s8, %s803_s27  ;;  %s808_s22 = sshll.u32 %s892_s20, 4  ;;  %s809_s22 = int_to_ptr.vmem [resolvable:$false] %s808_s22 }
  0x55   : > { %s810_s4 = scalar_lea.vmem %s809_s22, 4608  ;;  %p811_p9 = scmp.lt.s32.totalorder %s1054_s8, %s809_s22 }
  0x56   : > { %p806_p2 = pnand %p804_p10, %p790_p1  ;;  %p812_p6 = scmp.lt.s32.totalorder %s810_s4, %s803_s27 }
  0x58   : > { %p807_p0 = pneg %p806_p2  ;;  %p813_p12 = por %p812_p6, %p811_p9 }
  0x5a   : > { %p814_p13 = pnand %p813_p12, %p807_p0 }
  0x5c   : > { %817 = shalt.err (!%p814_p13)
}
  0x5d   : > { %s893_s6 = smov 128   ;;  %s894_s29 = smov 8  }
  0x5e   : > { %683 = dma.hbm_to_vmem [thread:$0]  (!%p1333_p7), %s1052_s7, 2304, %s1054_s8, %s1056_s9, %s893_s6, %s893_s6, %s894_s29  }
  0x5f   : > { %p1334_p1 = scmp.ne.s32.totalorder %s1329_s26, 0 }
  0x60   : > { %s1087_s10 = sand.u32 (!%p1334_p1), 1, %s880_s13   ;;  %p1335_p11 = scmp.ne.s32.totalorder (!%p1334_p1), %s1326_s23, 0 }
  0x61   : > { %178 = sbr.rel (%p1334_p1) target bundleno = 162 (0xa2), region = 32  ;;  %s181_s11 = scalar_lea.sflag (!%p1334_p1), [#allocation3], %s1087_s10 }
  0x62   : > { %s660_s5 = smul.u32 (!%p1334_p1), 144, %s1087_s10 }
  0x64   : > { %s1093_s28 = scalar_lea.vmem (!%p1334_p1), [#allocation2], %s660_s5 }
  0x68   : > { %863 = dma.done.wait (%p1335_p11), %s181_s11, 2304  }
  0x69   : > { %865 = vsyncadd (%p1335_p11), %s181_s11, 4294964992  ;;  %p1336_p7 = scmp.eq.s32.totalorder %s939_s16, 0 }
  0x6b   : > { %867 = dma.done.wait (%p1336_p7), [#allocation6], 64   ;;  %p1337_p3 = pmov %p1336_p7 }
  0x6c   : > { %v273_v0 = vlaneseq  ;;  %vm475_vm0 = vcmask 1043456   ;;  %v217_v4 = vld [vmem:[%s1093_s28] sm:$0xff]  ;;  %vm476_vm1 = vcmask 130052   ;;  %v218_v11 = vld [vmem:[%s1093_s28 + $0x8] sm:$0xff]  ;;  %v219_v12 = vld [vmem:[%s1093_s28 + $0x10] sm:$0xff]  ;;  %s1143_s23 = scalar_lea.vmem [#allocation8], %s660_s5 }
  0x6d   : > { %869 = vsyncadd (%p1337_p3), [#allocation6], 4294967232  ;;  %v271_v5 = vld [vmem:[#allocation5] sm:$0x3]  ;;  %v319_v6 = vld [vmem:[#allocation7] sm:$0x3]  ;;  %v235_v7 = vunpack.c.l.bf16 %v217_v4  ;;  %v236_v8 = vunpack.c.h.bf16 %v217_v4  ;;  %v237_v16 = vunpack.c.l.bf16 %v218_v11  ;;  %v238_v17 = vunpack.c.h.bf16 %v218_v11 }
  0x6e   : > { %v274_v1 = vshrl.u32 %v273_v0, 7  ;;  %v220_v13 = vld [vmem:[%s1093_s28 + $0x18] sm:$0xff]  ;;  %v239_v20 = vunpack.c.l.bf16 %v219_v12  ;;  %v240_v21 = vunpack.c.h.bf16 %v219_v12  ;;  %v221_v26 = vld [vmem:[%s1093_s28 + $0x20] sm:$0xff]  ;;  %vm1126_vm2 = vmor %vm476_vm1, %vm475_vm0  ;;  %s658_s26 = smul.u32 2304, %s939_s16  ;;  %s511_s30 = sshll.u32 %s1143_s23, 4  ;;  %s1261_s30 = int_to_ptr.vmem [resolvable:$true] %s511_s30 }
  0x6f   : > { %v241_v24 = vunpack.c.l.bf16 %v220_v13  ;;  %v242_v25 = vunpack.c.h.bf16 %v220_v13  ;;  %v222_v36 = vld [vmem:[%s1093_s28 + $0x28] sm:$0xff]  ;;  %v243_v40 = vunpack.c.l.bf16 %v221_v26  ;;  %v223_v41 = vld [vmem:[%s1093_s28 + $0x30] sm:$0xff]  ;;  %v244_v45 = vunpack.c.h.bf16 %v221_v26  ;;  %v224_v46 = vld [vmem:[%s1093_s28 + $0x38] sm:$0xff]  ;;  %s497_s9 = scalar_lea.sflag [#allocation4], %s1087_s10  ;;  %s818_s17 = scalar_lea.vmem %s1261_s30, 2304 }
  0x70   : > { %v275_v2 = vsub.s32 0, %v274_v1  ;;  %v279_v3 = vsub.s32 1, %v274_v1  ;;  %v245_v49 = vunpack.c.l.bf16 %v222_v36  ;;  %v246_v50 = vunpack.c.h.bf16 %v222_v36  ;;  %v225_v55 = vld [vmem:[%s1093_s28 + $0x40] sm:$0xff]  ;;  %v226_v4 = vld [vmem:[%s1093_s28 + $0x48] sm:$0xff]  ;;  %v227_v11 = vld [vmem:[%s1093_s28 + $0x50] sm:$0xff]  ;;  %s1266_s16 = scalar_lea.hbm %s1319_s3, %s658_s26  ;;  %p819_p8 = scmp.ne.s32.totalorder %s1261_s30, %s818_s17 }
  0x71   : > { %v247_v53 = vunpack.c.l.bf16 %v223_v41  ;;  %v248_v54 = vunpack.c.h.bf16 %v223_v41  ;;  %v249_v59 = vunpack.c.l.bf16 %v224_v46  ;;  %v250_v63 = vunpack.c.h.bf16 %v224_v46  ;;  %v230_v41 = vld [vmem:[%s1093_s28 + $0x68] sm:$0xff]  ;;  %v231_v46 = vld [vmem:[%s1093_s28 + $0x70] sm:$0xff]  ;;  %p1340_p4 = scmp.ne.s32.totalorder %s1327_s24, 0  ;;  %s895_s19 = smov [#allocation8]  }
  0x72   : > { %v1104_v9 = vrot.slane %v271_v5, %v275_v2  ;;  %v1106_v10 = vrot.slane %v271_v5, %v279_v3  ;;  %v1111_v14 = vrot.slane %v319_v6, %v275_v2  ;;  %v1113_v15 = vrot.slane %v319_v6, %v279_v3  ;;  %s822_s27 = sshll.u32 %s895_s19, 4  ;;  %s823_s27 = int_to_ptr.vmem [resolvable:$false] %s822_s27 }
  0x73   : > { %v251_v3 = vunpack.c.l.bf16 %v225_v55  ;;  %v256_v26 = vunpack.c.h.bf16 %v227_v11  ;;  %p820_p5 = pnand %p819_p8, %p1340_p4  ;;  %s824_s20 = scalar_lea.vmem %s823_s27, 4608 }
  0x74   : > { %v283_v18 = vmul.f32 %v1104_v9, %v235_v7  ;;  %v284_v19 = vmul.f32 %v1106_v10, %v236_v8  ;;  %v285_v22 = vmul.f32 %v1104_v9, %v237_v16  ;;  %v286_v23 = vmul.f32 %v1106_v10, %v238_v17  ;;  %p825_p2 = scmp.lt.s32.totalorder %s1261_s30, %s823_s27  ;;  %p826_p0 = scmp.lt.s32.totalorder %s824_s20, %s818_s17 }
  0x75   : > { %v287_v29 = vmul.f32 %v1104_v9, %v239_v20  ;;  %v288_v30 = vmul.f32 %v1106_v10, %v240_v21  ;;  %v289_v34 = vmul.f32 %v1104_v9, %v241_v24  ;;  %v290_v35 = vmul.f32 %v1106_v10, %v242_v25  ;;  %p821_p10 = pneg %p820_p5 }
  0x76   : > { %v331_v27 = vadd.f32 %v1111_v14, %v283_v18  ;;  %v332_v28 = vadd.f32 %v1113_v15, %v284_v19  ;;  %v333_v32 = vadd.f32 %v1111_v14, %v285_v22  ;;  %v334_v33 = vadd.f32 %v1113_v15, %v286_v23  ;;  %v228_v18 = vld [vmem:[%s1093_s28 + $0x58] sm:$0xff]  ;;  %p827_p9 = por %p826_p0, %p825_p2 }
  0x77   : > { %v335_v38 = vadd.f32 %v1111_v14, %v287_v29  ;;  %v336_v39 = vadd.f32 %v1113_v15, %v288_v30  ;;  %v337_v43 = vadd.f32 %v1111_v14, %v289_v34  ;;  %v338_v44 = vadd.f32 %v1113_v15, %v290_v35 }
  0x78   : > { %v637_v37 = vpack.c.bf16 %v332_v28, %v331_v27  ;;  %v638_v42 = vpack.c.bf16 %v334_v33, %v333_v32  ;;  %v291_v48 = vmul.f32 %v1104_v9, %v243_v40  ;;  %v292_v52 = vmul.f32 %v1106_v10, %v244_v45  ;;  %v229_v27 = vld [vmem:[%s1093_s28 + $0x60] sm:$0xff]  ;;  %p828_p6 = pnand %p827_p9, %p821_p10 }
  0x79   : > { %v639_v47 = vpack.c.bf16 %v336_v39, %v335_v38  ;;  %v640_v51 = vpack.c.bf16 %v338_v44, %v337_v43  ;;  %v293_v57 = vmul.f32 %v1104_v9, %v245_v49  ;;  %v294_v58 = vmul.f32 %v1106_v10, %v246_v50 }
  0x7a   : > { %478 = vst.msk [vmem:[%s1143_s23] sm:$0xff] %vm1126_vm2, %v637_v37  ;;  %479 = vst.msk [vmem:[%s1143_s23 + $0x8] sm:$0xff] %vm1126_vm2, %v638_v42  ;;  %v339_v56 = vadd.f32 %v1111_v14, %v291_v48  ;;  %v340_v60 = vadd.f32 %v1113_v15, %v292_v52  ;;  %v295_v61 = vmul.f32 %v1104_v9, %v247_v53  ;;  %v252_v16 = vunpack.c.h.bf16 %v225_v55 }
  0x7b   : > { %480 = vst.msk [vmem:[%s1143_s23 + $0x10] sm:$0xff] %vm1126_vm2, %v639_v47  ;;  %481 = vst.msk [vmem:[%s1143_s23 + $0x18] sm:$0xff] %vm1126_vm2, %v640_v51  ;;  %v296_v62 = vmul.f32 %v1106_v10, %v248_v54  ;;  %v341_v0 = vadd.f32 %v1111_v14, %v293_v57  ;;  %v342_v1 = vadd.f32 %v1113_v15, %v294_v58  ;;  %v253_v21 = vunpack.c.l.bf16 %v226_v4  ;;  %v232_v51 = vld [vmem:[%s1093_s28 + $0x78] sm:$0xff] }
  0x7c   : > { %v297_v2 = vmul.f32 %v1104_v9, %v249_v59  ;;  %v641_v5 = vpack.c.bf16 %v340_v60, %v339_v56  ;;  %v343_v6 = vadd.f32 %v1111_v14, %v295_v61  ;;  %v298_v8 = vmul.f32 %v1106_v10, %v250_v63  ;;  %v233_v60 = vld [vmem:[%s1093_s28 + $0x80] sm:$0xff] }
  0x7d   : > { %v344_v7 = vadd.f32 %v1113_v15, %v296_v62  ;;  %v642_v12 = vpack.c.bf16 %v342_v1, %v341_v0  ;;  %v299_v17 = vmul.f32 %v1104_v9, %v251_v3  ;;  %v254_v22 = vunpack.c.h.bf16 %v226_v4 }
  0x7e   : > { %v345_v13 = vadd.f32 %v1111_v14, %v297_v2  ;;  %482 = vst.msk [vmem:[%s1143_s23 + $0x20] sm:$0xff] %vm1126_vm2, %v641_v5  ;;  %v346_v20 = vadd.f32 %v1113_v15, %v298_v8  ;;  %v300_v23 = vmul.f32 %v1106_v10, %v252_v16  ;;  %v255_v25 = vunpack.c.l.bf16 %v227_v11  ;;  %v234_v11 = vld [vmem:[%s1093_s28 + $0x88] sm:$0xff] }
  0x7f   : > { %v643_v19 = vpack.c.bf16 %v344_v7, %v343_v6  ;;  %483 = vst.msk [vmem:[%s1143_s23 + $0x28] sm:$0xff] %vm1126_vm2, %v642_v12  ;;  %v347_v24 = vadd.f32 %v1111_v14, %v299_v17  ;;  %v301_v29 = vmul.f32 %v1104_v9, %v253_v21  ;;  %v302_v30 = vmul.f32 %v1106_v10, %v254_v22 }
  0x80   : > { %v644_v28 = vpack.c.bf16 %v346_v20, %v345_v13  ;;  %v257_v32 = vunpack.c.l.bf16 %v228_v18  ;;  %v348_v33 = vadd.f32 %v1113_v15, %v300_v23  ;;  %v303_v34 = vmul.f32 %v1104_v9, %v255_v25 }
  0x81   : > { %484 = vst.msk [vmem:[%s1143_s23 + $0x30] sm:$0xff] %vm1126_vm2, %v643_v19  ;;  %v304_v35 = vmul.f32 %v1106_v10, %v256_v26  ;;  %v258_v36 = vunpack.c.h.bf16 %v228_v18  ;;  %v349_v37 = vadd.f32 %v1111_v14, %v301_v29  ;;  %v350_v38 = vadd.f32 %v1113_v15, %v302_v30 }
  0x82   : > { %485 = vst.msk [vmem:[%s1143_s23 + $0x38] sm:$0xff] %vm1126_vm2, %v644_v28  ;;  %v305_v39 = vmul.f32 %v1104_v9, %v257_v32  ;;  %v259_v40 = vunpack.c.l.bf16 %v229_v27  ;;  %v645_v42 = vpack.c.bf16 %v348_v33, %v347_v24  ;;  %v351_v43 = vadd.f32 %v1111_v14, %v303_v34 }
  0x83   : > { %v352_v44 = vadd.f32 %v1113_v15, %v304_v35  ;;  %v306_v45 = vmul.f32 %v1106_v10, %v258_v36  ;;  %v646_v47 = vpack.c.bf16 %v350_v38, %v349_v37  ;;  %v260_v49 = vunpack.c.h.bf16 %v229_v27 }
  0x84   : > { %v353_v48 = vadd.f32 %v1111_v14, %v305_v39  ;;  %v307_v50 = vmul.f32 %v1104_v9, %v259_v40  ;;  %486 = vst.msk [vmem:[%s1143_s23 + $0x40] sm:$0xff] %vm1126_vm2, %v645_v42  ;;  %v261_v54 = vunpack.c.l.bf16 %v230_v41  ;;  %v262_v55 = vunpack.c.h.bf16 %v230_v41 }
  0x85   : > { %v647_v52 = vpack.c.bf16 %v352_v44, %v351_v43  ;;  %v354_v53 = vadd.f32 %v1113_v15, %v306_v45  ;;  %487 = vst.msk [vmem:[%s1143_s23 + $0x48] sm:$0xff] %vm1126_vm2, %v646_v47  ;;  %v308_v56 = vmul.f32 %v1106_v10, %v260_v49  ;;  %v263_v58 = vunpack.c.l.bf16 %v231_v46 }
  0x86   : > { %v355_v57 = vadd.f32 %v1111_v14, %v307_v50  ;;  %v264_v59 = vunpack.c.h.bf16 %v231_v46  ;;  %v309_v62 = vmul.f32 %v1104_v9, %v261_v54  ;;  %v310_v63 = vmul.f32 %v1106_v10, %v262_v55 }
  0x87   : > { %488 = vst.msk [vmem:[%s1143_s23 + $0x50] sm:$0xff] %vm1126_vm2, %v647_v52  ;;  %v648_v61 = vpack.c.bf16 %v354_v53, %v353_v48  ;;  %v265_v0 = vunpack.c.l.bf16 %v232_v51  ;;  %v356_v1 = vadd.f32 %v1113_v15, %v308_v56  ;;  %v311_v2 = vmul.f32 %v1104_v9, %v263_v58 }
  0x88   : > { %v312_v3 = vmul.f32 %v1106_v10, %v264_v59  ;;  %v266_v4 = vunpack.c.h.bf16 %v232_v51  ;;  %v357_v5 = vadd.f32 %v1111_v14, %v309_v62  ;;  %v358_v6 = vadd.f32 %v1113_v15, %v310_v63 }
  0x89   : > { %489 = vst.msk [vmem:[%s1143_s23 + $0x58] sm:$0xff] %vm1126_vm2, %v648_v61  ;;  %v313_v7 = vmul.f32 %v1104_v9, %v265_v0  ;;  %v267_v8 = vunpack.c.l.bf16 %v233_v60  ;;  %v649_v12 = vpack.c.bf16 %v356_v1, %v355_v57  ;;  %v359_v13 = vadd.f32 %v1111_v14, %v311_v2 }
  0x8a   : > { %v360_v16 = vadd.f32 %v1113_v15, %v312_v3  ;;  %v314_v17 = vmul.f32 %v1106_v10, %v266_v4  ;;  %v650_v18 = vpack.c.bf16 %v358_v6, %v357_v5  ;;  %v268_v20 = vunpack.c.h.bf16 %v233_v60 }
  0x8b   : > { %v361_v19 = vadd.f32 %v1111_v14, %v313_v7  ;;  %v315_v21 = vmul.f32 %v1104_v9, %v267_v8  ;;  %490 = vst.msk [vmem:[%s1143_s23 + $0x60] sm:$0xff] %vm1126_vm2, %v649_v12  ;;  %v269_v24 = vunpack.c.l.bf16 %v234_v11  ;;  %v270_v25 = vunpack.c.h.bf16 %v234_v11 }
  0x8c   : > { %v651_v22 = vpack.c.bf16 %v360_v16, %v359_v13  ;;  %v362_v23 = vadd.f32 %v1113_v15, %v314_v17  ;;  %491 = vst.msk [vmem:[%s1143_s23 + $0x68] sm:$0xff] %vm1126_vm2, %v650_v18  ;;  %v316_v26 = vmul.f32 %v1106_v10, %v268_v20 }
  0x8d   : > { %v363_v27 = vadd.f32 %v1111_v14, %v315_v21  ;;  %v317_v29 = vmul.f32 %v1104_v9, %v269_v24  ;;  %v318_v30 = vmul.f32 %v1106_v10, %v270_v25 }
  0x8e   : > { %492 = vst.msk [vmem:[%s1143_s23 + $0x70] sm:$0xff] %vm1126_vm2, %v651_v22  ;;  %v652_v28 = vpack.c.bf16 %v362_v23, %v361_v19  ;;  %v364_v32 = vadd.f32 %v1113_v15, %v316_v26 }
  0x8f   : > { %v365_v33 = vadd.f32 %v1111_v14, %v317_v29  ;;  %v366_v34 = vadd.f32 %v1113_v15, %v318_v30 }
  0x90   : > { %493 = vst.msk [vmem:[%s1143_s23 + $0x78] sm:$0xff] %vm1126_vm2, %v652_v28  ;;  %v653_v35 = vpack.c.bf16 %v364_v32, %v363_v27 }
  0x91   : > { %v654_v9 = vpack.c.bf16 %v366_v34, %v365_v33 }
  0x92   : > { %494 = vst.msk [vmem:[%s1143_s23 + $0x80] sm:$0xff] %vm1126_vm2, %v653_v35 }
  0x93   : > { %495 = vst.msk [vmem:[%s1143_s23 + $0x88] sm:$0xff] %vm1126_vm2, %v654_v9 }
  0x94   : > { %831 = shalt.err (!%p828_p6)
}
  0x95   : > { %s832_s22 = scalar_lea.hbm %s1266_s16, 2304  ;;  %s836_s29 = scalar_lea.hbm %s1319_s3, 4608 }
  0x96   : > { %p833_p12 = scmp.ne.s32.totalorder %s1266_s16, %s832_s22  ;;  %p837_p11 = scmp.lt.u32.totalorder %s1266_s16, %s1319_s3 }
  0x97   : > { %p838_p7 = scmp.lt.u32.totalorder %s836_s29, %s832_s22  ;;  %p840_p8 = scmp.lt.u32.totalorder %s832_s22, %s1266_s16 }
  0x98   : > { %p834_p13 = pnand %p833_p12, %p1340_p4 }
  0x99   : > { %p839_p3 = por %p838_p7, %p837_p11 }
  0x9a   : > { %p835_p1 = pneg %p834_p13 }
  0x9b   : > { %p841_p5 = por %p840_p8, %p839_p3 }
  0x9d   : > { %p842_p10 = pnand %p841_p5, %p835_p1 }
  0x9f   : > { %845 = shalt.err (!%p842_p10)
}
  0xa0   : > { %s896_s28 = smov 128   ;;  %s897_s23 = smov 8  }
  0xa1   : > { %671 = dma.vmem_to_hbm [thread:$0]  (%p1340_p4), %s1261_s30, 2304, %s1266_s16, %s497_s9, %s896_s28, %s896_s28, %s897_s23  }
  0xa2 PF: > { %s526_s26 = sand.u32 1, %s876_s12   ;;  %p1341_p2 = scmp.ne.s32.totalorder %s1328_s25, 0 }
  0xa3   : > { %p1342_p0 = scmp.ge.s32.totalorder %s888_s15, 2  ;;  %s527_s7 = scalar_lea.sflag [#allocation4], %s526_s26 }
  0xa5   : > { %p685_p9 = pnand %p1342_p0, %p1341_p2 }
  0xa7   : > { %871 = dma.done.wait (!%p685_p9), %s527_s7, 2304  }
  0xa8   : > { %873 = vsyncadd (!%p685_p9), %s527_s7, 4294964992  ;;  %p17_p6 = scmp.ge.s32.totalorder %s943_s18, 4   ;;  %s1343_s12 = smov %s880_s13 }
  0xa9   : > { %s1344_s13 = smov %s884_s14  ;;  %s1345_s14 = smov %s955_s21 }
  0xaa   : > { %s1346_s15 = smov %s943_s18  ;;  %19 = sbr.rel (!%p17_p6) target bundleno = 6 (0x6), region = 85 }
  0xb1   :  { %532 = vsyncpa [#allocation3], 1 }
  0xb2   :  { %534 = vsyncpa [#allocation3 + $0x1], 1 }
  0xb3   :  { %535 = vsyncpa [#allocation6], 1 }
  0xb4   :  { %536 = vsyncpa [#allocation4], 1 }
  0xb5   :  { %538 = vsyncpa [#allocation4 + $0x1], 1 }

// kernel: conv_block_forward.4
= control target key start
LH: loop header
LB: loop body
LE: loop exit
PB: predicated region body
PF: predicated region fallthrough
CT: control target
= control target key end

     0   :  { %s5118_s0 = inlined_call_operand.hbm [shape: bf16[288,144], index: 0, kind: input, shape index: {}]   ;;  %s5119_s1 = inlined_call_operand.hbm [shape: f32[1,144], index: 1, kind: input, shape index: {}]   ;;  %s5120_s2 = inlined_call_operand.hbm [shape: f32[1,144], index: 2, kind: input, shape index: {}]   ;;  %s5121_s3 = inlined_call_operand.hbm [shape: f32[288,1], index: 3, kind: input, shape index: {}]   ;;  %s5122_s4 = inlined_call_operand.hbm [shape: bf16[432,144], index: 4, kind: input, shape index: {}]   ;;  %s5123_s5 = inlined_call_operand.hbm [shape: f32[1,144], index: 5, kind: input, shape index: {}]   ;;  %s5124_s6 = inlined_call_operand.hbm [shape: f32[1,144], index: 6, kind: input, shape index: {}]   ;;  %s5125_s7 = inlined_call_operand.hbm [shape: bf16[288,144], index: 7, kind: output, shape index: {0}]   ;;  %s5126_s8 = inlined_call_operand.hbm [shape: f32[16,144], index: 8, kind: output, shape index: {1}]  }
   0x1   :  { %5173 = sst [smem:[#allocation41_spill]] %s5118_s0 }
   0x2   :  { %5174 = sst [smem:[#allocation42_spill]] %s5119_s1 }
   0x3   :  { %5175 = sst [smem:[#allocation43_spill]] %s5120_s2 }
   0x4   :  { %5176 = sst [smem:[#allocation44_spill]] %s5122_s4 }
   0x5   :  { %5177 = sst [smem:[#allocation45_spill]] %s5123_s5 }
   0x6   :  { %14 = vsyncpa [#allocation3], 0 }
   0x7   :  { %16 = vsyncpa [#allocation3 + $0x1], 0 }
   0x8   :  { %17 = vsyncpa [#allocation6], 0 }
   0x9   :  { %18 = vsyncpa [#allocation9], 0 }
   0xa   :  { %20 = vsyncpa [#allocation9 + $0x1], 0 }
   0xb   :  { %21 = vsyncpa [#allocation12], 0 }
   0xc   :  { %22 = vsyncpa [#allocation4], 0 }
   0xd   :  { %24 = vsyncpa [#allocation4 + $0x1], 0 }
   0xe   :  { %25 = vsyncpa [#allocation16], 0 }
   0xf   :  { %27 = vsyncpa [#allocation16 + $0x1], 0  ;;  %s3493_s27 = smov 0   ;;  %s3495_s28 = smov 0  }
  0x10   :  { %s3497_s29 = smov 0   ;;  %s3499_s30 = smov 0  }
  0x11 LB: > { %s3431_s9 = smov [#allocation5]   ;;  %s3514_s11 = sadd.s32 4294967295, %s3429_s30   ;;  %s3429_s30 = sphi %s3499_s30, %s5309_s30   ;;  %s3425_s29 = sphi %s3497_s29, %s5308_s29   ;;  %s3421_s28 = sphi %s3495_s28, %s5307_s28   ;;  %s3417_s27 = sphi %s3493_s27, %s5306_s27  }
  0x12   : > { %s260_s10 = sshll.u32 %s3431_s9, 4  ;;  %p2530_p0 = scmp.ge.s32.totalorder %s3429_s30, 1  ;;  %s261_s10 = int_to_ptr.vmem [resolvable:$true] %s260_s10 }
  0x13   : > { %p5127_p1 = scmp.eq.s32.totalorder %s3514_s11, 0  ;;  %p247_p2 = scmp.lt.s32.totalorder %s3429_s30, 3 }
  0x14   : > { %s3432_s13 = smov [#allocation10]   ;;  %s3433_s16 = smov [#allocation11]  }
  0x15   : > { %p3519_p3 = pnand %p2530_p0, %p247_p2  ;;  %s281_s14 = sshll.u32 %s3432_s13, 4  ;;  %s3526_s14 = int_to_ptr.vmem [resolvable:$true] %s281_s14 }
  0x16   : > { %s295_s17 = sshll.u32 %s3433_s16, 4  ;;  %s5180_s1 = sld [smem:[#allocation42_spill]]  ;;  %s3534_s17 = int_to_ptr.vmem [resolvable:$true] %s295_s17 }
  0x17   : > { %s5178_s12 = scalar_select %p3519_p3, 1, 0 }
  0x18   : > { %p2765_p5 = pneg %p3519_p3 }
  0x1a   : > { %p3530_p6 = pnand %p2765_p5, %p5127_p1 }
  0x1c   : > { %s3115_s20 = scalar_lea.hbm %s5180_s1, 32  ;;  %p3544_p8 = pneg %p3530_p6 }
  0x1d   : > { %p3116_p7 = scmp.ne.s32.totalorder %s5180_s1, %s3115_s20  ;;  %p3122_p11 = scmp.lt.u32.totalorder %s3115_s20, %s5180_s1 }
  0x1f   : > { %p3118_p9 = pnand %p3544_p8, %p3116_p7 }
  0x21   : > { %p3119_p10 = pneg %p3118_p9 }
  0x23   : > { %p3124_p12 = pnand %p3122_p11, %p3119_p10 }
  0x25   : > { %3127 = shalt.err (!%p3124_p12)
}
  0x26   : > { %s3128_s26 = scalar_lea.vmem %s261_s10, 32  ;;  %p3136_p5 = scmp.lt.s32.totalorder %s261_s10, %s261_s10 }
  0x27   : > { %p3129_p13 = scmp.ne.s32.totalorder %s261_s10, %s3128_s26  ;;  %p3137_p4 = scmp.lt.s32.totalorder %s3128_s26, %s3128_s26 }
  0x29   : > { %p3131_p0 = pnand %p3129_p13, %p3544_p8  ;;  %p3138_p1 = por %p3137_p4, %p3136_p5 }
  0x2b   : > { %p3132_p2 = pneg %p3131_p0 }
  0x2d   : > { %p3139_p3 = pnand %p3138_p1, %p3132_p2 }
  0x2f   : > { %3142 = shalt.err (!%p3139_p3)
}
  0x30   : > { %2768 = dma.hbm_to_vmem [thread:$0]  (!%p3530_p6), %s5180_s1, 32, %s261_s10, [#allocation6]  }
  0x31   : > { %s5182_s4 = sld [smem:[#allocation44_spill]] }
  0x37   : > { %s3143_s19 = scalar_lea.hbm %s5182_s4, 6912 }
  0x38   : > { %p3144_p7 = scmp.ne.s32.totalorder %s5182_s4, %s3143_s19  ;;  %p3150_p1 = scmp.lt.u32.totalorder %s3143_s19, %s5182_s4 }
  0x3a   : > { %p3146_p9 = pnand %p3144_p7, %p3544_p8 }
  0x3c   : > { %p3147_p4 = pneg %p3146_p9 }
  0x3e   : > { %p3152_p3 = pnand %p3150_p1, %p3147_p4 }
  0x40   : > { %3155 = shalt.err (!%p3152_p3)
}
  0x41   : > { %s3156_s10 = scalar_lea.vmem %s3526_s14, 6912  ;;  %p3164_p13 = scmp.lt.s32.totalorder %s3526_s14, %s3526_s14 }
  0x42   : > { %p3157_p10 = scmp.ne.s32.totalorder %s3526_s14, %s3156_s10  ;;  %p3165_p0 = scmp.lt.s32.totalorder %s3156_s10, %s3156_s10 }
  0x44   : > { %p3159_p11 = pnand %p3157_p10, %p3544_p8  ;;  %p3166_p2 = por %p3165_p0, %p3164_p13 }
  0x46   : > { %p3160_p12 = pneg %p3159_p11 }
  0x48   : > { %p3167_p5 = pnand %p3166_p2, %p3160_p12 }
  0x4a   : > { %3170 = shalt.err (!%p3167_p5)
}
  0x4b   : > { %s5129_s25 = smov 128   ;;  %s5131_s26 = smov 8  }
  0x4c   : > { %2774 = dma.hbm_to_vmem [thread:$0]  (!%p3530_p6), %s5182_s4, 6912, %s3526_s14, [#allocation9], %s5129_s25, %s5129_s25, %s5131_s26  }
  0x4d   : > { %s5183_s5 = sld [smem:[#allocation45_spill]] }
  0x53   : > { %s3171_s19 = scalar_lea.hbm %s5183_s5, 32 }
  0x54   : > { %p3172_p7 = scmp.ne.s32.totalorder %s5183_s5, %s3171_s19  ;;  %p3178_p1 = scmp.lt.u32.totalorder %s3171_s19, %s5183_s5 }
  0x56   : > { %p3174_p9 = pnand %p3172_p7, %p3544_p8 }
  0x58   : > { %p3175_p4 = pneg %p3174_p9 }
  0x5a   : > { %p3180_p3 = pnand %p3178_p1, %p3175_p4 }
  0x5c   : > { %3183 = shalt.err (!%p3180_p3)
}
  0x5d   : > { %s3184_s14 = scalar_lea.vmem %s3534_s17, 32  ;;  %p3192_p13 = scmp.lt.s32.totalorder %s3534_s17, %s3534_s17 }
  0x5e   : > { %p3185_p10 = scmp.ne.s32.totalorder %s3534_s17, %s3184_s14  ;;  %p3193_p0 = scmp.lt.s32.totalorder %s3184_s14, %s3184_s14 }
  0x60   : > { %p3187_p11 = pnand %p3185_p10, %p3544_p8  ;;  %p3194_p2 = por %p3193_p0, %p3192_p13 }
  0x62   : > { %p3188_p12 = pneg %p3187_p11 }
  0x64   : > { %p3195_p5 = pnand %p3194_p2, %p3188_p12 }
  0x66   : > { %3198 = shalt.err (!%p3195_p5)
}
  0x67   : > { %2777 = dma.hbm_to_vmem [thread:$0]  (!%p3530_p6), %s5183_s5, 32, %s3534_s17, [#allocation12]  }
  0x68   : > { %s3436_s13 = smov [#allocation7]   ;;  %s3437_s18 = smov [#allocation13]  }
  0x69   : > { %s271_s16 = sshll.u32 %s3436_s13, 4  ;;  %s306_s19 = sshll.u32 %s3437_s18, 4  ;;  %s272_s16 = int_to_ptr.vmem [resolvable:$true] %s271_s16  ;;  %s307_s19 = int_to_ptr.vmem [resolvable:$true] %s306_s19 }
  0x6a   : > { %s5184_s2 = sld [smem:[#allocation43_spill]] }
  0x70   : > { %s3199_s22 = scalar_lea.hbm %s5184_s2, 32 }
  0x71   : > { %p3200_p7 = scmp.ne.s32.totalorder %s5184_s2, %s3199_s22  ;;  %p3206_p1 = scmp.lt.u32.totalorder %s3199_s22, %s5184_s2 }
  0x73   : > { %p3202_p9 = pnand %p3200_p7, %p3544_p8 }
  0x75   : > { %p3203_p4 = pneg %p3202_p9 }
  0x77   : > { %p3208_p3 = pnand %p3206_p1, %p3203_p4 }
  0x79   : > { %3211 = shalt.err (!%p3208_p3)
}
  0x7a   : > { %s3212_s17 = scalar_lea.vmem %s272_s16, 32  ;;  %p3220_p13 = scmp.lt.s32.totalorder %s272_s16, %s272_s16 }
  0x7b   : > { %p3213_p10 = scmp.ne.s32.totalorder %s272_s16, %s3212_s17  ;;  %p3221_p0 = scmp.lt.s32.totalorder %s3212_s17, %s3212_s17 }
  0x7d   : > { %p3215_p11 = pnand %p3213_p10, %p3544_p8  ;;  %p3222_p2 = por %p3221_p0, %p3220_p13 }
  0x7f   : > { %p3216_p12 = pneg %p3215_p11 }
  0x81   : > { %p3223_p5 = pnand %p3222_p2, %p3216_p12 }
  0x83   : > { %3226 = shalt.err (!%p3223_p5)
}
  0x84   : > { %2771 = dma.hbm_to_vmem [thread:$0]  (!%p3530_p6), %s5184_s2, 32, %s272_s16, [#allocation6]  }
  0x85   : > { %s3227_s20 = scalar_lea.hbm %s5124_s6, 32 }
  0x86   : > { %p3228_p7 = scmp.ne.s32.totalorder %s5124_s6, %s3227_s20  ;;  %p3234_p1 = scmp.lt.u32.totalorder %s3227_s20, %s5124_s6 }
  0x88   : > { %p3230_p9 = pnand %p3228_p7, %p3544_p8 }
  0x8a   : > { %p3231_p4 = pneg %p3230_p9 }
  0x8c   : > { %p3236_p3 = pnand %p3234_p1, %p3231_p4 }
  0x8e   : > { %3239 = shalt.err (!%p3236_p3)
}
  0x8f   : > { %s3240_s10 = scalar_lea.vmem %s307_s19, 32  ;;  %p3248_p13 = scmp.lt.s32.totalorder %s307_s19, %s307_s19 }
  0x90   : > { %p3241_p10 = scmp.ne.s32.totalorder %s307_s19, %s3240_s10  ;;  %p3249_p0 = scmp.lt.s32.totalorder %s3240_s10, %s3240_s10 }
  0x92   : > { %p3243_p11 = pnand %p3241_p10, %p3544_p8  ;;  %p3250_p2 = por %p3249_p0, %p3248_p13 }
  0x94   : > { %p3244_p12 = pneg %p3243_p11 }
  0x96   : > { %p3251_p5 = pnand %p3250_p2, %p3244_p12 }
  0x98   : > { %3254 = shalt.err (!%p3251_p5)
}
  0x99   : > { %2780 = dma.hbm_to_vmem [thread:$0]  (!%p3530_p6), %s5124_s6, 32, %s307_s19, [#allocation12]  }
  0x9a   : > { %s2529_s23 = sadd.s32 4294967294, %s3429_s30   ;;  %s3647_s15 = sadd.s32 1, %s3429_s30  }
  0x9b   : > { %s40_s9 = sadd.s32 1, %s3425_s29  ;;  %s37_s13 = ssub.s32 %s3429_s30, %s3647_s15 }
  0x9c   : > { %p47_p8 = scmp.ne.s32.totalorder %s3425_s29, %s3421_s28  ;;  %p38_p7 = scmp.eq.s32.totalorder %s37_s13, 0 }
  0x9d   : > { %p48_p9 = scmp.eq.s32.totalorder %s3429_s30, 0  ;;  %p53_p4 = scmp.ne.s32.totalorder %s3421_s28, %s3417_s27 }
  0x9e   : > { %p208_p1 = scmp.eq.s32.totalorder %s3514_s11, 1  ;;  %p5185_p10 = scmp.eq.s32.totalorder %s3514_s11, 0 }
  0x9f   : > { %s3659_s25 = scalar_select %p38_p7, %s3425_s29, %s40_s9  }
  0xa0   : > { %p49_p3 = por %p48_p9, %p47_p8  ;;  %p3663_p6 = por %p5185_p10, %p53_p4 }
  0xa1   : > { %p3667_p11 = por %p208_p1, %p47_p8  ;;  %p214_p12 = scmp.eq.s32.totalorder %s2529_s23, 1 }
  0xa2   : > { %p2800_p13 = scmp.lt.s32.totalorder %s3429_s30, 2  ;;  %s317_s20 = sand.u32 1, %s3425_s29  }
  0xa3   : > { %s5187_s18 = scalar_select %p3667_p11, 1, 0 }
  0xa4   : > { %p3673_p0 = por %p214_p12, %p53_p4  ;;  %s3677_s22 = smul.u32 144, %s317_s20 }
  0xa5   : > { %p3679_p2 = pnand %p2800_p13, %p49_p3  ;;  %s5133_s14 = smul.u32 2304, %s3429_s30 }
  0xa6   : > { %s5188_s21 = scalar_select %p3673_p0, 1, 0 }
  0xa7   : > { %s5190_s0 = sld [smem:[#allocation41_spill]]  ;;  %s321_s9 = scalar_lea.vmem [#allocation2], %s3677_s22 }
  0xa8   : > { %s329_s13 = sshll.u32 %s321_s9, 4  ;;  %s3695_s26 = scalar_lea.sflag [#allocation3], %s317_s20  ;;  %s3693_s13 = int_to_ptr.vmem [resolvable:$true] %s329_s13 }
  0xa9   : > { %p3257_p8 = pneg %p3679_p2 }
  0xad   : > { %s3690_s23 = scalar_lea.hbm %s5190_s0, %s5133_s14  ;;  %s3260_s10 = scalar_lea.hbm %s5190_s0, 4608 }
  0xae   : > { %s3255_s1 = scalar_lea.hbm %s3690_s23, 2304  ;;  %p3261_p4 = scmp.lt.u32.totalorder %s3690_s23, %s5190_s0 }
  0xaf   : > { %p3256_p5 = scmp.ne.s32.totalorder %s3690_s23, %s3255_s1  ;;  %p3262_p1 = scmp.lt.u32.totalorder %s3260_s10, %s3255_s1 }
  0xb0   : > { %p3264_p10 = scmp.lt.u32.totalorder %s3255_s1, %s3690_s23 }
  0xb1   : > { %p3258_p7 = pnand %p3257_p8, %p3256_p5  ;;  %p3263_p3 = por %p3262_p1, %p3261_p4 }
  0xb3   : > { %p3259_p9 = pneg %p3258_p7  ;;  %p3265_p12 = por %p3264_p10, %p3263_p3 }
  0xb5   : > { %p3266_p13 = pnand %p3265_p12, %p3259_p9 }
  0xb7   : > { %3269 = shalt.err (!%p3266_p13)
}
  0xb8   : > { %s3270_s20 = scalar_lea.vmem %s3693_s13, 2304  ;;  %s3438_s9 = smov [#allocation2]  }
  0xb9   : > { %p3271_p5 = scmp.ne.s32.totalorder %s3693_s13, %s3270_s20  ;;  %s3275_s16 = sshll.u32 %s3438_s9, 4  ;;  %s3276_s16 = int_to_ptr.vmem [resolvable:$false] %s3275_s16 }
  0xba   : > { %s3277_s2 = scalar_lea.vmem %s3276_s16, 4608  ;;  %p3278_p11 = scmp.lt.s32.totalorder %s3693_s13, %s3276_s16 }
  0xbb   : > { %p3273_p7 = pnand %p3271_p5, %p3257_p8  ;;  %p3279_p4 = scmp.lt.s32.totalorder %s3277_s2, %s3270_s20 }
  0xbd   : > { %p3274_p0 = pneg %p3273_p7  ;;  %p3280_p1 = por %p3279_p4, %p3278_p11 }
  0xbf   : > { %p3281_p3 = pnand %p3280_p1, %p3274_p0 }
  0xc1   : > { %3284 = shalt.err (!%p3281_p3)
}
  0xc2   : > { %s5191_s1 = smov 8   ;;  %s5192_s14 = smov 128  }
  0xc3   : > { %2784 = dma.hbm_to_vmem [thread:$0]  (!%p3679_p2), %s3690_s23, 2304, %s3693_s13, %s3695_s26, %s5192_s14, %s5192_s14, %s5191_s1  }
  0xc4   : > { %s5193_s10 = smul.u32 2304, %s3429_s30  ;;  %s343_s16 = scalar_lea.vmem [#allocation8], %s3677_s22 }
  0xc5   : > { %s350_s2 = sshll.u32 %s343_s16, 4  ;;  %s5194_s0 = sand.u32 1, %s3429_s30   ;;  %s3734_s2 = int_to_ptr.vmem [resolvable:$true] %s350_s2 }
  0xc6   : > { %s3731_s20 = scalar_lea.hbm %s5121_s3, %s5193_s10  ;;  %s3738_s4 = scalar_lea.sflag [#allocation9], %s5194_s0 }
  0xc7   : > { %s3285_s5 = scalar_lea.hbm %s3731_s20, 2304  ;;  %s3290_s13 = scalar_lea.hbm %s5121_s3, 4608 }
  0xc8   : > { %p3286_p11 = scmp.ne.s32.totalorder %s3731_s20, %s3285_s5  ;;  %p3291_p10 = scmp.lt.u32.totalorder %s3731_s20, %s5121_s3 }
  0xc9   : > { %p3292_p12 = scmp.lt.u32.totalorder %s3290_s13, %s3285_s5  ;;  %p3294_p5 = scmp.lt.u32.totalorder %s3285_s5, %s3731_s20 }
  0xca   : > { %p3288_p0 = pnand %p3286_p11, %p3257_p8 }
  0xcb   : > { %p3293_p13 = por %p3292_p12, %p3291_p10 }
  0xcc   : > { %p3289_p9 = pneg %p3288_p0 }
  0xcd   : > { %p3295_p7 = por %p3294_p5, %p3293_p13 }
  0xcf   : > { %p3296_p4 = pnand %p3295_p7, %p3289_p9 }
  0xd1   : > { %3299 = shalt.err (!%p3296_p4)
}
  0xd2   : > { %s3300_s0 = scalar_lea.vmem %s3734_s2, 2304  ;;  %s3439_s22 = smov [#allocation8]  }
  0xd3   : > { %p3301_p1 = scmp.ne.s32.totalorder %s3734_s2, %s3300_s0  ;;  %s3305_s9 = sshll.u32 %s3439_s22, 4  ;;  %s3306_s9 = int_to_ptr.vmem [resolvable:$false] %s3305_s9 }
  0xd4   : > { %s3307_s16 = scalar_lea.vmem %s3306_s9, 4608  ;;  %p3308_p0 = scmp.lt.s32.totalorder %s3734_s2, %s3306_s9 }
  0xd5   : > { %p3303_p3 = pnand %p3301_p1, %p3257_p8  ;;  %p3309_p10 = scmp.lt.s32.totalorder %s3307_s16, %s3300_s0 }
  0xd7   : > { %p3304_p11 = pneg %p3303_p3  ;;  %p3310_p12 = por %p3309_p10, %p3308_p0 }
  0xd9   : > { %p3311_p13 = pnand %p3310_p12, %p3304_p11 }
  0xdb   : > { %3314 = shalt.err (!%p3311_p13)
}
  0xdc   : > { %2787 = dma.hbm_to_vmem [thread:$0]  (!%p3679_p2), %s3731_s20, 2304, %s3734_s2, %s3738_s4, %s5192_s14, %s5192_s14, %s5191_s1  }
  0xdd   : > { %p5195_p8 = scmp.ne.s32.totalorder %s5178_s12, 0 }
  0xdf   : > { %362 = sbr.rel (%p5195_p8) target bundleno = 857 (0x359), region = 48 }
  0xe6   : > { %s3770_s5 = sand.u32 1, %s3421_s28  }
  0xe7   : > { %s3773_s26 = smul.u32 144, %s3770_s5  ;;  %s365_s24 = scalar_lea.sflag [#allocation3], %s3770_s5 }
  0xe9   : > { %s3777_s23 = scalar_lea.vmem [#allocation2], %s3773_s26 }
  0xea   : > { %3388 = dma.done.wait (%p3663_p6), %s365_s24, 2304  }
  0xeb   : > { %3390 = vsyncadd (%p3663_p6), %s365_s24, 4294964992  ;;  %p5196_p2 = scmp.eq.s32.totalorder %s3514_s11, 0 }
  0xed   : > { %3392 = dma.done.wait (%p5196_p2), [#allocation6], 64   ;;  %p5197_p9 = pmov %p5196_p2 }
  0xee   : > { %s381_s4 = sand.u32 1, %s3514_s11   ;;  %s3789_s1 = scalar_lea.vmem [#allocation8], %s3773_s26 }
  0xef   : > { %3394 = vsyncadd (%p5197_p9), [#allocation6], 4294967232  ;;  %s382_s12 = scalar_lea.sflag [#allocation9], %s381_s4 }
  0xf0   : > { %3396 = dma.done.wait (%p3663_p6), %s382_s12, 2304  }
  0xf1   : > { %3398 = vsyncadd (%p3663_p6), %s382_s12, 4294964992  ;;  %p5198_p5 = pmov %p5196_p2 }
  0xf2   : > { %p5199_p7 = pmov %p5196_p2 }
  0xf3   : > { %3400 = dma.done.wait (%p5198_p5), [#allocation9], 6912  }
  0xf4   : > { %3402 = vsyncadd (%p5199_p7), [#allocation9], 4294960384  ;;  %p5200_p4 = pmov %p5196_p2 }
  0xf5   : > { %p5201_p1 = pmov %p5196_p2 }
  0xf6   : > { %3404 = dma.done.wait (%p5200_p4), [#allocation12], 64  }
  0xf7   : > { %3406 = vsyncadd (%p5201_p1), [#allocation12], 4294967232  ;;  %v3440_v0 = vmov 0   ;;  %v446_v1 = vld [vmem:[%s3789_s1 + $0x10] sm:$0xff]  ;;  %v444_v2 = vld [vmem:[%s3789_s1] sm:$0xff]  ;;  %v5135_v13 = vlaneseq  ;;  %s3441_s19 = smov 16  }
  0xf8   : > { %2853 = vset.pattern.permute.xlu1 %v3440_v0  ;;  %2852 = vset.pattern.permute.xlu0 %v3440_v0  ;;  %v447_v3 = vld [vmem:[%s3789_s1 + $0x18] sm:$0xff]  ;;  %v445_v4 = vld [vmem:[%s3789_s1 + $0x8] sm:$0xff]  ;;  %v448_v6 = vld [vmem:[%s3789_s1 + $0x20] sm:$0xff]  ;;  %s3442_s14 = smov 32   ;;  %vm994_vm2 = vcmask 130048   ;;  %vm1157_vm3 = vcmask 261120  }
  0xf9   : > { %624 = vperm.xlu1 %2853, %v446_v1   ;;  %614 = vperm.xlu0 %2852, %v444_v2   ;;  %v449_v5 = vld [vmem:[%s3789_s1 + $0x28] sm:$0xff]  ;;  %v451_v7 = vld [vmem:[%s3789_s1 + $0x38] sm:$0xff]  ;;  %v450_v8 = vld [vmem:[%s3789_s1 + $0x30] sm:$0xff]  ;;  %v3820_v18 = vshrl.u32 %v5135_v13, 7  ;;  %vm1620_vm4 = vcmask 392192   ;;  %vm2038_vm5 = vcmask 1043456  }
  0xfa   : > { %v453_v9 = vld [vmem:[%s3789_s1 + $0x48] sm:$0xff]  ;;  %v452_v10 = vld [vmem:[%s3789_s1 + $0x40] sm:$0xff]  ;;  %v455_v11 = vld [vmem:[%s3789_s1 + $0x58] sm:$0xff]  ;;  %vm2039_vm6 = vcmask 130052   ;;  %s4877_s20 = scalar_lea.vmem [#allocation14], %s3773_s26  ;;  %s2661_s2 = smul.u32 2304, %s3514_s11 }
  0xfb   : > { %v454_v12 = vld [vmem:[%s3789_s1 + $0x50] sm:$0xff]  ;;  %v457_v14 = vld [vmem:[%s3789_s1 + $0x68] sm:$0xff]  ;;  %v456_v15 = vld [vmem:[%s3789_s1 + $0x60] sm:$0xff]  ;;  %v3823_v19 = vsub.s32 0, %v3820_v18  ;;  %v3826_v20 = vsub.s32 1, %v3820_v18  ;;  %vm849_vm0 = vcmp.lt.s32.totalorder %v3820_v18, 7 }
  0xfc   : > { %v459_v16 = vld [vmem:[%s3789_s1 + $0x78] sm:$0xff]  ;;  %v458_v17 = vld [vmem:[%s3789_s1 + $0x70] sm:$0xff]  ;;  %v461_v21 = vld [vmem:[%s3789_s1 + $0x88] sm:$0xff]  ;;  %vm776_vm1 = vcmp.lt.s32.totalorder %v3820_v18, 1  ;;  %s2340_s13 = sshll.u32 %s4877_s20, 4  ;;  %s5025_s0 = scalar_lea.hbm %s5125_s7, %s2661_s2  ;;  %s5028_s13 = int_to_ptr.vmem [resolvable:$true] %s2340_s13 }
  0xfd   : > { %629 = vperm.xlu1 %2853, %v447_v3   ;;  %619 = vperm.xlu0 %2852, %v445_v4   ;;  %v460_v22 = vld [vmem:[%s3789_s1 + $0x80] sm:$0xff]  ;;  %v516_v23 = vld [vmem:[#allocation5] sm:$0x3]  ;;  %v564_v25 = vld [vmem:[#allocation7] sm:$0x3]  ;;  %s2321_s22 = scalar_lea.sflag [#allocation4], %s3770_s5 }
  0xfe   : > { %v479_v24 = vld [vmem:[%s3777_s23 + $0x88] sm:$0xff]  ;;  %v3832_v26 = vrot.slane %v516_v23, %v3823_v19  ;;  %v3835_v27 = vrot.slane %v516_v23, %v3826_v20  ;;  %v3838_v30 = vrot.slane %v564_v25, %v3823_v19  ;;  %v3841_v31 = vrot.slane %v564_v25, %v3826_v20  ;;  %vm4868_vm7 = vmor %vm2039_vm6, %vm2038_vm5  ;;  %s3315_s9 = scalar_lea.vmem %s5028_s13, 2304  ;;  %p5302_p3 = scmp.ne.s32.totalorder %s5187_s18, 0 }
  0xff   : > { %v514_v28 = vunpack.c.l.bf16 %v479_v24  ;;  %v515_v29 = vunpack.c.h.bf16 %v479_v24  ;;  %v3034_v36 = vld [vmem:[#allocation10 + $0x4] ss:$8 sps:$4 sm:$0xff]   ;;  %v3036_v37 = vld [vmem:[#allocation10] ss:$8 sps:$4 sm:$0xff]   ;;  %v3037_v38 = vld [vmem:[#allocation10 + $0x14] ss:$8 sps:$4 sm:$0xff]   ;;  %p3316_p6 = scmp.ne.s32.totalorder %s5028_s13, %s3315_s9 }
 0x100   : > { %1648 = vmatprep.subr.bf16.mxu1 %v3034_v36  ;;  %v3039_v39 = vld [vmem:[#allocation10 + $0x10] ss:$8 sps:$4 sm:$0xff]   ;;  %v3040_v40 = vld [vmem:[#allocation10 + $0x24] ss:$8 sps:$4 sm:$0xff]   ;;  %v3042_v41 = vld [vmem:[#allocation10 + $0x20] ss:$8 sps:$4 sm:$0xff]  }
 0x101   : > { %639 = vperm.xlu1 %2853, %v449_v5   ;;  %634 = vperm.xlu0 %2852, %v448_v6   ;;  %v562_v32 = vmul.f32 %v3832_v26, %v514_v28  ;;  %v563_v33 = vmul.f32 %v3835_v27, %v515_v29  ;;  %v3043_v42 = vld [vmem:[#allocation10 + $0x34] ss:$8 sps:$4 sm:$0xff]   ;;  %v3045_v43 = vld [vmem:[#allocation10 + $0x30] ss:$8 sps:$4 sm:$0xff]   ;;  %v3046_v44 = vld [vmem:[#allocation10 + $0x44] ss:$8 sps:$4 sm:$0xff]   ;;  %p3317_p11 = pnand %p3316_p6, %p5302_p3 }
 0x102   : > { %1649 = vmatpush1.bf16.msra.mxu1 %v3036_v37  ;;  %v3054_v45 = vld [vmem:[#allocation10 + $0x104] ss:$8 sps:$4 sm:$0xff]   ;;  %v3048_v46 = vld [vmem:[#allocation10 + $0x40] ss:$8 sps:$4 sm:$0xff]   ;;  %v3060_v48 = vld [vmem:[#allocation10 + $0x114] ss:$8 sps:$4 sm:$0xff]  }
 0x103   : > { %v3846_v34 = vadd.f32 %v3838_v30, %v562_v32  ;;  %v3849_v35 = vadd.f32 %v3841_v31, %v563_v33  ;;  %1650 = vmatprep.subr.bf16.mxu1 %v3037_v38  ;;  %v3057_v47 = vld [vmem:[#allocation10 + $0x100] ss:$8 sps:$4 sm:$0xff]   ;;  %v3049_v49 = vld [vmem:[#allocation10 + $0x54] ss:$8 sps:$4 sm:$0xff]   ;;  %1771 = vmatprep.subr.bf16.mxu0 %v3054_v45  ;;  %v3063_v50 = vld [vmem:[#allocation10 + $0x110] ss:$8 sps:$4 sm:$0xff]   ;;  %p3318_p0 = pneg %p3317_p11 }
 0x104   : > { %1772 = vmatpush1.bf16.msra.mxu0 %v3057_v47  ;;  %v3066_v51 = vld [vmem:[#allocation10 + $0x124] ss:$8 sps:$4 sm:$0xff]   ;;  %v3051_v52 = vld [vmem:[#allocation10 + $0x50] ss:$8 sps:$4 sm:$0xff]   ;;  %v3069_v54 = vld [vmem:[#allocation10 + $0x120] ss:$8 sps:$4 sm:$0xff]  }
 0x105   : > { %649 = vperm.xlu1 %2853, %v451_v7   ;;  %644 = vperm.xlu0 %2852, %v450_v8   ;;  %v3052_v53 = vld [vmem:[#allocation10 + $0x64] ss:$8 sps:$4 sm:$0xff]   ;;  %v3072_v55 = vld [vmem:[#allocation10 + $0x134] ss:$8 sps:$4 sm:$0xff]   ;;  %v3056_v56 = vld [vmem:[#allocation10 + $0x60] ss:$8 sps:$4 sm:$0xff]  }
 0x106   : > { %1651 = vmatpush1.bf16.msra.mxu1 %v3039_v39  ;;  %1773 = vmatprep.subr.bf16.mxu0 %v3060_v48  ;;  %v3058_v57 = vld [vmem:[#allocation10 + $0x74] ss:$8 sps:$4 sm:$0xff]   ;;  %v3075_v58 = vld [vmem:[#allocation10 + $0x130] ss:$8 sps:$4 sm:$0xff]   ;;  %v3078_v59 = vld [vmem:[#allocation10 + $0x144] ss:$8 sps:$4 sm:$0xff]  }
 0x107   : > { %1652 = vmatprep.subr.bf16.mxu1 %v3040_v40  ;;  %v3062_v60 = vld [vmem:[#allocation10 + $0x70] ss:$8 sps:$4 sm:$0xff]   ;;  %v3064_v61 = vld [vmem:[#allocation10 + $0x84] ss:$8 sps:$4 sm:$0xff]   ;;  %v3081_v62 = vld [vmem:[#allocation10 + $0x140] ss:$8 sps:$4 sm:$0xff]  }
 0x108   : > { %1774 = vmatpush1.bf16.msra.mxu0 %v3063_v50  ;;  %v3084_v63 = vld [vmem:[#allocation10 + $0x154] ss:$8 sps:$4 sm:$0xff]   ;;  %v3068_v0 = vld [vmem:[#allocation10 + $0x80] ss:$8 sps:$4 sm:$0xff]   ;;  %v3087_v2 = vld [vmem:[#allocation10 + $0x150] ss:$8 sps:$4 sm:$0xff]  }
 0x109   : > { %659 = vperm.xlu1 %2853, %v453_v9   ;;  %654 = vperm.xlu0 %2852, %v452_v10   ;;  %v3070_v1 = vld [vmem:[#allocation10 + $0x94] ss:$8 sps:$4 sm:$0xff]   ;;  %v3090_v3 = vld [vmem:[#allocation10 + $0x164] ss:$8 sps:$4 sm:$0xff]   ;;  %v3074_v4 = vld [vmem:[#allocation10 + $0x90] ss:$8 sps:$4 sm:$0xff]  }
 0x10a   : > { %1653 = vmatpush1.bf16.msra.mxu1 %v3042_v41  ;;  %1775 = vmatprep.subr.bf16.mxu0 %v3066_v51  ;;  %v3076_v5 = vld [vmem:[#allocation10 + $0xa4] ss:$8 sps:$4 sm:$0xff]   ;;  %v3093_v7 = vld [vmem:[#allocation10 + $0x160] ss:$8 sps:$4 sm:$0xff]   ;;  %v3096_v9 = vld [vmem:[#allocation10 + $0x174] ss:$8 sps:$4 sm:$0xff]  }
 0x10b   : > { %1654 = vmatprep.subr.bf16.mxu1 %v3043_v42  ;;  %v464_v6 = vld [vmem:[%s3777_s23 + $0x10] sm:$0xff]  ;;  %v462_v8 = vld [vmem:[%s3777_s23] sm:$0xff]  ;;  %v465_v10 = vld [vmem:[%s3777_s23 + $0x18] sm:$0xff]  ;;  %s3443_s16 = smov [#allocation14]  }
 0x10c   : > { %1776 = vmatpush1.bf16.msra.mxu0 %v3069_v54  ;;  %v486_v23 = vunpack.c.l.bf16 %v465_v10  ;;  %v487_v24 = vunpack.c.h.bf16 %v465_v10  ;;  %v467_v25 = vld [vmem:[%s3777_s23 + $0x28] sm:$0xff]  ;;  %v466_v38 = vld [vmem:[%s3777_s23 + $0x20] sm:$0xff]  ;;  %v469_v47 = vld [vmem:[%s3777_s23 + $0x38] sm:$0xff]  ;;  %s3319_s26 = sshll.u32 %s3443_s16, 4  ;;  %s3320_s26 = int_to_ptr.vmem [resolvable:$false] %s3319_s26 }
 0x10d   : > { %669 = vperm.xlu1 %2853, %v455_v11   ;;  %664 = vperm.xlu0 %2852, %v454_v12   ;;  %v3080_v11 = vld [vmem:[#allocation10 + $0xa0] ss:$8 sps:$4 sm:$0xff]   ;;  %v484_v12 = vunpack.c.l.bf16 %v464_v6  ;;  %v3102_v28 = vld [vmem:[#allocation10 + $0x184] ss:$8 sps:$4 sm:$0xff]   ;;  %v3086_v33 = vld [vmem:[#allocation10 + $0xb0] ss:$8 sps:$4 sm:$0xff]   ;;  %v490_v41 = vunpack.c.l.bf16 %v467_v25  ;;  %v491_v42 = vunpack.c.h.bf16 %v467_v25  ;;  %v488_v50 = vunpack.c.l.bf16 %v466_v38  ;;  %p3322_p10 = scmp.lt.s32.totalorder %s5028_s13, %s3320_s26 }
 0x10e   : > { %1655 = vmatpush1.bf16.msra.mxu1 %v3045_v43  ;;  %1777 = vmatprep.subr.bf16.mxu0 %v3072_v55  ;;  %v3088_v39 = vld [vmem:[#allocation10 + $0xc4] ss:$8 sps:$4 sm:$0xff]   ;;  %v3105_v43 = vld [vmem:[#allocation10 + $0x180] ss:$8 sps:$4 sm:$0xff]   ;;  %v534_v45 = vmul.f32 %v3832_v26, %v486_v23  ;;  %v489_v54 = vunpack.c.h.bf16 %v466_v38  ;;  %s3321_s24 = scalar_lea.vmem %s3320_s26, 4608 }
 0x10f   : > { %1656 = vmatprep.subr.bf16.mxu1 %v3046_v44  ;;  %v532_v36 = vmul.f32 %v3832_v26, %v484_v12  ;;  %v3092_v51 = vld [vmem:[#allocation10 + $0xc0] ss:$8 sps:$4 sm:$0xff]   ;;  %p3323_p12 = scmp.lt.s32.totalorder %s3321_s24, %s3315_s9 }
 0x110   : > { %1778 = vmatpush1.bf16.msra.mxu0 %v3075_v58  ;;  %v468_v55 = vld [vmem:[%s3777_s23 + $0x30] sm:$0xff]  ;;  %v538_v58 = vmul.f32 %v3832_v26, %v490_v41 }
 0x111   : > { %679 = vperm.xlu1 %2853, %v457_v14   ;;  %674 = vperm.xlu0 %2852, %v456_v15   ;;  %v485_v14 = vunpack.c.h.bf16 %v464_v6  ;;  %v463_v15 = vld [vmem:[%s3777_s23 + $0x8] sm:$0xff]  ;;  %v492_v6 = vunpack.c.l.bf16 %v468_v55  ;;  %v493_v10 = vunpack.c.h.bf16 %v468_v55  ;;  %p3324_p13 = por %p3323_p12, %p3322_p10 }
 0x112   : > { %1657 = vmatpush1.bf16.msra.mxu1 %v3048_v46  ;;  %1779 = vmatprep.subr.bf16.mxu0 %v3078_v59  ;;  %v482_v29 = vunpack.c.l.bf16 %v463_v15  ;;  %v483_v32 = vunpack.c.h.bf16 %v463_v15  ;;  %v535_v46 = vmul.f32 %v3835_v27, %v487_v24  ;;  %v539_v59 = vmul.f32 %v3835_v27, %v491_v42  ;;  %v3100_v15 = vld [vmem:[#allocation10 + $0xe4] ss:$8 sps:$4 sm:$0xff]   ;;  %v3104_v38 = vld [vmem:[#allocation10 + $0xe0] ss:$8 sps:$4 sm:$0xff]  }
 0x113   : > { %1658 = vmatprep.subr.bf16.mxu1 %v3049_v49  ;;  %v533_v37 = vmul.f32 %v3835_v27, %v485_v14  ;;  %v472_v14 = vld [vmem:[%s3777_s23 + $0x50] sm:$0xff]  ;;  %p3325_p8 = pnand %p3324_p13, %p3318_p0 }
 0x114   : > { %1780 = vmatpush1.bf16.msra.mxu0 %v3081_v62  ;;  %v530_v48 = vmul.f32 %v3832_v26, %v482_v29  ;;  %v531_v49 = vmul.f32 %v3835_v27, %v483_v32  ;;  %v475_v29 = vld [vmem:[%s3777_s23 + $0x68] sm:$0xff] }
 0x115   : > { %689 = vperm.xlu1 %2853, %v459_v16   ;;  %684 = vperm.xlu0 %2852, %v458_v17   ;;  %v3082_v16 = vld [vmem:[#allocation10 + $0xb4] ss:$8 sps:$4 sm:$0xff]   ;;  %v480_v17 = vunpack.c.l.bf16 %v462_v8 }
 0x116   : > { %1659 = vmatpush1.bf16.msra.mxu1 %v3051_v52  ;;  %1781 = vmatprep.subr.bf16.mxu0 %v3084_v63  ;;  %v3867_v52 = vadd.f32 %v3838_v30, %v532_v36  ;;  %v3883_v63 = vadd.f32 %v3838_v30, %v534_v45  ;;  %v500_v36 = vunpack.c.l.bf16 %v472_v14 }
 0x117   : > { %1660 = vmatprep.subr.bf16.mxu1 %v3052_v53  ;;  %v528_v40 = vmul.f32 %v3832_v26, %v480_v17  ;;  %v3870_v53 = vadd.f32 %v3841_v31, %v533_v37  ;;  %v3903_v17 = vadd.f32 %v3841_v31, %v539_v59  ;;  %v501_v37 = vunpack.c.h.bf16 %v472_v14 }
 0x118   : > { %1782 = vmatpush1.bf16.msra.mxu0 %v3087_v2  ;;  %v470_v2 = vld [vmem:[%s3777_s23 + $0x40] sm:$0xff] }
 0x119   : > { %699 = vperm.xlu1 %2853, %v461_v21   ;;  %694 = vperm.xlu0 %2852, %v460_v22   ;;  %v3099_v21 = vld [vmem:[#allocation10 + $0x170] ss:$8 sps:$4 sm:$0xff]   ;;  %v481_v22 = vunpack.c.h.bf16 %v462_v8  ;;  %v497_v24 = vunpack.c.h.bf16 %v470_v2 }
 0x11a   : > { %1661 = vmatpush1.bf16.msra.mxu1 %v3056_v56  ;;  %1783 = vmatprep.subr.bf16.mxu0 %v3090_v3  ;;  %v3094_v56 = vld [vmem:[#allocation10 + $0xd4] ss:$8 sps:$4 sm:$0xff]   ;;  %v3890_v3 = vadd.f32 %v3838_v30, %v530_v48  ;;  %v3098_v8 = vld [vmem:[#allocation10 + $0xd0] ss:$8 sps:$4 sm:$0xff]  }
 0x11b   : > { %1662 = vmatprep.subr.bf16.mxu1 %v3058_v57  ;;  %v529_v44 = vmul.f32 %v3835_v27, %v481_v22  ;;  %v3874_v57 = vadd.f32 %v3838_v30, %v528_v40  ;;  %v496_v22 = vunpack.c.l.bf16 %v470_v2  ;;  %v541_v40 = vmul.f32 %v3835_v27, %v493_v10  ;;  %v3106_v10 = vld [vmem:[#allocation10 + $0xf4] ss:$8 sps:$4 sm:$0xff]  }
 0x11c   : > { %1784 = vmatpush1.bf16.msra.mxu0 %v3093_v7  ;;  %v473_v7 = vld [vmem:[%s3777_s23 + $0x58] sm:$0xff] }
 0x11d   : > { %1785 = vmatprep.subr.bf16.mxu0 %v3096_v9  ;;  %v3880_v62 = vadd.f32 %v3841_v31, %v529_v44  ;;  %v537_v9 = vmul.f32 %v3835_v27, %v489_v54  ;;  %v502_v25 = vunpack.c.l.bf16 %v473_v7  ;;  %v544_v45 = vmul.f32 %v3832_v26, %v496_v22  ;;  %v477_v54 = vld [vmem:[%s3777_s23 + $0x78] sm:$0xff] }
 0x11e   : > { %1663 = vmatpush1.bf16.msra.mxu1 %v3062_v60  ;;  %v494_v60 = vunpack.c.l.bf16 %v469_v47 }
 0x11f   : > { %1664 = vmatprep.subr.bf16.mxu1 %v3064_v61  ;;  %v471_v61 = vld [vmem:[%s3777_s23 + $0x48] sm:$0xff] }
 0x120   : > { %1786 = vmatpush1.bf16.msra.mxu0 %v3099_v21  ;;  %v499_v12 = vunpack.c.h.bf16 %v471_v61  ;;  %v542_v21 = vmul.f32 %v3832_v26, %v494_v60  ;;  %v3936_v60 = vadd.f32 %v3841_v31, %v541_v40 }
 0x121   : > { %1787 = vmatprep.subr.bf16.mxu0 %v3102_v28  ;;  %v503_v28 = vunpack.c.h.bf16 %v473_v7 }
 0x122   : > { %1665 = vmatpush1.bf16.msra.mxu1 %v3068_v0  ;;  %v3886_v0 = vadd.f32 %v3841_v31, %v535_v46  ;;  %v547_v42 = vmul.f32 %v3835_v27, %v499_v12  ;;  %v3920_v44 = vadd.f32 %v3838_v30, %v542_v21  ;;  %v506_v46 = vunpack.c.l.bf16 %v475_v29  ;;  %v3110_v12 = vld [vmem:[#allocation10 + $0xf0] ss:$8 sps:$4 sm:$0xff]  }
 0x123   : > { %1666 = vmatprep.subr.bf16.mxu1 %v3070_v1  ;;  %v495_v1 = vunpack.c.h.bf16 %v469_v47  ;;  %v507_v47 = vunpack.c.h.bf16 %v475_v29 }
 0x124   : > { %1788 = vmatpush1.bf16.msra.mxu0 %v3105_v43  ;;  %v474_v43 = vld [vmem:[%s3777_s23 + $0x60] sm:$0xff]  ;;  %v554_v7 = vmul.f32 %v3832_v26, %v506_v46 }
 0x125   : > { %v543_v23 = vmul.f32 %v3835_v27, %v495_v1  ;;  %v504_v59 = vunpack.c.l.bf16 %v474_v43  ;;  %v3942_v1 = vadd.f32 %v3841_v31, %v547_v42  ;;  %v505_v2 = vunpack.c.h.bf16 %v474_v43 }
 0x126   : > { %1667 = vmatpush1.bf16.msra.mxu1 %v3074_v4  ;;  %v3893_v4 = vadd.f32 %v3841_v31, %v531_v49  ;;  %v545_v49 = vmul.f32 %v3835_v27, %v497_v24  ;;  %v511_v24 = vunpack.c.h.bf16 %v477_v54  ;;  %v3982_v43 = vadd.f32 %v3838_v30, %v554_v7 }
 0x127   : > { %1668 = vmatprep.subr.bf16.mxu1 %v3076_v5  ;;  %v536_v5 = vmul.f32 %v3832_v26, %v488_v50  ;;  %v3924_v48 = vadd.f32 %v3841_v31, %v543_v23  ;;  %v550_v50 = vmul.f32 %v3832_v26, %v502_v25  ;;  %v478_v25 = vld [vmem:[%s3777_s23 + $0x80] sm:$0xff] }
 0x128   : > { %v3956_v21 = vadd.f32 %v3841_v31, %v545_v49 }
 0x129   : > { %v3909_v32 = vadd.f32 %v3838_v30, %v536_v5  ;;  %v476_v5 = vld [vmem:[%s3777_s23 + $0x70] sm:$0xff]  ;;  %v3959_v22 = vadd.f32 %v3838_v30, %v550_v50 }
 0x12a   : > { %1669 = vmatpush1.bf16.msra.mxu1 %v3080_v11  ;;  %v498_v11 = vunpack.c.l.bf16 %v471_v61  ;;  %v509_v42 = vunpack.c.h.bf16 %v476_v5 }
 0x12b   : > { %1670 = vmatprep.subr.bf16.mxu1 %v3082_v16  ;;  %v3900_v16 = vadd.f32 %v3838_v30, %v538_v58  ;;  %v549_v58 = vmul.f32 %v3835_v27, %v501_v37  ;;  %v508_v37 = vunpack.c.l.bf16 %v476_v5 }
 0x12c   : > { %v546_v41 = vmul.f32 %v3832_v26, %v498_v11  ;;  %v3108_v11 = vld [vmem:[#allocation10 + $0x194] ss:$8 sps:$4 sm:$0xff]  }
 0x12d   : > { %1789 = vmatprep.subr.bf16.mxu0 %v3108_v11 }
 0x12e   : > { %1671 = vmatpush1.bf16.msra.mxu1 %v3086_v33  ;;  %v540_v33 = vmul.f32 %v3832_v26, %v492_v6  ;;  %v3939_v61 = vadd.f32 %v3838_v30, %v546_v41  ;;  %v3947_v6 = vadd.f32 %v3838_v30, %v544_v45  ;;  %v553_v41 = vmul.f32 %v3835_v27, %v505_v2 }
 0x12f   : > { %1672 = vmatprep.subr.bf16.mxu1 %v3088_v39  ;;  %v3913_v39 = vadd.f32 %v3841_v31, %v537_v9  ;;  %v510_v9 = vunpack.c.l.bf16 %v477_v54  ;;  %v559_v54 = vmul.f32 %v3835_v27, %v511_v24 }
 0x130   : > { %v3931_v55 = vadd.f32 %v3838_v30, %v540_v33  ;;  %v3969_v33 = vadd.f32 %v3841_v31, %v549_v58  ;;  %v3114_v58 = vld [vmem:[#allocation10 + $0x1a0] ss:$8 sps:$4 sm:$0xff]  }
 0x131   : > { %v558_v46 = vmul.f32 %v3832_v26, %v510_v9 }
 0x132   : > { %1673 = vmatpush1.bf16.msra.mxu1 %v3092_v51  ;;  %v551_v51 = vmul.f32 %v3835_v27, %v503_v28  ;;  %v3111_v28 = vld [vmem:[#allocation10 + $0x190] ss:$8 sps:$4 sm:$0xff]  }
 0x133   : > { %1674 = vmatprep.subr.bf16.mxu1 %v3094_v56  ;;  %v548_v56 = vmul.f32 %v3832_v26, %v500_v36  ;;  %v552_v36 = vmul.f32 %v3832_v26, %v504_v59  ;;  %1790 = vmatpush1.bf16.msra.mxu0 %v3111_v28 }
 0x134   : > { %v3962_v23 = vadd.f32 %v3841_v31, %v551_v51 }
 0x135   : > { %v3966_v29 = vadd.f32 %v3838_v30, %v548_v56  ;;  %v513_v56 = vunpack.c.h.bf16 %v478_v25  ;;  %v4010_v2 = vadd.f32 %v3838_v30, %v552_v36 }
 0x136   : > { %1675 = vmatpush1.bf16.msra.mxu1 %v3098_v8  ;;  %v555_v8 = vmul.f32 %v3835_v27, %v507_v47  ;;  %v512_v47 = vunpack.c.l.bf16 %v478_v25 }
 0x137   : > { %1676 = vmatprep.subr.bf16.mxu1 %v3100_v15 }
 0x138   : > { %v3985_v45 = vadd.f32 %v3841_v31, %v555_v8  ;;  %v4016_v8 = vadd.f32 %v3841_v31, %v553_v41  ;;  %v560_v11 = vmul.f32 %v3832_v26, %v512_v47 }
 0x13a   : > { %1677 = vmatpush1.bf16.msra.mxu1 %v3104_v38 }
 0x13b   : > { %1678 = vmatprep.subr.bf16.mxu1 %v3106_v10 }
 0x13e   : > { %1679 = vmatpush1.bf16.msra.mxu1 %v3110_v12 }
 0x178   : > { %v3951_v14 = vpop.permute.xlu1 %624  ;;  %v3953_v15 = vpop.permute.xlu0 %614 }
 0x179   : > { %5202 = vst [vmem:[#allocation24_spill] sm:$0xff] %v3951_v14  ;;  %v3974_v38 = vmul.f32 %v3951_v14, %v3867_v52  ;;  %v3978_v40 = vmul.f32 %v3951_v14, %v3870_v53  ;;  %v3112_v52 = vld [vmem:[#allocation10 + $0x1a4] ss:$8 sps:$4 sm:$0xff]   ;;  %v3990_v53 = vmul.f32 %v3953_v15, %v3874_v57  ;;  %v3994_v49 = vmul.f32 %v3953_v15, %v3880_v62 }
 0x17a   : > { %v556_v62 = vmul.f32 %v3832_v26, %v508_v37  ;;  %1791 = vmatprep.subr.bf16.mxu0 %v3112_v52  ;;  %v561_v37 = vmul.f32 %v3835_v27, %v513_v56  ;;  %v4064_v56 = vadd.f32 %v3838_v30, %v558_v46 }
 0x17b   : > { %v817_v5 = vrot.slane %v3974_v38, 1  ;;  %v818_v7 = vrot.slane %v3978_v40, 1  ;;  %1792 = vmatpush1.bf16.msra.mxu0 %v3114_v58  ;;  %v5137_v25 = vrot.slane %v3990_v53, 1  ;;  %v5136_v28 = vrot.slane %v3994_v49, 1 }
 0x17c   : > { %v3996_v50 = vpop.permute.xlu1 %629  ;;  %v3998_v51 = vpop.permute.xlu0 %619  ;;  %v4067_v58 = vadd.f32 %v3841_v31, %v559_v54 }
 0x17d   : > { %5203 = vst [vmem:[#allocation25_spill] sm:$0xff] %v3996_v50  ;;  %5204 = vst [vmem:[#allocation26_spill] sm:$0xff] %v3998_v51  ;;  %v4003_v59 = vmul.f32 %v3998_v51, %v3890_v3  ;;  %v4007_v57 = vmul.f32 %v3998_v51, %v3893_v4  ;;  %v557_v3 = vmul.f32 %v3835_v27, %v509_v42 }
 0x17e   : > { %v4035_v41 = vmul.f32 %v3996_v50, %v3883_v63  ;;  %v4039_v26 = vmul.f32 %v3996_v50, %v3886_v0 }
 0x17f   : > { %v2859_v9 = vpack.i.bf16 %v4007_v57, %v3994_v49  ;;  %v2854_v4 = vpack.i.bf16 %v4003_v59, %v3990_v53  ;;  %v815_v10 = vrot.slane %v4003_v59, 1  ;;  %v816_v36 = vrot.slane %v4007_v57, 1 }
 0x180   : > { %v4025_v12 = vpop.permute.xlu1 %639  ;;  %v4027_v24 = vpop.permute.xlu0 %634  ;;  %v819_v46 = vrot.slane %v4035_v41, 1  ;;  %v820_v54 = vrot.slane %v4039_v26, 1 }
 0x181   : > { %5205 = vst [vmem:[#allocation27_spill] sm:$0xff] %v4025_v12  ;;  %5206 = vst [vmem:[#allocation28_spill] sm:$0xff] %v4027_v24  ;;  %v4043_v42 = vmul.f32 %v4027_v24, %v3909_v32  ;;  %v4047_v47 = vmul.f32 %v4027_v24, %v3913_v39  ;;  %2860 = vrot.lane.b32.xlu1 %v2859_v9, %s3441_s19  ;;  %2855 = vrot.lane.b32.xlu0 %v2854_v4, %s3441_s19 }
 0x182   : > { %v882_v27 = vsel %vm849_vm0, %v5137_v25, %v815_v10  ;;  %v883_v63 = vsel %vm849_vm0, %v5136_v28, %v816_v36  ;;  %v880_v0 = vsel %vm849_vm0, %v815_v10, %v817_v5  ;;  %v881_v32 = vsel %vm849_vm0, %v816_v36, %v818_v7 }
 0x183   : > { %v2864_v39 = vpack.i.bf16 %v883_v63, %v882_v27  ;;  %v2874_v52 = vpack.i.bf16 %v881_v32, %v880_v0  ;;  %v821_v13 = vrot.slane %v4043_v42, 1  ;;  %v822_v28 = vrot.slane %v4047_v47, 1 }
 0x184   : > { %v4069_v9 = vpop.permute.xlu1 %649  ;;  %v4071_v4 = vpop.permute.xlu0 %644  ;;  %v4076_v10 = vadd.f32 %v3838_v30, %v556_v62  ;;  %v4079_v36 = vadd.f32 %v3841_v31, %v557_v3  ;;  %v4085_v27 = vadd.f32 %v3838_v30, %v560_v11  ;;  %v4088_v63 = vadd.f32 %v3841_v31, %v561_v37 }
 0x185   : > { %5207 = vst [vmem:[#allocation29_spill] sm:$0xff] %v4069_v9  ;;  %5208 = vst [vmem:[#allocation30_spill] sm:$0xff] %v4071_v4  ;;  %2875 = vrot.lane.b32.xlu1 %v2874_v52, %s3442_s14  ;;  %v4093_v62 = vmul.f32 %v4025_v12, %v3900_v16  ;;  %v4097_v3 = vmul.f32 %v4025_v12, %v3903_v17  ;;  %2865 = vrot.lane.b32.xlu0 %v2864_v39, %s3442_s14 }
 0x186   : > { %v4103_v30 = vmul.f32 %v4071_v4, %v3931_v55  ;;  %v2879_v31 = vpack.i.bf16 %v4039_v26, %v3978_v40  ;;  %v4111_v37 = vmul.f32 %v4071_v4, %v3936_v60  ;;  %v2869_v52 = vpack.i.bf16 %v4035_v41, %v3974_v38 }
 0x187   : > { %v876_v55 = vsel %vm849_vm0, %v819_v46, %v821_v13  ;;  %v877_v0 = vsel %vm849_vm0, %v820_v54, %v822_v28  ;;  %v4126_v16 = vmul.f32 %v4069_v9, %v3924_v48  ;;  %v878_v60 = vsel %vm849_vm0, %v817_v5, %v819_v46 }
 0x188   : > { %v4113_v17 = vpop.permute.xlu1 %659  ;;  %v4115_v39 = vpop.permute.xlu0 %654  ;;  %v879_v32 = vsel %vm849_vm0, %v818_v7, %v820_v54  ;;  %v4136_v4 = vmul.f32 %v4069_v9, %v3920_v44  ;;  %v823_v11 = vrot.slane %v4093_v62, 1  ;;  %v824_v48 = vrot.slane %v4097_v3, 1 }
 0x189   : > { %5209 = vst [vmem:[#allocation31_spill] sm:$0xff] %v4113_v17  ;;  %5210 = vst [vmem:[#allocation32_spill] sm:$0xff] %v4115_v39  ;;  %2880 = vrot.lane.b32.xlu1 %v2879_v31, %s3441_s19  ;;  %2870 = vrot.lane.b32.xlu0 %v2869_v52, %s3441_s19  ;;  %v4143_v31 = vmul.f32 %v4113_v17, %v3942_v1  ;;  %v4147_v5 = vmul.f32 %v4115_v39, %v3956_v21  ;;  %v825_v46 = vrot.slane %v4103_v30, 1 }
 0x18a   : > { %v2894_v7 = vpack.i.bf16 %v877_v0, %v876_v55  ;;  %v4153_v54 = vmul.f32 %v4115_v39, %v3947_v6  ;;  %v2884_v9 = vpack.i.bf16 %v879_v32, %v878_v60  ;;  %v826_v1 = vrot.slane %v4111_v37, 1 }
 0x18b   : > { %v4164_v0 = vmul.f32 %v4113_v17, %v3939_v61  ;;  %v2889_v6 = vpack.i.bf16 %v4093_v62, %v4043_v42  ;;  %v874_v32 = vsel %vm849_vm0, %v821_v13, %v823_v11  ;;  %v875_v55 = vsel %vm849_vm0, %v822_v28, %v824_v48 }
 0x18c   : > { %v4155_v52 = vpop.permute.xlu1 %669  ;;  %v4157_v25 = vpop.permute.xlu0 %664  ;;  %v827_v60 = vrot.slane %v4136_v4, 1  ;;  %v828_v21 = vrot.slane %v4126_v16, 1  ;;  %v873_v17 = vsel %vm849_vm0, %v824_v48, %v826_v1  ;;  %v829_v61 = vrot.slane %v4153_v54, 1 }
 0x18d   : > { %5211 = vst [vmem:[#allocation33_spill] sm:$0xff] %v4155_v52  ;;  %5212 = vst [vmem:[#allocation34_spill] sm:$0xff] %v4157_v25  ;;  %2895 = vrot.lane.b32.xlu1 %v2894_v7, %s3442_s14  ;;  %2885 = vrot.lane.b32.xlu0 %v2884_v9, %s3442_s14  ;;  %v2899_v7 = vpack.i.bf16 %v4097_v3, %v4047_v47  ;;  %v872_v9 = vsel %vm849_vm0, %v823_v11, %v825_v46  ;;  %v830_v12 = vrot.slane %v4147_v5, 1 }
 0x18e   : > { %v4184_v13 = vmul.f32 %v4155_v52, %v3962_v23  ;;  %v4196_v39 = vmul.f32 %v4157_v25, %v3966_v29  ;;  %v4200_v11 = vmul.f32 %v4157_v25, %v3969_v33  ;;  %v2904_v23 = vpack.i.bf16 %v875_v55, %v874_v32 }
 0x18f   : > { %v2909_v24 = vpack.i.bf16 %v4136_v4, %v4103_v30  ;;  %v2919_v48 = vpack.i.bf16 %v4126_v16, %v4111_v37  ;;  %v870_v50 = vsel %vm849_vm0, %v825_v46, %v827_v60  ;;  %v871_v29 = vsel %vm849_vm0, %v826_v1, %v828_v21 }
 0x190   : > { %v4186_v44 = vpop.permute.xlu1 %679  ;;  %v4188_v28 = vpop.permute.xlu0 %674  ;;  %v831_v33 = vrot.slane %v4164_v0, 1  ;;  %v2914_v55 = vpack.i.bf16 %v873_v17, %v872_v9  ;;  %v868_v14 = vsel %vm849_vm0, %v827_v60, %v829_v61  ;;  %v2924_v17 = vpack.i.bf16 %v871_v29, %v870_v50 }
 0x191   : > { %5213 = vst [vmem:[#allocation35_spill] sm:$0xff] %v4186_v44  ;;  %5214 = vst [vmem:[#allocation36_spill] sm:$0xff] %v4188_v28  ;;  %2900 = vrot.lane.b32.xlu1 %v2899_v7, %s3441_s19  ;;  %2890 = vrot.lane.b32.xlu0 %v2889_v6, %s3441_s19  ;;  %v4215_v7 = vmul.f32 %v4155_v52, %v3959_v22  ;;  %v4219_v32 = vmul.f32 %v4186_v44, %v3985_v45  ;;  %v832_v45 = vrot.slane %v4143_v31, 1 }
 0x192   : > { %v4223_v6 = vmul.f32 %v4188_v28, %v4016_v8  ;;  %v869_v22 = vsel %vm849_vm0, %v828_v21, %v830_v12  ;;  %v4238_v8 = vmul.f32 %v4188_v28, %v4010_v2  ;;  %v833_v9 = vrot.slane %v4196_v39, 1 }
 0x193   : > { %v4244_v46 = vmul.f32 %v4186_v44, %v3982_v43  ;;  %v2929_v21 = vpack.i.bf16 %v4164_v0, %v4153_v54  ;;  %v2939_v60 = vpack.i.bf16 %v4143_v31, %v4147_v5  ;;  %v4253_v2 = vsel %vm849_vm0, %v829_v61, %v831_v33 }
 0x194   : > { %v4226_v25 = vpop.permute.xlu1 %689  ;;  %v4228_v1 = vpop.permute.xlu0 %684  ;;  %v834_v43 = vrot.slane %v4200_v11, 1  ;;  %v4266_v44 = vsel %vm849_vm0, %v830_v12, %v832_v45  ;;  %v835_v61 = vrot.slane %v4215_v7, 1  ;;  %v836_v28 = vrot.slane %v4184_v13, 1 }
 0x195   : > { %5215 = vst [vmem:[#allocation37_spill] sm:$0xff] %v4226_v25  ;;  %5216 = vst [vmem:[#allocation38_spill] sm:$0xff] %v4228_v1  ;;  %2915 = vrot.lane.b32.xlu1 %v2914_v55, %s3442_s14  ;;  %2905 = vrot.lane.b32.xlu0 %v2904_v23, %s3442_s14  ;;  %v2934_v55 = vpack.i.bf16 %v869_v22, %v868_v14  ;;  %v4260_v23 = vmul.f32 %v4226_v25, %v4067_v58  ;;  %v837_v22 = vrot.slane %v4238_v8, 1 }
 0x196   : > { %v864_v14 = vsel %vm849_vm0, %v831_v33, %v833_v9  ;;  %v838_v12 = vrot.slane %v4223_v6, 1  ;;  %v4282_v50 = vmul.f32 %v4226_v25, %v4064_v56  ;;  %v4286_v51 = vmul.f32 %v4228_v1, %v4076_v10 }
 0x197   : > { %v2944_v10 = vpack.i.bf16 %v4266_v44, %v4253_v2  ;;  %v741_v33 = vrot.slane %v4007_v57, 7  ;;  %v5220_v57 = vrot.slane %v3994_v49, 1 }
 0x198   : > { %v4262_v52 = vpop.permute.xlu0 %694  ;;  %v4271_v29 = vpop.permute.xlu1 %699 }
 0x199   : > { %5217 = vst [vmem:[#allocation39_spill] sm:$0xff] %v4262_v52  ;;  %5218 = vst [vmem:[#allocation40_spill] sm:$0xff] %v4271_v29  ;;  %2920 = vrot.lane.b32.xlu1 %v2919_v48, %s3441_s19  ;;  %v4290_v48 = vmul.f32 %v4228_v1, %v4079_v36  ;;  %2910 = vrot.lane.b32.xlu0 %v2909_v24, %s3441_s19  ;;  %v4297_v58 = vmul.f32 %v4262_v52, %v4085_v27  ;;  %v5266_v1 = vrot.slane %v4260_v23, 7 }
 0x19a   : > { %v4301_v56 = vmul.f32 %v4262_v52, %v4088_v63  ;;  %v865_v36 = vsel %vm849_vm0, %v832_v45, %v834_v43  ;;  %v4310_v24 = vmul.f32 %v4271_v29, %v3846_v34  ;;  %v4314_v27 = vsel %vm849_vm0, %v833_v9, %v835_v61 }
 0x19b   : > { %v4318_v63 = vsel %vm849_vm0, %v834_v43, %v836_v28  ;;  %v4322_v44 = vmul.f32 %v4271_v29, %v3849_v35  ;;  %v4327_v45 = vsel %vm849_vm0, %v835_v61, %v837_v22  ;;  %v4331_v34 = vsel %vm849_vm0, %v836_v28, %v838_v12 }
 0x19c   : > { %v839_v9 = vrot.slane %v4244_v46, 1  ;;  %v2954_v43 = vpack.i.bf16 %v865_v36, %v864_v14  ;;  %v5166_v28 = vrot.slane %v4297_v58, 1  ;;  %v847_v25 = vrot.slane %v4310_v24, 1 }
 0x19d   : > { %2935 = vrot.lane.b32.xlu1 %v2934_v55, %s3442_s14  ;;  %2925 = vrot.lane.b32.xlu0 %v2924_v17, %s3442_s14  ;;  %v840_v55 = vrot.slane %v4219_v32, 1  ;;  %v2974_v17 = vpack.i.bf16 %v4331_v34, %v4327_v45  ;;  %v848_v61 = vrot.slane %v4322_v44, 1  ;;  %v5235_v52 = vrot.slane %v4047_v47, 7 }
 0x19e   : > { %v4353_v35 = vsel %vm849_vm0, %v837_v22, %v839_v9  ;;  %v5219_v22 = vrot.slane %v3990_v53, 1  ;;  %v5240_v47 = vrot.slane %v4111_v37, 7  ;;  %v750_v37 = vrot.slane %v4103_v30, 7 }
 0x19f   : > { %v4361_v45 = vsel %vm849_vm0, %v838_v12, %v840_v55  ;;  %v4382_v12 = vsel %vm849_vm0, %v5166_v28, %v847_v25  ;;  %v5224_v28 = vrot.slane %v4322_v44, 7 }
 0x1a0   : > { %v4370_v36 = vsel %vm849_vm0, %v847_v25, %v5219_v22  ;;  %v5226_v22 = vrot.slane %v4290_v48, 1 }
 0x1a1   : > { %2940 = vrot.lane.b32.xlu1 %v2939_v60, %s3441_s19  ;;  %2930 = vrot.lane.b32.xlu0 %v2929_v21, %s3441_s19  ;;  %v740_v60 = vrot.slane %v4003_v59, 7  ;;  %v4376_v21 = vsel %vm849_vm0, %v848_v61, %v5220_v57  ;;  %v5221_v59 = vrot.slane %v4301_v56, 1  ;;  %v5222_v57 = vrot.slane %v3994_v49, 7 }
 0x1a2   : > { %v5227_v49 = vrot.slane %v3990_v53, 7 }
 0x1a3   : > { %v4388_v2 = vsel %vm849_vm0, %v5221_v59, %v848_v61  ;;  %v4398_v34 = vsel %vm776_vm1, %v5222_v57, %v741_v33  ;;  %v5223_v25 = vmov %v5222_v57  ;;  %v5225_v59 = vrot.slane %v4286_v51, 1 }
 0x1a4   : > { %v4406_v61 = vsel %vm776_vm1, %v5224_v28, %v5223_v25  ;;  %v4419_v57 = vsel %vm849_vm0, %v840_v55, %v5226_v22  ;;  %v4425_v28 = vsel %vm776_vm1, %v5227_v49, %v740_v60  ;;  %v5229_v25 = vrot.slane %v4310_v24, 7 }
 0x1a5   : > { %2955 = vrot.lane.b32.xlu1 %v2954_v43, %s3442_s14  ;;  %v4413_v14 = vsel %vm849_vm0, %v839_v9, %v5225_v59  ;;  %v5228_v43 = vmov %v5227_v49  ;;  %2945 = vrot.lane.b32.xlu0 %v2944_v10, %s3442_s14  ;;  %v5230_v22 = vrot.slane %v4039_v26, 7  ;;  %v5231_v59 = vrot.slane %v3978_v40, 7 }
 0x1a6   : > { %v4433_v9 = vsel %vm776_vm1, %v5229_v25, %v5228_v43  ;;  %v744_v43 = vrot.slane %v4035_v41, 7  ;;  %v5233_v10 = vrot.slane %v3974_v38, 7  ;;  %v5234_v55 = vrot.slane %v4097_v3, 7 }
 0x1a7   : > { %v4444_v49 = vsel %vm776_vm1, %v5231_v59, %v5230_v22  ;;  %v5232_v53 = vmov %v5231_v59  ;;  %v5236_v40 = vmov %v5235_v52  ;;  %v746_v59 = vrot.slane %v4043_v42, 7 }
 0x1a8   : > { %v4450_v29 = vsel %vm776_vm1, %v741_v33, %v5232_v53  ;;  %v4457_v25 = vsel %vm776_vm1, %v740_v60, %v5233_v10  ;;  %v4465_v22 = vsel %vm776_vm1, %v5235_v52, %v5234_v55  ;;  %v5237_v33 = vrot.slane %v4039_v26, 7 }
 0x1a9   : > { %v5238_v60 = vmov %v5233_v10  ;;  %v748_v10 = vrot.slane %v4093_v62, 7  ;;  %v5239_v52 = vrot.slane %v4126_v16, 7  ;;  %v5241_v55 = vmov %v5240_v47 }
 0x1aa   : > { %v4473_v41 = vsel %vm776_vm1, %v5237_v33, %v5236_v40  ;;  %v4480_v53 = vsel %vm776_vm1, %v5238_v60, %v744_v43  ;;  %v5242_v42 = vrot.slane %v4097_v3, 7  ;;  %v5243_v62 = vpack.i.bf16 %v4184_v13, %v4200_v11 }
 0x1ab   : > { %v4489_v26 = vsel %vm776_vm1, %v5240_v47, %v5239_v52  ;;  %v4507_v33 = vsel %vm776_vm1, %v744_v43, %v746_v59  ;;  %v752_v3 = vrot.slane %v4136_v4, 7  ;;  %v5244_v60 = vpack.i.bf16 %v4215_v7, %v4196_v39 }
 0x1ac   : > { %v4497_v38 = vsel %vm776_vm1, %v5242_v42, %v5241_v55  ;;  %2960 = vrot.lane.b32.xlu1 %v5243_v62, %s3441_s19  ;;  %v4517_v52 = vsel %vm776_vm1, %v746_v59, %v748_v10  ;;  %v5245_v47 = vrot.slane %v4143_v31, 7  ;;  %v5246_v55 = vrot.slane %v4147_v5, 7 }
 0x1ad   : > { %2950 = vrot.lane.b32.xlu0 %v5244_v60, %s3441_s19  ;;  %v5248_v4 = vrot.slane %v4126_v16, 7  ;;  %v754_v62 = vrot.slane %v4153_v54, 7  ;;  %v4540_v60 = vsel %vm776_vm1, %v750_v37, %v752_v3  ;;  %v756_v5 = vrot.slane %v4164_v0, 7 }
 0x1ae   : > { %v4525_v43 = vsel %vm776_vm1, %v5246_v55, %v5245_v47  ;;  %v5247_v30 = vmov %v5246_v55  ;;  %v4544_v47 = vsel %vm776_vm1, %v748_v10, %v750_v37  ;;  %v5249_v54 = vrot.slane %v4184_v13, 7 }
 0x1af   : > { %v4533_v42 = vsel %vm776_vm1, %v5248_v4, %v5247_v30  ;;  %v4551_v55 = vsel %vm776_vm1, %v752_v3, %v754_v62  ;;  %v5250_v30 = vrot.slane %v4200_v11, 7  ;;  %v5252_v37 = vrot.slane %v4143_v31, 7 }
 0x1b0   : > { %2975 = vrot.lane.b32.xlu1 %v2974_v17, %s3442_s14  ;;  %v4572_v3 = vsel %vm776_vm1, %v754_v62, %v756_v5  ;;  %v758_v16 = vrot.slane %v4196_v39, 7  ;;  %v760_v59 = vrot.slane %v4215_v7, 7  ;;  %v5254_v11 = vrot.slane %v4223_v6, 7 }
 0x1b1   : > { %v4559_v4 = vsel %vm776_vm1, %v5250_v30, %v5249_v54  ;;  %v5251_v10 = vmov %v5250_v30  ;;  %v5253_v54 = vrot.slane %v4219_v32, 7  ;;  %v5255_v17 = vpack.i.bf16 %v4318_v63, %v4314_v27 }
 0x1b2   : > { %v4567_v0 = vsel %vm776_vm1, %v5252_v37, %v5251_v10  ;;  %v5256_v39 = vmov %v5254_v11  ;;  %v5257_v7 = vrot.slane %v4184_v13, 7  ;;  %v762_v10 = vrot.slane %v4238_v8, 7 }
 0x1b3   : > { %v4582_v31 = vsel %vm776_vm1, %v5254_v11, %v5253_v54  ;;  %2965 = vrot.lane.b32.xlu0 %v5255_v17, %s3442_s14  ;;  %v764_v37 = vrot.slane %v4244_v46, 7  ;;  %v4602_v54 = vsel %vm776_vm1, %v758_v16, %v760_v59  ;;  %v4606_v27 = vsel %vm776_vm1, %v756_v5, %v758_v16 }
 0x1b4   : > { %v4596_v30 = vsel %vm776_vm1, %v5257_v7, %v5256_v39  ;;  %v5258_v63 = vrot.slane %v4260_v23, 7  ;;  %v5259_v13 = vrot.slane %v4290_v48, 7  ;;  %v5261_v39 = vrot.slane %v4219_v32, 7 }
 0x1b5   : > { %v4628_v16 = vsel %vm776_vm1, %v762_v10, %v764_v37  ;;  %v4632_v62 = vsel %vm776_vm1, %v760_v59, %v762_v10  ;;  %v5263_v5 = vrot.slane %v4322_v44, 7  ;;  %v5264_v40 = vrot.slane %v4301_v56, 7 }
 0x1b6   : > { %v4614_v11 = vsel %vm776_vm1, %v5259_v13, %v5258_v63  ;;  %v5260_v17 = vmov %v5259_v13  ;;  %v766_v63 = vrot.slane %v4286_v51, 7  ;;  %v5262_v13 = vpack.i.bf16 %v4219_v32, %v4223_v6 }
 0x1b7   : > { %v4622_v7 = vsel %vm776_vm1, %v5261_v39, %v5260_v17  ;;  %v768_v39 = vrot.slane %v4282_v50, 7  ;;  %v4648_v59 = vsel %vm776_vm1, %v5264_v40, %v5263_v5  ;;  %v5265_v10 = vmov %v5264_v40 }
 0x1b8   : > { %2980 = vrot.lane.b32.xlu1 %v5262_v13, %s3441_s19  ;;  %v4656_v32 = vsel %vm776_vm1, %v5266_v1, %v5265_v10  ;;  %v5267_v6 = vpack.i.bf16 %v4244_v46, %v4238_v8  ;;  %v4664_v13 = vsel %vm776_vm1, %v764_v37, %v766_v63  ;;  %v770_v40 = vrot.slane %v4297_v58, 7 }
 0x1b9   : > { %v2994_v5 = vpack.i.bf16 %v4419_v57, %v4413_v14  ;;  %v4671_v17 = vsel %vm776_vm1, %v766_v63, %v768_v39  ;;  %v2984_v1 = vpack.i.bf16 %v4361_v45, %v4353_v35  ;;  %v5268_v8 = vrot.slane %v4310_v24, 7 }
 0x1ba   : > { %2970 = vrot.lane.b32.xlu0 %v5267_v6, %s3441_s19  ;;  %v1276_v46 = vpack.c.bf16 %v4671_v17, %v4664_v13  ;;  %v4685_v10 = vsel %vm776_vm1, %v768_v39, %v770_v40  ;;  %v843_v14 = vrot.slane %v4282_v50, 1  ;;  %v844_v57 = vrot.slane %v4260_v23, 1 }
 0x1bb   : > { %v4681_v37 = vsel %vm776_vm1, %v770_v40, %v5268_v8  ;;  %v2999_v45 = vpack.i.bf16 %v4260_v23, %v4290_v48  ;;  %v2989_v63 = vpack.i.bf16 %v4282_v50, %v4286_v51  ;;  %v5269_v39 = vrot.slane %v4297_v58, 1 }
 0x1bc   : > { %2995 = vrot.lane.b32.xlu1 %v2994_v5, %s3442_s14  ;;  %v5270_v40 = vrot.slane %v4301_v56, 1  ;;  %v5272_v8 = vrot.slane %v4290_v48, 1  ;;  %v5273_v48 = vpack.i.bf16 %v4376_v21, %v4370_v36 }
 0x1bd   : > { %v852_v6 = vsel %vm849_vm0, %v843_v14, %v5269_v39 }
 0x1be   : > { %2985 = vrot.lane.b32.xlu0 %v2984_v1, %s3442_s14  ;;  %v853_v5 = vsel %vm849_vm0, %v844_v57, %v5270_v40  ;;  %v5271_v1 = vrot.slane %v4286_v51, 1  ;;  %v855_v50 = vsel %vm849_vm0, %v5272_v8, %v844_v57  ;;  %v3009_v51 = vpack.i.bf16 %v4310_v24, %v4297_v58 }
 0x1bf   : > { %v3014_v39 = vpack.i.bf16 %v853_v5, %v852_v6 }
 0x1c0   : > { %3000 = vrot.lane.b32.xlu1 %v2999_v45, %s3441_s19  ;;  %v854_v23 = vsel %vm849_vm0, %v5271_v1, %v843_v14  ;;  %v3019_v45 = vpack.i.bf16 %v4322_v44, %v4301_v56  ;;  %v5274_v14 = vpack.i.bf16 %v4388_v2, %v4382_v12 }
 0x1c1   : > { %v3004_v35 = vpack.i.bf16 %v855_v50, %v854_v23 }
 0x1c2   : > { %2990 = vrot.lane.b32.xlu0 %v2989_v63, %s3441_s19 }
 0x1c4   : > { %3015 = vrot.lane.b32.xlu1 %v3014_v39, %s3442_s14 }
 0x1c6   : > { %3005 = vrot.lane.b32.xlu0 %v3004_v35, %s3442_s14 }
 0x1c8   : > { %3020 = vrot.lane.b32.xlu1 %v3019_v45, %s3441_s19 }
 0x1ca   : > { %3010 = vrot.lane.b32.xlu0 %v3009_v51, %s3441_s19 }
 0x1cc   : > { %3030 = vrot.lane.b32.xlu1 %v5273_v48, %s3442_s14 }
 0x1ce   : > { %3025 = vrot.lane.b32.xlu0 %v5274_v14, %s3442_s14 }
 0x1f3   : > { %v2861_v57 = vpop.permute.xlu1 %2860  ;;  %v2856_v56 = vpop.permute.xlu0 %2855 }
 0x1f4   : > { %v2863_v44 = vunpack.i.h.bf16 %v2861_v57  ;;  %v2858_v35 = vunpack.i.h.bf16 %v2856_v56  ;;  %v2857_v58 = vunpack.i.l.bf16 %v2856_v56  ;;  %v2862_v24 = vunpack.i.l.bf16 %v2861_v57 }
 0x1f6   : > { %v1212_v6 = vsel %vm994_vm2, %v4406_v61, %v2857_v58  ;;  %v1213_v36 = vsel %vm994_vm2, %v4398_v34, %v2858_v35  ;;  %v996_v12 = vsel %vm994_vm2, %v2858_v35, %v2863_v44  ;;  %v995_v8 = vsel %vm994_vm2, %v2857_v58, %v2862_v24 }
 0x1f7   : > { %v2876_v63 = vpop.permute.xlu1 %2875  ;;  %v2866_v5 = vpop.permute.xlu0 %2865  ;;  %v1249_v2 = vpack.c.bf16 %v1213_v36, %v1212_v6  ;;  %v5275_v61 = vpack.c.bf16 %v4425_v28, %v4433_v9 }
 0x1f8   : > { %v2878_v21 = vunpack.i.h.bf16 %v2876_v63  ;;  %v2877_v40 = vunpack.i.l.bf16 %v2876_v63  ;;  %v2868_v1 = vunpack.i.h.bf16 %v2866_v5  ;;  %v2867_v23 = vunpack.i.l.bf16 %v2866_v5 }
 0x1f9   : > { %1680 = vmatprep.mubr.bf16.mxu1 %v1249_v2 }
 0x1fa   : > { %v1159_v50 = vsel %vm1157_vm3, %v2877_v40, %v2878_v21  ;;  %v1231_v39 = vsel %vm1157_vm3, %v996_v12, %v2877_v40  ;;  %1681 = vmatmul.mubr.bf16.vlgmr.msra.gmra.mrb[0].mxu1 %v5275_v61  ;;  %v1158_v45 = vsel %vm1157_vm3, %v2867_v23, %v2868_v1  ;;  %v1230_v51 = vsel %vm1157_vm3, %v995_v8, %v2867_v23 }
 0x1fb   : > { %v2881_v34 = vpop.permute.xlu1 %2880  ;;  %v2871_v48 = vpop.permute.xlu0 %2870  ;;  %v1251_v14 = vpack.c.bf16 %v1159_v50, %v1158_v45  ;;  %v1250_v57 = vpack.c.bf16 %v1231_v39, %v1230_v51 }
 0x1fc   : > { %v2883_v56 = vunpack.i.h.bf16 %v2881_v34  ;;  %v2873_v44 = vunpack.i.h.bf16 %v2871_v48  ;;  %v2872_v35 = vunpack.i.l.bf16 %v2871_v48  ;;  %v2882_v58 = vunpack.i.l.bf16 %v2881_v34 }
 0x1fd   : > { %2601 = vmatprep.mubr.msk.bf16.mxu0 %vm1620_vm4, %v1251_v14 }
 0x1fe   : > { %1804 = vmatmul.mubr.bf16.vlgmr.msra.gmra.mrb[0].mxu0 %v1250_v57  ;;  %v1214_v28 = vsel %vm994_vm2, %v4450_v29, %v2872_v35  ;;  %v1215_v9 = vsel %vm994_vm2, %v4444_v49, %v2873_v44  ;;  %v998_v40 = vsel %vm994_vm2, %v2873_v44, %v2883_v56  ;;  %v997_v12 = vsel %vm994_vm2, %v2872_v35, %v2882_v58 }
 0x1ff   : > { %v2896_v24 = vpop.permute.xlu1 %2895  ;;  %v2886_v36 = vpop.permute.xlu0 %2885  ;;  %v1253_v21 = vpack.c.bf16 %v1215_v9, %v1214_v28  ;;  %v5276_v49 = vpack.c.bf16 %v4480_v53, %v4457_v25 }
 0x200   : > { %v2898_v63 = vunpack.i.h.bf16 %v2896_v24  ;;  %v2897_v6 = vunpack.i.l.bf16 %v2896_v24  ;;  %v2888_v5 = vunpack.i.h.bf16 %v2886_v36  ;;  %v2887_v2 = vunpack.i.l.bf16 %v2886_v36 }
 0x201   : > { %1690 = vmatprep.mubr.bf16.mxu1 %v1253_v21 }
 0x202   : > { %v1161_v1 = vsel %vm1157_vm3, %v2897_v6, %v2898_v63  ;;  %v1233_v23 = vsel %vm1157_vm3, %v998_v40, %v2897_v6  ;;  %v1160_v29 = vsel %vm1157_vm3, %v2887_v2, %v2888_v5  ;;  %1691 = vmatmul.mubr.bf16.gmra.mrb[4].mxu1 %v5276_v49  ;;  %v1232_v50 = vsel %vm1157_vm3, %v997_v12, %v2887_v2 }
 0x203   : > { %v2901_v8 = vpop.permute.xlu1 %2900  ;;  %v1255_v39 = vpack.c.bf16 %v1161_v1, %v1160_v29  ;;  %v2891_v61 = vpop.permute.xlu0 %2890  ;;  %v1254_v34 = vpack.c.bf16 %v1233_v23, %v1232_v50 }
 0x204   : > { %v2903_v45 = vunpack.i.h.bf16 %v2901_v8  ;;  %v2893_v51 = vunpack.i.h.bf16 %v2891_v61  ;;  %v2892_v48 = vunpack.i.l.bf16 %v2891_v61  ;;  %v2902_v14 = vunpack.i.l.bf16 %v2901_v8 }
 0x205   : > { %2602 = vmatprep.mubr.msk.bf16.mxu0 %vm1620_vm4, %v1255_v39 }
 0x206   : > { %1814 = vmatmul.mubr.bf16.gmra.mrb[4].mxu0 %v1254_v34  ;;  %v1216_v56 = vsel %vm994_vm2, %v4473_v41, %v2892_v48  ;;  %v1217_v25 = vsel %vm994_vm2, %v4465_v22, %v2893_v51  ;;  %v1000_v24 = vsel %vm994_vm2, %v2893_v51, %v2903_v45  ;;  %v999_v63 = vsel %vm994_vm2, %v2892_v48, %v2902_v14 }
 0x207   : > { %v2916_v57 = vpop.permute.xlu1 %2915  ;;  %v2906_v35 = vpop.permute.xlu0 %2905  ;;  %v1257_v58 = vpack.c.bf16 %v1217_v25, %v1216_v56  ;;  %v5277_v22 = vpack.c.bf16 %v4517_v52, %v4507_v33 }
 0x208   : > { %v2918_v53 = vunpack.i.h.bf16 %v2916_v57  ;;  %v2917_v44 = vunpack.i.l.bf16 %v2916_v57  ;;  %v2908_v28 = vunpack.i.h.bf16 %v2906_v35  ;;  %v2907_v9 = vunpack.i.l.bf16 %v2906_v35 }
 0x209   : > { %1700 = vmatprep.mubr.bf16.mxu1 %v1257_v58 }
 0x20a   : > { %v1163_v6 = vsel %vm1157_vm3, %v2917_v44, %v2918_v53  ;;  %v1235_v36 = vsel %vm1157_vm3, %v1000_v24, %v2917_v44  ;;  %v1162_v41 = vsel %vm1157_vm3, %v2907_v9, %v2908_v28  ;;  %1701 = vmatmul.mubr.bf16.gmra.mrb[8].mxu1 %v5277_v22  ;;  %v1234_v40 = vsel %vm1157_vm3, %v999_v63, %v2907_v9 }
 0x20b   : > { %v2921_v21 = vpop.permute.xlu1 %2920  ;;  %v1259_v5 = vpack.c.bf16 %v1163_v6, %v1162_v41  ;;  %v2911_v2 = vpop.permute.xlu0 %2910  ;;  %v1258_v12 = vpack.c.bf16 %v1235_v36, %v1234_v40 }
 0x20c   : > { %v2923_v1 = vunpack.i.h.bf16 %v2921_v21  ;;  %v2913_v23 = vunpack.i.h.bf16 %v2911_v2  ;;  %v2912_v29 = vunpack.i.l.bf16 %v2911_v2  ;;  %v2922_v49 = vunpack.i.l.bf16 %v2921_v21 }
 0x20d   : > { %2603 = vmatprep.mubr.msk.bf16.mxu0 %vm1620_vm4, %v1259_v5 }
 0x20e   : > { %1824 = vmatmul.mubr.bf16.gmra.mrb[8].mxu0 %v1258_v12  ;;  %v1218_v50 = vsel %vm994_vm2, %v4497_v38, %v2912_v29  ;;  %v1219_v33 = vsel %vm994_vm2, %v4489_v26, %v2913_v23  ;;  %v1002_v45 = vsel %vm994_vm2, %v2913_v23, %v2923_v1  ;;  %v1001_v14 = vsel %vm994_vm2, %v2912_v29, %v2922_v49 }
 0x20f   : > { %v2936_v8 = vpop.permute.xlu1 %2935  ;;  %v2926_v61 = vpop.permute.xlu0 %2925  ;;  %v1261_v34 = vpack.c.bf16 %v1219_v33, %v1218_v50  ;;  %v5278_v26 = vpack.c.bf16 %v4540_v60, %v4544_v47 }
 0x210   : > { %v2938_v52 = vunpack.i.h.bf16 %v2936_v8  ;;  %v2937_v39 = vunpack.i.l.bf16 %v2936_v8  ;;  %v2928_v51 = vunpack.i.h.bf16 %v2926_v61  ;;  %v2927_v48 = vunpack.i.l.bf16 %v2926_v61 }
 0x211   : > { %1710 = vmatprep.mubr.bf16.mxu1 %v1261_v34 }
 0x212   : > { %v1165_v57 = vsel %vm1157_vm3, %v2937_v39, %v2938_v52  ;;  %v1237_v56 = vsel %vm1157_vm3, %v1002_v45, %v2937_v39  ;;  %v1164_v38 = vsel %vm1157_vm3, %v2927_v48, %v2928_v51  ;;  %1711 = vmatmul.mubr.bf16.gmra.mrb[12].mxu1 %v5278_v26  ;;  %v1236_v53 = vsel %vm1157_vm3, %v1001_v14, %v2927_v48 }
 0x213   : > { %v2941_v25 = vpop.permute.xlu1 %2940  ;;  %v1263_v44 = vpack.c.bf16 %v1165_v57, %v1164_v38  ;;  %v2931_v35 = vpop.permute.xlu0 %2930  ;;  %v1262_v58 = vpack.c.bf16 %v1237_v56, %v1236_v53 }
 0x214   : > { %v2943_v24 = vunpack.i.h.bf16 %v2941_v25  ;;  %v2933_v28 = vunpack.i.h.bf16 %v2931_v35  ;;  %v2932_v9 = vunpack.i.l.bf16 %v2931_v35  ;;  %v2942_v63 = vunpack.i.l.bf16 %v2941_v25 }
 0x215   : > { %2604 = vmatprep.mubr.msk.bf16.mxu0 %vm1620_vm4, %v1263_v44 }
 0x216   : > { %1834 = vmatmul.mubr.bf16.gmra.mrb[12].mxu0 %v1262_v58  ;;  %v1220_v36 = vsel %vm994_vm2, %v4533_v42, %v2932_v9  ;;  %v1221_v60 = vsel %vm994_vm2, %v4525_v43, %v2933_v28  ;;  %v1004_v40 = vsel %vm994_vm2, %v2933_v28, %v2943_v24  ;;  %v1003_v12 = vsel %vm994_vm2, %v2932_v9, %v2942_v63 }
 0x217   : > { %v2956_v6 = vpop.permute.xlu1 %2955  ;;  %v2946_v22 = vpop.permute.xlu0 %2945  ;;  %v1265_v21 = vpack.c.bf16 %v1221_v60, %v1220_v36  ;;  %v5279_v43 = vpack.c.bf16 %v4572_v3, %v4551_v55 }
 0x218   : > { %v2958_v47 = vunpack.i.h.bf16 %v2956_v6  ;;  %v2957_v41 = vunpack.i.l.bf16 %v2956_v6  ;;  %v2948_v5 = vunpack.i.h.bf16 %v2946_v22  ;;  %v2947_v2 = vunpack.i.l.bf16 %v2946_v22 }
 0x219   : > { %1720 = vmatprep.mubr.bf16.mxu1 %v1265_v21 }
 0x21a   : > { %v1167_v1 = vsel %vm1157_vm3, %v2957_v41, %v2958_v47  ;;  %v1239_v23 = vsel %vm1157_vm3, %v1004_v40, %v2957_v41  ;;  %v1166_v42 = vsel %vm1157_vm3, %v2947_v2, %v2948_v5  ;;  %1721 = vmatmul.mubr.bf16.gmra.mrb[16].mxu1 %v5279_v43  ;;  %v1238_v49 = vsel %vm1157_vm3, %v1003_v12, %v2947_v2 }
 0x21b   : > { %v1267_v8 = vpack.c.bf16 %v1167_v1, %v1166_v42  ;;  %v1266_v33 = vpack.c.bf16 %v1239_v23, %v1238_v49 }
 0x21d   : > { %2605 = vmatprep.mubr.msk.bf16.mxu0 %vm1620_vm4, %v1267_v8 }
 0x21e   : > { %v2961_v29 = vpop.permute.xlu1 %2960  ;;  %1844 = vmatmul.mubr.bf16.gmra.mrb[16].mxu0 %v1266_v33 }
 0x21f   : > { %v2951_v50 = vpop.permute.xlu0 %2950  ;;  %v2963_v52 = vunpack.i.h.bf16 %v2961_v29  ;;  %v2962_v34 = vunpack.i.l.bf16 %v2961_v29 }
 0x220   : > { %v2953_v39 = vunpack.i.h.bf16 %v2951_v50  ;;  %v2952_v61 = vunpack.i.l.bf16 %v2951_v50 }
 0x222   : > { %v2976_v45 = vpop.permute.xlu1 %2975  ;;  %v1222_v51 = vsel %vm994_vm2, %v4567_v0, %v2952_v61  ;;  %v1223_v55 = vsel %vm994_vm2, %v4559_v4, %v2953_v39  ;;  %v1006_v56 = vsel %vm994_vm2, %v2953_v39, %v2963_v52  ;;  %v1005_v25 = vsel %vm994_vm2, %v2952_v61, %v2962_v34 }
 0x223   : > { %v2978_v3 = vunpack.i.h.bf16 %v2976_v45  ;;  %v2977_v48 = vunpack.i.l.bf16 %v2976_v45  ;;  %v1269_v57 = vpack.c.bf16 %v1223_v55, %v1222_v51  ;;  %v5280_v4 = vpack.c.bf16 %v4602_v54, %v4606_v27 }
 0x225   : > { %v2966_v14 = vpop.permute.xlu0 %2965  ;;  %v1169_v53 = vsel %vm1157_vm3, %v2977_v48, %v2978_v3  ;;  %1730 = vmatprep.mubr.bf16.mxu1 %v1269_v57  ;;  %v1241_v44 = vsel %vm1157_vm3, %v1006_v56, %v2977_v48 }
 0x226   : > { %v2968_v38 = vunpack.i.h.bf16 %v2966_v14  ;;  %v2967_v26 = vunpack.i.l.bf16 %v2966_v14  ;;  %1731 = vmatmul.mubr.bf16.gmra.mrb[20].mxu1 %v5280_v4 }
 0x228   : > { %v1168_v0 = vsel %vm1157_vm3, %v2967_v26, %v2968_v38  ;;  %v1240_v58 = vsel %vm1157_vm3, %v1005_v25, %v2967_v26 }
 0x229   : > { %v1271_v24 = vpack.c.bf16 %v1169_v53, %v1168_v0  ;;  %v1270_v9 = vpack.c.bf16 %v1241_v44, %v1240_v58 }
 0x22a   : > { %v2981_v35 = vpop.permute.xlu1 %2980 }
 0x22b   : > { %v2983_v63 = vunpack.i.h.bf16 %v2981_v35  ;;  %v2982_v60 = vunpack.i.l.bf16 %v2981_v35  ;;  %2606 = vmatprep.mubr.msk.bf16.mxu0 %vm1620_vm4, %v1271_v24 }
 0x22c   : > { %v2971_v28 = vpop.permute.xlu0 %2970  ;;  %1854 = vmatmul.mubr.bf16.gmra.mrb[20].mxu0 %v1270_v9 }
 0x22d   : > { %v2973_v6 = vunpack.i.h.bf16 %v2971_v28  ;;  %v2972_v36 = vunpack.i.l.bf16 %v2971_v28 }
 0x22e   : > { %v2996_v47 = vpop.permute.xlu1 %2995 }
 0x22f   : > { %v1224_v41 = vsel %vm994_vm2, %v4596_v30, %v2972_v36  ;;  %v1225_v54 = vsel %vm994_vm2, %v4582_v31, %v2973_v6  ;;  %v2998_v27 = vunpack.i.h.bf16 %v2996_v47  ;;  %v2997_v22 = vunpack.i.l.bf16 %v2996_v47 }
 0x230   : > { %v2986_v21 = vpop.permute.xlu0 %2985  ;;  %v1273_v40 = vpack.c.bf16 %v1225_v54, %v1224_v41  ;;  %v1008_v5 = vsel %vm994_vm2, %v2973_v6, %v2983_v63  ;;  %v1007_v1 = vsel %vm994_vm2, %v2972_v36, %v2982_v60  ;;  %v5281_v31 = vpack.c.bf16 %v4628_v16, %v4632_v62 }
 0x231   : > { %v2988_v2 = vunpack.i.h.bf16 %v2986_v21  ;;  %v2987_v12 = vunpack.i.l.bf16 %v2986_v21  ;;  %v1171_v23 = vsel %vm1157_vm3, %v2997_v22, %v2998_v27  ;;  %v1243_v42 = vsel %vm1157_vm3, %v1008_v5, %v2997_v22  ;;  %v1338_v5 = vld [vmem:[#allocation11] sm:$0x3] }
 0x232   : > { %1740 = vmatprep.mubr.bf16.mxu1 %v1273_v40  ;;  %v3001_v43 = vpop.permute.xlu1 %3000 }
 0x233   : > { %v1170_v30 = vsel %vm1157_vm3, %v2987_v12, %v2988_v2  ;;  %1741 = vmatmul.mubr.bf16.gmra.mrb[24].mxu1 %v5281_v31  ;;  %v1242_v29 = vsel %vm1157_vm3, %v1007_v1, %v2987_v12  ;;  %v3003_v33 = vunpack.i.h.bf16 %v3001_v43  ;;  %v3002_v61 = vunpack.i.l.bf16 %v3001_v43 }
 0x234   : > { %v1275_v49 = vpack.c.bf16 %v1171_v23, %v1170_v30  ;;  %v2991_v8 = vpop.permute.xlu0 %2990  ;;  %v1274_v50 = vpack.c.bf16 %v1243_v42, %v1242_v29  ;;  %v4858_v2 = vrot.slane %v1338_v5, %v3823_v19  ;;  %v4861_v1 = vrot.slane %v1338_v5, %v3826_v20 }
 0x235   : > { %v2993_v52 = vunpack.i.h.bf16 %v2991_v8  ;;  %v2992_v39 = vunpack.i.l.bf16 %v2991_v8 }
 0x236   : > { %2607 = vmatprep.mubr.msk.bf16.mxu0 %vm1620_vm4, %v1275_v49  ;;  %v3016_v34 = vpop.permute.xlu1 %3015 }
 0x237   : > { %1864 = vmatmul.mubr.bf16.gmra.mrb[24].mxu0 %v1274_v50  ;;  %v1226_v45 = vsel %vm994_vm2, %v4622_v7, %v2992_v39  ;;  %v1227_v62 = vsel %vm994_vm2, %v4614_v11, %v2993_v52  ;;  %v3018_v16 = vunpack.i.h.bf16 %v3016_v34  ;;  %v3017_v51 = vunpack.i.l.bf16 %v3016_v34 }
 0x238   : > { %v3006_v55 = vpop.permute.xlu0 %3005  ;;  %v1277_v3 = vpack.c.bf16 %v1227_v62, %v1226_v45  ;;  %v1010_v48 = vsel %vm994_vm2, %v2993_v52, %v3003_v33  ;;  %v1009_v56 = vsel %vm994_vm2, %v2992_v39, %v3002_v61 }
 0x239   : > { %v3008_v14 = vunpack.i.h.bf16 %v3006_v55  ;;  %v3007_v57 = vunpack.i.l.bf16 %v3006_v55  ;;  %v1173_v38 = vsel %vm1157_vm3, %v3017_v51, %v3018_v16  ;;  %v1245_v26 = vsel %vm1157_vm3, %v1010_v48, %v3017_v51 }
 0x23a   : > { %1750 = vmatprep.mubr.bf16.mxu1 %v1277_v3  ;;  %v3021_v11 = vpop.permute.xlu1 %3020 }
 0x23b   : > { %v1172_v7 = vsel %vm1157_vm3, %v3007_v57, %v3008_v14  ;;  %1751 = vmatmul.mubr.bf16.gmra.mrb[28].mxu1 %v1276_v46  ;;  %v1244_v25 = vsel %vm1157_vm3, %v1009_v56, %v3007_v57  ;;  %v3023_v4 = vunpack.i.h.bf16 %v3021_v11  ;;  %v3022_v24 = vunpack.i.l.bf16 %v3021_v11 }
 0x23c   : > { %v1279_v53 = vpack.c.bf16 %v1173_v38, %v1172_v7  ;;  %v3011_v44 = vpop.permute.xlu0 %3010  ;;  %v1278_v0 = vpack.c.bf16 %v1245_v26, %v1244_v25  ;;  %v5285_v26 = vld [vmem:[#allocation26_spill] sm:$0xff] }
 0x23d   : > { %v3013_v35 = vunpack.i.h.bf16 %v3011_v44  ;;  %v3012_v58 = vunpack.i.l.bf16 %v3011_v44 }
 0x23e   : > { %2608 = vmatprep.mubr.msk.bf16.mxu0 %vm1620_vm4, %v1279_v53  ;;  %v3031_v28 = vpop.permute.xlu1 %3030 }
 0x23f   : > { %1874 = vmatmul.mubr.bf16.gmra.mrb[28].mxu0 %v1278_v0  ;;  %v1228_v9 = vsel %vm994_vm2, %v4656_v32, %v3012_v58  ;;  %v1229_v17 = vsel %vm994_vm2, %v4648_v59, %v3013_v35  ;;  %v3033_v13 = vunpack.i.h.bf16 %v3031_v28  ;;  %v3032_v46 = vunpack.i.l.bf16 %v3031_v28 }
 0x240   : > { %v3026_v63 = vpop.permute.xlu0 %3025  ;;  %v1281_v6 = vpack.c.bf16 %v1229_v17, %v1228_v9  ;;  %v1012_v36 = vsel %vm994_vm2, %v3013_v35, %v3023_v4  ;;  %v1011_v41 = vsel %vm994_vm2, %v3012_v58, %v3022_v24  ;;  %v5282_v59 = vpack.c.bf16 %v4681_v37, %v4685_v10 }
 0x241   : > { %v3028_v60 = vunpack.i.h.bf16 %v3026_v63  ;;  %v3027_v47 = vunpack.i.l.bf16 %v3026_v63  ;;  %v1175_v54 = vsel %vm1157_vm3, %v3032_v46, %v3033_v13  ;;  %v1247_v27 = vsel %vm1157_vm3, %v1012_v36, %v3032_v46 }
 0x242   : > { %1760 = vmatprep.mubr.bf16.mxu1 %v1281_v6 }
 0x243   : > { %v1174_v32 = vsel %vm1157_vm3, %v3027_v47, %v3028_v60  ;;  %1761 = vmatmul.mubr.bf16.gmra.mrb[32].mxu1 %v5282_v59  ;;  %v1246_v22 = vsel %vm1157_vm3, %v1011_v41, %v3027_v47 }
 0x244   : > { %v1283_v21 = vpack.c.bf16 %v1175_v54, %v1174_v32  ;;  %v1282_v40 = vpack.c.bf16 %v1247_v27, %v1246_v22 }
 0x246   : > { %2609 = vmatprep.mubr.msk.bf16.mxu0 %vm1620_vm4, %v1283_v21 }
 0x247   : > { %1884 = vmatmul.mubr.bf16.gmra.mrb[32].mxu0 %v1282_v40 }
 0x2cd   : > { %v1682_v12 = vpop.f32.mrb[0].mxu1 }
 0x2ce   : > { %v1684_v23 = vpop.f32.mrb[1].mxu1  ;;  %v1683_v37 = vadd.f32 %v1682_v12, %v4858_v2  ;;  %v5286_v12 = vld [vmem:[#allocation24_spill] sm:$0xff] }
 0x2cf   : > { %v1686_v42 = vpop.f32.mrb[2].mxu1  ;;  %v1685_v30 = vadd.f32 %v1684_v23, %v4861_v1 }
 0x2d0   : > { %v1688_v10 = vpop.f32.mrb[3].mxu1  ;;  %v1687_v43 = vadd.f32 %v1686_v42, %v4858_v2 }
 0x2d1   : > { %v1805_v31 = vpop.f32.mrb[0].mxu0  ;;  %v1689_v8 = vadd.f32 %v1688_v10, %v4861_v1 }
 0x2d2   : > { %v1806_v29 = vadd.f32 %v1805_v31, %v1683_v37  ;;  %v1807_v49 = vpop.f32.mrb[1].mxu0 }
 0x2d3   : > { %v1808_v50 = vadd.f32 %v1807_v49, %v1685_v30  ;;  %v1809_v33 = vpop.f32.mrb[2].mxu0 }
 0x2d4   : > { %v1894_v52 = vmax.f32 %v1806_v29, 0.0  ;;  %v1810_v39 = vadd.f32 %v1809_v33, %v1687_v43  ;;  %v1811_v61 = vpop.f32.mrb[3].mxu0  ;;  %v5287_v33 = vld [vmem:[#allocation25_spill] sm:$0xff] }
 0x2d5   : > { %v1895_v34 = vmax.f32 %v1808_v50, 0.0  ;;  %v1812_v45 = vadd.f32 %v1811_v61, %v1689_v8  ;;  %v1692_v62 = vpop.f32.mrb[4].mxu1 }
 0x2d6   : > { %v2059_v16 = vmul.f32 %v1894_v52, %v3953_v15  ;;  %v1896_v55 = vmax.f32 %v1810_v39, 0.0  ;;  %v1694_v3 = vpop.f32.mrb[5].mxu1  ;;  %v1693_v11 = vadd.f32 %v1692_v62, %v4858_v2 }
 0x2d7   : > { %v2639_v48 = vpack.c.bf16 %v1895_v34, %v1894_v52  ;;  %v2060_v14 = vmul.f32 %v1895_v34, %v3953_v15  ;;  %v1897_v57 = vmax.f32 %v1812_v45, 0.0  ;;  %v1696_v56 = vpop.f32.mrb[6].mxu1  ;;  %v1695_v25 = vadd.f32 %v1694_v3, %v4861_v1 }
 0x2d8   : > { %v2197_v38 = vmul.f32 %v2059_v16, %v1894_v52  ;;  %v2061_v7 = vmul.f32 %v1896_v55, %v5285_v26  ;;  %v1698_v53 = vpop.f32.mrb[7].mxu1  ;;  %v1697_v4 = vadd.f32 %v1696_v56, %v4858_v2 }
 0x2d9   : > { %2041 = vst.msk [vmem:[%s4877_s20] sm:$0xff] %vm4868_vm7, %v2639_v48  ;;  %v2198_v44 = vmul.f32 %v2060_v14, %v1895_v34  ;;  %v2640_v0 = vpack.c.bf16 %v1897_v57, %v1896_v55  ;;  %v2062_v15 = vmul.f32 %v1897_v57, %v5285_v26  ;;  %v1815_v35 = vpop.f32.mrb[4].mxu0  ;;  %v2119_v58 = vsel %vm994_vm2, %v2060_v14, 0.0 }
 0x2da   : > { %v2096_v24 = vadd.f32 %v2061_v7, %v2059_v16  ;;  %v2199_v28 = vmul.f32 %v2061_v7, %v1896_v55  ;;  %v1816_v9 = vadd.f32 %v1815_v35, %v1693_v11  ;;  %v1817_v17 = vpop.f32.mrb[5].mxu0  ;;  %v1699_v63 = vadd.f32 %v1698_v53, %v4861_v1 }
 0x2db   : > { %2042 = vst.msk [vmem:[%s4877_s20 + $0x8] sm:$0xff] %vm4868_vm7, %v2640_v0  ;;  %v2120_v13 = vsel %vm994_vm2, %v2062_v15, 0.0  ;;  %v2200_v46 = vmul.f32 %v2062_v15, %v1897_v57  ;;  %v1818_v6 = vadd.f32 %v1817_v17, %v1695_v25  ;;  %v1819_v36 = vpop.f32.mrb[6].mxu0  ;;  %v2256_v32 = vsel %vm994_vm2, %v2198_v44, 0.0 }
 0x2dc   : > { %v2233_v60 = vadd.f32 %v2199_v28, %v2197_v38  ;;  %v2121_v47 = vadd.f32 %v2120_v13, %v2119_v58  ;;  %v1898_v41 = vmax.f32 %v1816_v9, 0.0  ;;  %v1820_v54 = vadd.f32 %v1819_v36, %v1697_v4  ;;  %v1821_v27 = vpop.f32.mrb[7].mxu0 }
 0x2dd   : > { %v2257_v59 = vsel %vm994_vm2, %v2200_v46, 0.0  ;;  %v1899_v22 = vmax.f32 %v1818_v6, 0.0  ;;  %v1822_v21 = vadd.f32 %v1821_v27, %v1699_v63  ;;  %v1702_v40 = vpop.f32.mrb[8].mxu1 }
 0x2de   : > { %v2258_v5 = vadd.f32 %v2257_v59, %v2256_v32  ;;  %v2063_v23 = vmul.f32 %v1898_v41, %v5286_v12  ;;  %v1900_v42 = vmax.f32 %v1820_v54, 0.0  ;;  %v1703_v37 = vadd.f32 %v1702_v40, %v4858_v2  ;;  %v1704_v10 = vpop.f32.mrb[9].mxu1  ;;  %v5289_v40 = vld [vmem:[#allocation27_spill] sm:$0xff] }
 0x2df   : > { %v2641_v30 = vpack.c.bf16 %v1899_v22, %v1898_v41  ;;  %v2064_v31 = vmul.f32 %v1899_v22, %v5286_v12  ;;  %v1901_v43 = vmax.f32 %v1822_v21, 0.0  ;;  %v1705_v29 = vadd.f32 %v1704_v10, %v4861_v1  ;;  %v1706_v49 = vpop.f32.mrb[10].mxu1 }
 0x2e0   : > { %v2097_v8 = vadd.f32 %v2096_v24, %v2063_v23  ;;  %v2201_v50 = vmul.f32 %v2063_v23, %v1898_v41  ;;  %v2065_v52 = vmul.f32 %v1900_v42, %v5287_v33  ;;  %v1707_v39 = vadd.f32 %v1706_v49, %v4858_v2  ;;  %v1708_v61 = vpop.f32.mrb[11].mxu1 }
 0x2e1   : > { %2043 = vst.msk [vmem:[%s4877_s20 + $0x10] sm:$0xff] %vm4868_vm7, %v2641_v30  ;;  %v2122_v34 = vsel %vm994_vm2, %v2064_v31, 0.0  ;;  %v2202_v45 = vmul.f32 %v2064_v31, %v1899_v22  ;;  %v2642_v62 = vpack.c.bf16 %v1901_v43, %v1900_v42  ;;  %v2066_v16 = vmul.f32 %v1901_v43, %v5287_v33  ;;  %v1825_v55 = vpop.f32.mrb[8].mxu0 }
 0x2e2   : > { %v2234_v3 = vadd.f32 %v2233_v60, %v2201_v50  ;;  %v2123_v48 = vadd.f32 %v2122_v34, %v2121_v47  ;;  %v2098_v14 = vadd.f32 %v2097_v8, %v2065_v52  ;;  %v2203_v57 = vmul.f32 %v2065_v52, %v1900_v42  ;;  %v1827_v56 = vpop.f32.mrb[9].mxu0  ;;  %v5288_v47 = vld [vmem:[#allocation28_spill] sm:$0xff] }
 0x2e3   : > { %v2259_v38 = vsel %vm994_vm2, %v2202_v45, 0.0  ;;  %2044 = vst.msk [vmem:[%s4877_s20 + $0x18] sm:$0xff] %vm4868_vm7, %v2642_v62  ;;  %v2124_v26 = vsel %vm994_vm2, %v2066_v16, 0.0  ;;  %v2204_v7 = vmul.f32 %v2066_v16, %v1901_v43  ;;  %v1709_v11 = vadd.f32 %v1708_v61, %v4861_v1  ;;  %v1829_v25 = vpop.f32.mrb[10].mxu0 }
 0x2e4   : > { %v2260_v53 = vadd.f32 %v2259_v38, %v2258_v5  ;;  %v2235_v44 = vadd.f32 %v2234_v3, %v2203_v57  ;;  %v2125_v0 = vadd.f32 %v2124_v26, %v2123_v48  ;;  %v1826_v15 = vadd.f32 %v1825_v55, %v1703_v37  ;;  %v1831_v4 = vpop.f32.mrb[11].mxu0 }
 0x2e5   : > { %v2261_v35 = vsel %vm994_vm2, %v2204_v7, 0.0  ;;  %v1828_v58 = vadd.f32 %v1827_v56, %v1705_v29  ;;  %v1830_v24 = vadd.f32 %v1829_v25, %v1707_v39  ;;  %v1832_v28 = vadd.f32 %v1831_v4, %v1709_v11  ;;  %v1712_v9 = vpop.f32.mrb[12].mxu1  ;;  %v5290_v7 = vld [vmem:[#allocation30_spill] sm:$0xff] }
 0x2e6   : > { %v2262_v17 = vadd.f32 %v2261_v35, %v2260_v53  ;;  %v1902_v13 = vmax.f32 %v1826_v15, 0.0  ;;  %v1714_v46 = vpop.f32.mrb[13].mxu1  ;;  %v1713_v54 = vadd.f32 %v1712_v9, %v4858_v2 }
 0x2e7   : > { %v1903_v63 = vmax.f32 %v1828_v58, 0.0  ;;  %v1904_v6 = vmax.f32 %v1830_v24, 0.0  ;;  %v1905_v36 = vmax.f32 %v1832_v28, 0.0  ;;  %v1716_v60 = vpop.f32.mrb[14].mxu1  ;;  %v1715_v27 = vadd.f32 %v1714_v46, %v4861_v1  ;;  %v5291_v46 = vld [vmem:[#allocation29_spill] sm:$0xff] }
 0x2e8   : > { %v2067_v41 = vmul.f32 %v1902_v13, %v5288_v47  ;;  %v1717_v32 = vadd.f32 %v1716_v60, %v4858_v2  ;;  %v1718_v59 = vpop.f32.mrb[15].mxu1 }
 0x2e9   : > { %v2643_v22 = vpack.c.bf16 %v1903_v63, %v1902_v13  ;;  %v2068_v21 = vmul.f32 %v1903_v63, %v5288_v47  ;;  %v2069_v5 = vmul.f32 %v1904_v6, %v5289_v40  ;;  %v2644_v12 = vpack.c.bf16 %v1905_v36, %v1904_v6  ;;  %v1835_v23 = vpop.f32.mrb[12].mxu0 }
 0x2ea   : > { %v2099_v42 = vadd.f32 %v2098_v14, %v2067_v41  ;;  %v2205_v37 = vmul.f32 %v2067_v41, %v1902_v13  ;;  %v2070_v10 = vmul.f32 %v1905_v36, %v5289_v40  ;;  %v1719_v30 = vadd.f32 %v1718_v59, %v4861_v1  ;;  %v1837_v31 = vpop.f32.mrb[13].mxu0 }
 0x2eb   : > { %2045 = vst.msk [vmem:[%s4877_s20 + $0x20] sm:$0xff] %vm4868_vm7, %v2643_v22  ;;  %v2126_v43 = vsel %vm994_vm2, %v2068_v21, 0.0  ;;  %v2206_v29 = vmul.f32 %v2068_v21, %v1903_v63  ;;  %v2207_v49 = vmul.f32 %v2069_v5, %v1904_v6  ;;  %2046 = vst.msk [vmem:[%s4877_s20 + $0x28] sm:$0xff] %vm4868_vm7, %v2644_v12  ;;  %v1836_v8 = vadd.f32 %v1835_v23, %v1713_v54  ;;  %v1839_v50 = vpop.f32.mrb[14].mxu0 }
 0x2ec   : > { %v2236_v33 = vadd.f32 %v2235_v44, %v2205_v37  ;;  %v2127_v52 = vadd.f32 %v2126_v43, %v2125_v0  ;;  %v2100_v39 = vadd.f32 %v2099_v42, %v2069_v5  ;;  %v2128_v61 = vsel %vm994_vm2, %v2070_v10, 0.0  ;;  %v1841_v34 = vpop.f32.mrb[15].mxu0 }
 0x2ed   : > { %v2263_v45 = vsel %vm994_vm2, %v2206_v29, 0.0  ;;  %v2208_v62 = vmul.f32 %v2070_v10, %v1905_v36  ;;  %v1906_v16 = vmax.f32 %v1836_v8, 0.0  ;;  %v1838_v55 = vadd.f32 %v1837_v31, %v1715_v27  ;;  %v1722_v3 = vpop.f32.mrb[16].mxu1 }
 0x2ee   : > { %v2264_v48 = vadd.f32 %v2263_v45, %v2262_v17  ;;  %v2237_v14 = vadd.f32 %v2236_v33, %v2207_v49  ;;  %v2129_v57 = vadd.f32 %v2128_v61, %v2127_v52  ;;  %v1840_v56 = vadd.f32 %v1839_v50, %v1717_v32  ;;  %v1724_v38 = vpop.f32.mrb[17].mxu1  ;;  %v5292_v52 = vld [vmem:[#allocation32_spill] sm:$0xff] }
 0x2ef   : > { %v2265_v26 = vsel %vm994_vm2, %v2208_v62, 0.0  ;;  %v2071_v11 = vmul.f32 %v1906_v16, %v5290_v7  ;;  %v1907_v25 = vmax.f32 %v1838_v55, 0.0  ;;  %v1842_v53 = vadd.f32 %v1841_v34, %v1719_v30  ;;  %v1726_v44 = vpop.f32.mrb[18].mxu1 }
 0x2f0   : > { %v2266_v0 = vadd.f32 %v2265_v26, %v2264_v48  ;;  %v1908_v15 = vmax.f32 %v1840_v56, 0.0  ;;  %v1723_v4 = vadd.f32 %v1722_v3, %v4858_v2  ;;  %v1725_v35 = vadd.f32 %v1724_v38, %v4861_v1  ;;  %v1728_v58 = vpop.f32.mrb[19].mxu1 }
 0x2f1   : > { %v2101_v24 = vadd.f32 %v2100_v39, %v2071_v11  ;;  %v2209_v28 = vmul.f32 %v2071_v11, %v1906_v16  ;;  %v2645_v9 = vpack.c.bf16 %v1907_v25, %v1906_v16  ;;  %v2072_v17 = vmul.f32 %v1907_v25, %v5290_v7  ;;  %v1845_v13 = vpop.f32.mrb[16].mxu0  ;;  %v5293_v11 = vld [vmem:[#allocation31_spill] sm:$0xff] }
 0x2f2   : > { %v2073_v63 = vmul.f32 %v1908_v15, %v5291_v46  ;;  %v1909_v6 = vmax.f32 %v1842_v53, 0.0  ;;  %v1727_v36 = vadd.f32 %v1726_v44, %v4858_v2  ;;  %v1729_v60 = vadd.f32 %v1728_v58, %v4861_v1  ;;  %v1847_v47 = vpop.f32.mrb[17].mxu0 }
 0x2f3   : > { %v2238_v41 = vadd.f32 %v2237_v14, %v2209_v28  ;;  %2047 = vst.msk [vmem:[%s4877_s20 + $0x30] sm:$0xff] %vm4868_vm7, %v2645_v9  ;;  %v2130_v54 = vsel %vm994_vm2, %v2072_v17, 0.0  ;;  %v2210_v27 = vmul.f32 %v2072_v17, %v1907_v25  ;;  %v1846_v32 = vadd.f32 %v1845_v13, %v1723_v4  ;;  %v1849_v59 = vpop.f32.mrb[18].mxu0 }
 0x2f4   : > { %v2131_v22 = vadd.f32 %v2130_v54, %v2129_v57  ;;  %v2102_v21 = vadd.f32 %v2101_v24, %v2073_v63  ;;  %v2211_v40 = vmul.f32 %v2073_v63, %v1908_v15  ;;  %v2646_v5 = vpack.c.bf16 %v1909_v6, %v1908_v15  ;;  %v1851_v12 = vpop.f32.mrb[19].mxu0 }
 0x2f5   : > { %v2267_v23 = vsel %vm994_vm2, %v2210_v27, 0.0  ;;  %v2074_v42 = vmul.f32 %v1909_v6, %v5291_v46  ;;  %v1910_v37 = vmax.f32 %v1846_v32, 0.0  ;;  %v1848_v10 = vadd.f32 %v1847_v47, %v1725_v35 }
 0x2f6   : > { %v2268_v31 = vadd.f32 %v2267_v23, %v2266_v0  ;;  %v2239_v43 = vadd.f32 %v2238_v41, %v2211_v40  ;;  %2048 = vst.msk [vmem:[%s4877_s20 + $0x38] sm:$0xff] %vm4868_vm7, %v2646_v5  ;;  %v1850_v29 = vadd.f32 %v1849_v59, %v1727_v36  ;;  %v1852_v49 = vadd.f32 %v1851_v12, %v1729_v60 }
 0x2f7   : > { %v2132_v50 = vsel %vm994_vm2, %v2074_v42, 0.0  ;;  %v2212_v33 = vmul.f32 %v2074_v42, %v1909_v6  ;;  %v2075_v39 = vmul.f32 %v1910_v37, %v5292_v52  ;;  %v1911_v61 = vmax.f32 %v1848_v10, 0.0 }
 0x2f8   : > { %v2133_v45 = vadd.f32 %v2132_v50, %v2131_v22  ;;  %v1912_v62 = vmax.f32 %v1850_v29, 0.0  ;;  %v1913_v16 = vmax.f32 %v1852_v49, 0.0 }
 0x2f9   : > { %v1732_v30 = vpop.f32.mrb[20].mxu1  ;;  %v2269_v48 = vsel %vm994_vm2, %v2212_v33, 0.0  ;;  %v2103_v14 = vadd.f32 %v2102_v21, %v2075_v39  ;;  %v2213_v57 = vmul.f32 %v2075_v39, %v1910_v37  ;;  %v2647_v56 = vpack.c.bf16 %v1911_v61, %v1910_v37 }
 0x2fa   : > { %v1734_v8 = vpop.f32.mrb[21].mxu1  ;;  %v1733_v55 = vadd.f32 %v1732_v30, %v4858_v2  ;;  %v2270_v26 = vadd.f32 %v2269_v48, %v2268_v31  ;;  %v2076_v7 = vmul.f32 %v1911_v61, %v5292_v52  ;;  %v2077_v25 = vmul.f32 %v1912_v62, %v5293_v11 }
 0x2fb   : > { %v1736_v34 = vpop.f32.mrb[22].mxu1  ;;  %v2648_v53 = vpack.c.bf16 %v1913_v16, %v1912_v62  ;;  %v2240_v0 = vadd.f32 %v2239_v43, %v2213_v57  ;;  %2049 = vst.msk [vmem:[%s4877_s20 + $0x40] sm:$0xff] %vm4868_vm7, %v2647_v56  ;;  %v2078_v15 = vmul.f32 %v1913_v16, %v5293_v11  ;;  %v1735_v4 = vadd.f32 %v1734_v8, %v4861_v1  ;;  %v5294_v8 = vld [vmem:[#allocation34_spill] sm:$0xff] }
 0x2fc   : > { %v1738_v3 = vpop.f32.mrb[23].mxu1  ;;  %v1737_v35 = vadd.f32 %v1736_v34, %v4858_v2  ;;  %v2134_v24 = vsel %vm994_vm2, %v2076_v7, 0.0  ;;  %v2214_v28 = vmul.f32 %v2076_v7, %v1911_v61  ;;  %v2104_v9 = vadd.f32 %v2103_v14, %v2077_v25  ;;  %v5295_v34 = vld [vmem:[#allocation33_spill] sm:$0xff] }
 0x2fd   : > { %v2215_v17 = vmul.f32 %v2077_v25, %v1912_v62  ;;  %2050 = vst.msk [vmem:[%s4877_s20 + $0x48] sm:$0xff] %vm4868_vm7, %v2648_v53  ;;  %v2135_v46 = vadd.f32 %v2134_v24, %v2133_v45  ;;  %v2136_v63 = vsel %vm994_vm2, %v2078_v15, 0.0  ;;  %v2216_v6 = vmul.f32 %v2078_v15, %v1913_v16 }
 0x2fe   : > { %v1739_v36 = vadd.f32 %v1738_v3, %v4861_v1  ;;  %v2271_v47 = vsel %vm994_vm2, %v2214_v28, 0.0 }
 0x2ff   : > { %v1855_v38 = vpop.f32.mrb[20].mxu0  ;;  %v2241_v41 = vadd.f32 %v2240_v0, %v2215_v17  ;;  %v2272_v59 = vadd.f32 %v2271_v47, %v2270_v26  ;;  %v2137_v22 = vadd.f32 %v2136_v63, %v2135_v46  ;;  %v2273_v21 = vsel %vm994_vm2, %v2216_v6, 0.0  ;;  %v5296_v63 = vld [vmem:[#allocation36_spill] sm:$0xff] }
 0x300   : > { %v1857_v44 = vpop.f32.mrb[21].mxu0  ;;  %v1856_v54 = vadd.f32 %v1855_v38, %v1733_v55 }
 0x301   : > { %v1859_v58 = vpop.f32.mrb[22].mxu0  ;;  %v1858_v27 = vadd.f32 %v1857_v44, %v1735_v4  ;;  %v2274_v30 = vadd.f32 %v2273_v21, %v2272_v59 }
 0x302   : > { %v1861_v13 = vpop.f32.mrb[23].mxu0  ;;  %v1860_v40 = vadd.f32 %v1859_v58, %v1737_v35  ;;  %v1914_v12 = vmax.f32 %v1856_v54, 0.0 }
 0x303   : > { %v1915_v23 = vmax.f32 %v1858_v27, 0.0  ;;  %v1862_v42 = vadd.f32 %v1861_v13, %v1739_v36 }
 0x304   : > { %v1916_v31 = vmax.f32 %v1860_v40, 0.0  ;;  %v2079_v50 = vmul.f32 %v1914_v12, %v5294_v8 }
 0x305   : > { %v2649_v33 = vpack.c.bf16 %v1915_v23, %v1914_v12  ;;  %v2080_v52 = vmul.f32 %v1915_v23, %v5294_v8  ;;  %v1917_v39 = vmax.f32 %v1862_v42, 0.0 }
 0x306   : > { %v1742_v60 = vpop.f32.mrb[24].mxu1  ;;  %v2081_v45 = vmul.f32 %v1916_v31, %v5295_v34  ;;  %v2105_v48 = vadd.f32 %v2104_v9, %v2079_v50  ;;  %v2217_v14 = vmul.f32 %v2079_v50, %v1914_v12 }
 0x307   : > { %v1744_v32 = vpop.f32.mrb[25].mxu1  ;;  %v1743_v37 = vadd.f32 %v1742_v60, %v4858_v2  ;;  %2051 = vst.msk [vmem:[%s4877_s20 + $0x50] sm:$0xff] %vm4868_vm7, %v2649_v33  ;;  %v2138_v57 = vsel %vm994_vm2, %v2080_v52, 0.0  ;;  %v2218_v56 = vmul.f32 %v2080_v52, %v1915_v23  ;;  %v2650_v11 = vpack.c.bf16 %v1917_v39, %v1916_v31 }
 0x308   : > { %v1746_v5 = vpop.f32.mrb[26].mxu1  ;;  %v1745_v43 = vadd.f32 %v1744_v32, %v4861_v1  ;;  %v2139_v26 = vadd.f32 %v2138_v57, %v2137_v22  ;;  %v2219_v7 = vmul.f32 %v2081_v45, %v1916_v31  ;;  %v2082_v25 = vmul.f32 %v1917_v39, %v5295_v34 }
 0x309   : > { %v1748_v10 = vpop.f32.mrb[27].mxu1  ;;  %v1747_v29 = vadd.f32 %v1746_v5, %v4858_v2  ;;  %v2242_v44 = vadd.f32 %v2241_v41, %v2217_v14  ;;  %v2275_v0 = vsel %vm994_vm2, %v2218_v56, 0.0  ;;  %v2106_v15 = vadd.f32 %v2105_v48, %v2081_v45  ;;  %2052 = vst.msk [vmem:[%s4877_s20 + $0x58] sm:$0xff] %vm4868_vm7, %v2650_v11 }
 0x30a   : > { %v1865_v49 = vpop.f32.mrb[24].mxu0  ;;  %v1749_v62 = vadd.f32 %v1748_v10, %v4861_v1  ;;  %v2276_v58 = vadd.f32 %v2275_v0, %v2274_v30  ;;  %v2140_v24 = vsel %vm994_vm2, %v2082_v25, 0.0  ;;  %v2220_v28 = vmul.f32 %v2082_v25, %v1917_v39 }
 0x30b   : > { %v1867_v61 = vpop.f32.mrb[25].mxu0  ;;  %v1866_v16 = vadd.f32 %v1865_v49, %v1743_v37  ;;  %v2243_v13 = vadd.f32 %v2242_v44, %v2219_v7  ;;  %v2141_v46 = vadd.f32 %v2140_v24, %v2139_v26 }
 0x30c   : > { %v1868_v55 = vadd.f32 %v1867_v61, %v1745_v43  ;;  %v1869_v3 = vpop.f32.mrb[26].mxu0  ;;  %v2277_v47 = vsel %vm994_vm2, %v2220_v28, 0.0  ;;  %v5297_v43 = vld [vmem:[#allocation35_spill] sm:$0xff] }
 0x30d   : > { %v1871_v38 = vpop.f32.mrb[27].mxu0  ;;  %v1918_v4 = vmax.f32 %v1866_v16, 0.0  ;;  %v1870_v36 = vadd.f32 %v1869_v3, %v1747_v29  ;;  %v2278_v59 = vadd.f32 %v2277_v47, %v2276_v58 }
 0x30e   : > { %v1752_v53 = vpop.f32.mrb[28].mxu1  ;;  %v1919_v9 = vmax.f32 %v1868_v55, 0.0  ;;  %v1872_v27 = vadd.f32 %v1871_v38, %v1749_v62 }
 0x30f   : > { %v1754_v35 = vpop.f32.mrb[29].mxu1  ;;  %v2083_v6 = vmul.f32 %v1918_v4, %v5296_v63  ;;  %v1920_v40 = vmax.f32 %v1870_v36, 0.0  ;;  %v1753_v37 = vadd.f32 %v1752_v53, %v4858_v2 }
 0x310   : > { %v1756_v17 = vpop.f32.mrb[30].mxu1  ;;  %v2651_v41 = vpack.c.bf16 %v1919_v9, %v1918_v4  ;;  %v2084_v54 = vmul.f32 %v1919_v9, %v5296_v63  ;;  %v1921_v42 = vmax.f32 %v1872_v27, 0.0  ;;  %v1755_v49 = vadd.f32 %v1754_v35, %v4861_v1 }
 0x311   : > { %v1758_v60 = vpop.f32.mrb[31].mxu1  ;;  %v2107_v22 = vadd.f32 %v2106_v15, %v2083_v6  ;;  %v2221_v21 = vmul.f32 %v2083_v6, %v1918_v4  ;;  %v2085_v29 = vmul.f32 %v1920_v40, %v5297_v43  ;;  %v1757_v39 = vadd.f32 %v1756_v17, %v4858_v2  ;;  %v5298_v17 = vld [vmem:[#allocation38_spill] sm:$0xff] }
 0x312   : > { %v1875_v32 = vpop.f32.mrb[28].mxu0  ;;  %2053 = vst.msk [vmem:[%s4877_s20 + $0x60] sm:$0xff] %vm4868_vm7, %v2651_v41  ;;  %v2142_v12 = vsel %vm994_vm2, %v2084_v54, 0.0  ;;  %v2222_v23 = vmul.f32 %v2084_v54, %v1919_v9  ;;  %v2652_v33 = vpack.c.bf16 %v1921_v42, %v1920_v40  ;;  %v2086_v52 = vmul.f32 %v1921_v42, %v5297_v43 }
 0x313   : > { %v1877_v5 = vpop.f32.mrb[29].mxu0  ;;  %v2244_v30 = vadd.f32 %v2243_v13, %v2221_v21  ;;  %v2143_v31 = vadd.f32 %v2142_v12, %v2141_v46  ;;  %v2108_v45 = vadd.f32 %v2107_v22, %v2085_v29  ;;  %v2223_v62 = vmul.f32 %v2085_v29, %v1920_v40 }
 0x314   : > { %v1879_v10 = vpop.f32.mrb[30].mxu0  ;;  %v2279_v50 = vsel %vm994_vm2, %v2222_v23, 0.0  ;;  %v1759_v16 = vadd.f32 %v1758_v60, %v4861_v1  ;;  %2054 = vst.msk [vmem:[%s4877_s20 + $0x68] sm:$0xff] %vm4868_vm7, %v2652_v33  ;;  %v2144_v3 = vsel %vm994_vm2, %v2086_v52, 0.0  ;;  %v2224_v48 = vmul.f32 %v2086_v52, %v1921_v42  ;;  %v5299_v60 = vld [vmem:[#allocation37_spill] sm:$0xff] }
 0x315   : > { %v1881_v8 = vpop.f32.mrb[31].mxu0  ;;  %v2280_v34 = vadd.f32 %v2279_v50, %v2278_v59  ;;  %v1876_v14 = vadd.f32 %v1875_v32, %v1753_v37  ;;  %v1878_v57 = vadd.f32 %v1877_v5, %v1755_v49  ;;  %v2245_v38 = vadd.f32 %v2244_v30, %v2223_v62 }
 0x316   : > { %v1762_v61 = vpop.f32.mrb[32].mxu1  ;;  %v2145_v26 = vadd.f32 %v2144_v3, %v2143_v31  ;;  %v1880_v7 = vadd.f32 %v1879_v10, %v1757_v39  ;;  %v1882_v11 = vadd.f32 %v1881_v8, %v1759_v16  ;;  %v2281_v53 = vsel %vm994_vm2, %v2224_v48, 0.0 }
 0x317   : > { %v1764_v55 = vpop.f32.mrb[33].mxu1  ;;  %v1922_v44 = vmax.f32 %v1876_v14, 0.0  ;;  %v1923_v0 = vmax.f32 %v1878_v57, 0.0  ;;  %v1763_v15 = vadd.f32 %v1762_v61, %v4858_v2  ;;  %v2282_v35 = vadd.f32 %v2281_v53, %v2280_v34  ;;  %v5300_v61 = vld [vmem:[#allocation39_spill] sm:$0xff]  ;;  %v5301_v14 = vld [vmem:[#allocation40_spill] sm:$0xff] }
 0x318   : > { %v1766_v56 = vpop.f32.mrb[34].mxu1  ;;  %v1924_v58 = vmax.f32 %v1880_v7, 0.0  ;;  %v1925_v24 = vmax.f32 %v1882_v11, 0.0  ;;  %v1765_v28 = vadd.f32 %v1764_v55, %v4861_v1 }
 0x319   : > { %v1768_v25 = vpop.f32.mrb[35].mxu1  ;;  %v2087_v13 = vmul.f32 %v1922_v44, %v5298_v17  ;;  %v2653_v46 = vpack.c.bf16 %v1923_v0, %v1922_v44  ;;  %v2088_v63 = vmul.f32 %v1923_v0, %v5298_v17  ;;  %v1767_v6 = vadd.f32 %v1766_v56, %v4858_v2 }
 0x31a   : > { %v1885_v4 = vpop.f32.mrb[32].mxu0  ;;  %v2089_v47 = vmul.f32 %v1924_v58, %v5299_v60  ;;  %v2654_v41 = vpack.c.bf16 %v1925_v24, %v1924_v58  ;;  %v2090_v54 = vmul.f32 %v1925_v24, %v5299_v60  ;;  %v1769_v27 = vadd.f32 %v1768_v25, %v4861_v1 }
 0x31b   : > { %v1887_v9 = vpop.f32.mrb[33].mxu0  ;;  %v2109_v59 = vadd.f32 %v2108_v45, %v2087_v13  ;;  %v2225_v22 = vmul.f32 %v2087_v13, %v1922_v44  ;;  %2055 = vst.msk [vmem:[%s4877_s20 + $0x70] sm:$0xff] %vm4868_vm7, %v2653_v46  ;;  %v2146_v21 = vsel %vm994_vm2, %v2088_v63, 0.0  ;;  %v2226_v40 = vmul.f32 %v2088_v63, %v1923_v0 }
 0x31c   : > { %v1889_v36 = vpop.f32.mrb[34].mxu0  ;;  %v2147_v5 = vadd.f32 %v2146_v21, %v2145_v26  ;;  %v2227_v2 = vmul.f32 %v2089_v47, %v1924_v58  ;;  %2056 = vst.msk [vmem:[%s4877_s20 + $0x78] sm:$0xff] %vm4868_vm7, %v2654_v41  ;;  %v2148_v12 = vsel %vm994_vm2, %v2090_v54, 0.0  ;;  %v2228_v23 = vmul.f32 %v2090_v54, %v1925_v24 }
 0x31d   : > { %v1891_v32 = vpop.f32.mrb[35].mxu0  ;;  %v2246_v1 = vadd.f32 %v2245_v38, %v2225_v22  ;;  %v2283_v42 = vsel %vm994_vm2, %v2226_v40, 0.0  ;;  %v2110_v37 = vadd.f32 %v2109_v59, %v2089_v47  ;;  %v1886_v10 = vadd.f32 %v1885_v4, %v1763_v15 }
 0x31e   : > { %v2284_v30 = vadd.f32 %v2283_v42, %v2282_v35  ;;  %v2149_v31 = vadd.f32 %v2148_v12, %v2147_v5  ;;  %v2285_v43 = vsel %vm994_vm2, %v2228_v23, 0.0  ;;  %v1888_v29 = vadd.f32 %v1887_v9, %v1765_v28 }
 0x31f   : > { %v2247_v49 = vadd.f32 %v2246_v1, %v2227_v2  ;;  %v1926_v8 = vmax.f32 %v1886_v10, 0.0  ;;  %v1890_v50 = vadd.f32 %v1889_v36, %v1767_v6  ;;  %v1892_v33 = vadd.f32 %v1891_v32, %v1769_v27 }
 0x320   : > { %v2286_v52 = vadd.f32 %v2285_v43, %v2284_v30  ;;  %v1927_v39 = vmax.f32 %v1888_v29, 0.0 }
 0x321   : > { %v2091_v34 = vmul.f32 %v1926_v8, %v5300_v61  ;;  %v1928_v45 = vmax.f32 %v1890_v50, 0.0  ;;  %v1929_v62 = vmax.f32 %v1892_v33, 0.0 }
 0x322   : > { %v2655_v16 = vpack.c.bf16 %v1927_v39, %v1926_v8  ;;  %v2092_v55 = vmul.f32 %v1927_v39, %v5300_v61 }
 0x323   : > { %v2111_v3 = vadd.f32 %v2110_v37, %v2091_v34  ;;  %v2229_v48 = vmul.f32 %v2091_v34, %v1926_v8  ;;  %v2093_v57 = vmul.f32 %v1928_v45, %v5301_v14  ;;  %v2656_v56 = vpack.c.bf16 %v1929_v62, %v1928_v45 }
 0x324   : > { %2057 = vst.msk [vmem:[%s4877_s20 + $0x80] sm:$0xff] %vm4868_vm7, %v2655_v16  ;;  %v2150_v38 = vsel %vm994_vm2, %v2092_v55, 0.0  ;;  %v2230_v26 = vmul.f32 %v2092_v55, %v1927_v39  ;;  %v2094_v7 = vmul.f32 %v1929_v62, %v5301_v14 }
 0x325   : > { %v2248_v11 = vadd.f32 %v2247_v49, %v2229_v48  ;;  %v2151_v25 = vadd.f32 %v2150_v38, %v2149_v31  ;;  %v2112_v53 = vadd.f32 %v2111_v3, %v2093_v57  ;;  %v2231_v44 = vmul.f32 %v2093_v57, %v1928_v45  ;;  %2058 = vst.msk [vmem:[%s4877_s20 + $0x88] sm:$0xff] %vm4868_vm7, %v2656_v56 }
 0x326   : > { %v2287_v0 = vsel %vm994_vm2, %v2230_v26, 0.0  ;;  %v2152_v15 = vsel %vm994_vm2, %v2094_v7, 0.0  ;;  %v2232_v4 = vmul.f32 %v2094_v7, %v1929_v62 }
 0x327   : > { %3328 = shalt.err (!%p3325_p8)
}
 0x328   : > { %s3329_s23 = scalar_lea.hbm %s5025_s0, 2304  ;;  %s3333_s1 = scalar_lea.hbm %s5125_s7, 4608 }
 0x329   : > { %p3330_p2 = scmp.ne.s32.totalorder %s5025_s0, %s3329_s23  ;;  %p3334_p7 = scmp.lt.u32.totalorder %s5025_s0, %s5125_s7 }
 0x32a   : > { %p3335_p4 = scmp.lt.u32.totalorder %s3333_s1, %s3329_s23  ;;  %p3337_p6 = scmp.lt.u32.totalorder %s3329_s23, %s5025_s0 }
 0x32b   : > { %p3331_p9 = pnand %p3330_p2, %p5302_p3 }
 0x32c   : > { %p3336_p1 = por %p3335_p4, %p3334_p7 }
 0x32d   : > { %p3332_p5 = pneg %p3331_p9 }
 0x32e   : > { %p3338_p11 = por %p3337_p6, %p3336_p1 }
 0x330   : > { %p3339_p0 = pnand %p3338_p11, %p3332_p5 }
 0x332   : > { %3342 = shalt.err (!%p3339_p0)
}
 0x333   : > { %s3444_s20 = smov 128   ;;  %s3445_s2 = smov 8   ;;  %v2288_v51 = vadd.f32 %v2287_v0, %v2286_v52  ;;  %v2113_v35 = vrot.slane %v2112_v53, 4  ;;  %v2249_v58 = vadd.f32 %v2248_v11, %v2231_v44  ;;  %v2153_v24 = vadd.f32 %v2152_v15, %v2151_v25  ;;  %v2095_v54 = vld [vmem:[#allocation13] sm:$0x3] }
 0x334   : > { %2761 = dma.vmem_to_hbm [thread:$0]  (%p5302_p3), %s5028_s13, 2304, %s5025_s0, %s2321_s22, %s3444_s20, %s3444_s20, %s3445_s2   ;;  %v2289_v28 = vsel %vm994_vm2, %v2232_v4, 0.0  ;;  %v3446_v47 = vmov 1966171168   ;;  %v2164_v12 = vrot.slane %v2095_v54, %v3823_v19  ;;  %v2168_v23 = vrot.slane %v2095_v54, %v3826_v20 }
 0x335   : > { %v2114_v9 = vadd.f32 %v2113_v35, %v2112_v53  ;;  %v2250_v17 = vrot.slane %v2249_v58, 4  ;;  %v2154_v13 = vrot.slane %v2153_v24, 4  ;;  %v2290_v46 = vadd.f32 %v2289_v28, %v2288_v51  ;;  %s2546_s13 = sshll.u32 %s3770_s5, 4  ;;  %s2659_s10 = sshll.u32 %s3514_s11, 8 }
 0x336   : > { %v2177_v41 = vunpack.c.l.s4 %v3446_v47  ;;  %v5303_v34 = vlaneseq  ;;  %s439_s17 = scalar_lea.vmem [#allocation15], %s2546_s13  ;;  %s5074_s16 = scalar_lea.hbm %s5126_s8, %s2659_s10 }
 0x337   : > { %v2115_v63 = vrot.slane %v2114_v9, 2  ;;  %v2251_v6 = vadd.f32 %v2250_v17, %v2249_v58  ;;  %v2155_v36 = vadd.f32 %v2154_v13, %v2153_v24  ;;  %v2291_v60 = vrot.slane %v2290_v46, 4  ;;  %s2357_s0 = sshll.u32 %s439_s17, 4  ;;  %s2326_s26 = scalar_lea.sflag [#allocation16], %s3770_s5  ;;  %s5076_s0 = int_to_ptr.vmem [resolvable:$true] %s2357_s0 }
 0x338   : > { %v2178_v1 = vunpack.c.0.s8 %v2177_v41  ;;  %vm2193_vm8 = vcmp.lt.s32.totalorder %v5303_v34, 144  ;;  %s3343_s24 = scalar_lea.vmem %s5076_s0, 256  ;;  %s3447_s11 = smov [#allocation15]  }
 0x339   : > { %v2116_v27 = vadd.f32 %v2115_v63, %v2114_v9  ;;  %v2252_v32 = vrot.slane %v2251_v6, 2  ;;  %v2156_v59 = vrot.slane %v2155_v36, 2  ;;  %v2292_v22 = vadd.f32 %v2291_v60, %v2290_v46  ;;  %p3344_p10 = scmp.ne.s32.totalorder %s5076_s0, %s3343_s24  ;;  %s3347_s23 = sshll.u32 %s3447_s11, 4  ;;  %s3348_s23 = int_to_ptr.vmem [resolvable:$false] %s3347_s23 }
 0x33a   : > { %v2181_v33 = vsub.s32 %v2178_v1, %v3820_v18  ;;  %s3349_s4 = scalar_lea.vmem %s3348_s23, 512  ;;  %p3350_p8 = scmp.lt.s32.totalorder %s5076_s0, %s3348_s23 }
 0x33b   : > { %v2117_v21 = vrot.slane %v2116_v27, 1  ;;  %v2253_v40 = vadd.f32 %v2252_v32, %v2251_v6  ;;  %v2157_v5 = vadd.f32 %v2156_v59, %v2155_v36  ;;  %v2293_v2 = vrot.slane %v2292_v22, 2  ;;  %p3345_p12 = pnand %p3344_p10, %p5302_p3  ;;  %p3351_p2 = scmp.lt.s32.totalorder %s3349_s4, %s3343_s24 }
 0x33d   : > { %v2118_v42 = vadd.f32 %v2117_v21, %v2116_v27  ;;  %v2254_v37 = vrot.slane %v2253_v40, 1  ;;  %v2158_v10 = vrot.slane %v2157_v5, 1  ;;  %v2294_v30 = vadd.f32 %v2293_v2, %v2292_v22  ;;  %p3346_p13 = pneg %p3345_p12  ;;  %p3352_p9 = por %p3351_p2, %p3350_p8 }
 0x33f   : > { %v2255_v31 = vadd.f32 %v2254_v37, %v2253_v40  ;;  %v2159_v43 = vadd.f32 %v2158_v10, %v2157_v5  ;;  %v2295_v29 = vrot.slane %v2294_v30, 1  ;;  %v2171_v49 = vmul.f32 %v2164_v12, %v2118_v42  ;;  %p3353_p5 = pnand %p3352_p9, %p3346_p13 }
 0x341   : > { %v2172_v8 = vmul.f32 %v2168_v23, %v2159_v43  ;;  %v2296_v50 = vadd.f32 %v2295_v29, %v2294_v30  ;;  %v2297_v52 = vmul.f32 %v2255_v31, %v2164_v12 }
 0x343   : > { %v2175_v19 = vcombine.low %v2171_v49, %v2172_v8  ;;  %v2298_v39 = vmul.f32 %v2296_v50, %v2168_v23 }
 0x345   : > { %v2301_v20 = vcombine.low %v2297_v52, %v2298_v39  ;;  %v2182_v61 = vrot.slane %v2175_v19, %v2181_v33 }
 0x347   : > { %v2189_v45 = vrot.slane %v2182_v61, %v2181_v33  ;;  %v2308_v62 = vrot.slane %v2301_v20, %v2181_v33 }
 0x349   : > { %2195 = vst.msk [vmem:[%s439_s17] ss:$8 sm:$0x3] %vm2193_vm8, %v2189_v45  ;;  %v2315_v16 = vrot.slane %v2308_v62, %v2181_v33 }
 0x34b   : > { %2628 = vst.msk [vmem:[%s439_s17 + $0x1] ss:$8 sm:$0x3] %vm2193_vm8, %v2315_v16 }
 0x34c   : > { %3356 = shalt.err (!%p3353_p5)
}
 0x34d   : > { %s3357_s5 = scalar_lea.hbm %s5074_s16, 256  ;;  %s3361_s19 = scalar_lea.hbm %s5126_s8, 512 }
 0x34e   : > { %p3358_p7 = scmp.ne.s32.totalorder %s5074_s16, %s3357_s5  ;;  %p3362_p6 = scmp.lt.u32.totalorder %s5074_s16, %s5126_s8 }
 0x34f   : > { %p3363_p11 = scmp.lt.u32.totalorder %s3361_s19, %s3357_s5  ;;  %p3365_p10 = scmp.lt.u32.totalorder %s3357_s5, %s5074_s16 }
 0x350   : > { %p3359_p4 = pnand %p3358_p7, %p5302_p3 }
 0x351   : > { %p3364_p0 = por %p3363_p11, %p3362_p6 }
 0x352   : > { %p3360_p1 = pneg %p3359_p4 }
 0x353   : > { %p3366_p12 = por %p3365_p10, %p3364_p0 }
 0x355   : > { %p3367_p13 = pnand %p3366_p12, %p3360_p1 }
 0x357   : > { %3370 = shalt.err (!%p3367_p13)
}
 0x358   : > { %2762 = dma.vmem_to_hbm [thread:$0]  (%p5302_p3), %s5076_s0, 256, %s5074_s16, %s2326_s26  }
 0x359 PF: > { %s2369_s2 = sand.u32 1, %s3417_s27   ;;  %p5304_p8 = scmp.ne.s32.totalorder %s5188_s21, 0 }
 0x35a   : > { %p5305_p2 = scmp.ge.s32.totalorder %s3429_s30, 2  ;;  %s2370_s13 = scalar_lea.sflag [#allocation4], %s2369_s2 }
 0x35c   : > { %p2789_p9 = pnand %p5305_p2, %p5304_p8 }
 0x35e   : > { %3408 = dma.done.wait (!%p2789_p9), %s2370_s13, 2304  }
 0x35f   : > { %3410 = vsyncadd (!%p2789_p9), %s2370_s13, 4294964992  ;;  %s2379_s10 = scalar_lea.sflag [#allocation16], %s2369_s2 }
 0x360   : > { %3412 = dma.done.wait (!%p2789_p9), %s2379_s10, 256  }
 0x361   : > { %3414 = vsyncadd (!%p2789_p9), %s2379_s10, 4294967040  ;;  %p30_p3 = scmp.ge.s32.totalorder %s3647_s15, 4   ;;  %s5306_s27 = smov %s3421_s28 }
 0x362   : > { %s5307_s28 = smov %s3425_s29  ;;  %s5308_s29 = smov %s3659_s25 }
 0x363   : > { %s5309_s30 = smov %s3647_s15  ;;  %32 = sbr.rel (!%p30_p3) target bundleno = 17 (0x11), region = 144 }
 0x36a   :  { %2384 = vsyncpa [#allocation3], 1 }
 0x36b   :  { %2386 = vsyncpa [#allocation3 + $0x1], 1 }
 0x36c   :  { %2387 = vsyncpa [#allocation6], 1 }
 0x36d   :  { %2388 = vsyncpa [#allocation9], 1 }
 0x36e   :  { %2390 = vsyncpa [#allocation9 + $0x1], 1 }
 0x36f   :  { %2391 = vsyncpa [#allocation12], 1 }
 0x370   :  { %2392 = vsyncpa [#allocation4], 1 }
 0x371   :  { %2394 = vsyncpa [#allocation4 + $0x1], 1 }
 0x372   :  { %2395 = vsyncpa [#allocation16], 1 }
 0x373   :  { %2397 = vsyncpa [#allocation16 + $0x1], 1 }

</bundles_post_ra>
